<compile_context>
chip_gen: v7x
topology: tpu7x:2x2x1
jax: 0.10.0
libtpu: 0.0.40
codegen_flags: <defaults>
</compile_context>

<pallas_src>
import jax
import jax.numpy as jnp
from jax import lax
from jax.experimental import pallas as pl
from jax.experimental.pallas import tpu as pltpu

F_IN = 74          # audio feature size (fixed by the module)
HID = 64           # LSTM hidden size
OUT = 64           # linear_1 out_size
NUM_CLASSES = 2    # args.num_classes (synthetic)
BT = 8             # batch tile (one sublane group)

# TODO(synk): LSTM layers 1..3, the use_seq=True packed-sequence branch, and
# dropout (identity in eval) are intentionally omitted -- they cannot affect
# the returned tensors of this forward pass.


def _lstm_cls_kernel(x_ref, wih_ref, bx_ref, whh_ref, w1_ref, b1_ref,
                     w2_ref, b2_ref, feat_ref, pred_ref, gx_ref):
    """Layer-0 bidirectional LSTM recurrence + two linear heads, all in VMEM.

    x_ref   : (S, BT, 74)   time-major input tile
    wih_ref : (74, 512)     [fwd | bwd] input->gate weights, gate order i,f,o,g
    bx_ref  : (1, 512)      combined b_ih + b_hh, same layout
    whh_ref : (128, 512)    block-diagonal [fwd ; bwd] hidden->gate weights
    w1/b1   : (128, 64) / (1, 64)   linear_1
    w2/b2   : (64, C)  / (1, C)     cls
    gx_ref  : (S, BT, 512)  VMEM scratch: precomputed input projections
    """
    S, BTk, _ = x_ref.shape
    H = HID
    G = 4 * H                       # gates per direction = 256

    # ---- hoisted input projection (independent of the recurrence) ----------
    bx = bx_ref[...]
    for t in range(S):
        gx_ref[t] = (jnp.dot(x_ref[t], wih_ref[...],
                             preferred_element_type=jnp.float32) + bx)

    # ---- bidirectional recurrence: fully unrolled, state in vregs ----------
    # h_cat/c_cat = [fwd | bwd] (BT, 128); one block-diagonal recurrent matmul
    # (BT,128)x(128,512) serves both directions per step.
    h_cat = jnp.zeros((BTk, 2 * H), jnp.float32)
    c_cat = jnp.zeros((BTk, 2 * H), jnp.float32)
    for t in range(S):
        gh = jnp.dot(h_cat, whh_ref[...], preferred_element_type=jnp.float32)
        gates_f = gh[:, :G] + gx_ref[t][:, :G]            # fwd consumes time t
        gates_b = gh[:, G:] + gx_ref[S - 1 - t][:, G:]    # bwd consumes S-1-t
        # gate order per direction is (i, f, o, g): contiguous 192-lane sigmoid
        # region + trailing 64-lane tanh region.
        sig_f = jax.nn.sigmoid(gates_f[:, :3 * H])
        sig_b = jax.nn.sigmoid(gates_b[:, :3 * H])
        g_cat = jnp.tanh(jnp.concatenate([gates_f[:, 3 * H:],
                                          gates_b[:, 3 * H:]], axis=-1))
        i_cat = jnp.concatenate([sig_f[:, 0 * H:1 * H], sig_b[:, 0 * H:1 * H]], axis=-1)
        f_cat = jnp.concatenate([sig_f[:, 1 * H:2 * H], sig_b[:, 1 * H:2 * H]], axis=-1)
        o_cat = jnp.concatenate([sig_f[:, 2 * H:3 * H], sig_b[:, 2 * H:3 * H]], axis=-1)
        c_cat = f_cat * c_cat + i_cat * g_cat
        h_cat = o_cat * jnp.tanh(c_cat)

    # ---- heads: linear_1 on cat(h_fwd, h_bwd), then cls ---------------------
    feat = jnp.dot(h_cat, w1_ref[...], preferred_element_type=jnp.float32) + b1_ref[...]
    pred = jnp.dot(feat, w2_ref[...], preferred_element_type=jnp.float32) + b2_ref[...]
    feat_ref[...] = feat
    pred_ref[...] = pred


def _reorder_gates(w):
    """PyTorch gate-block order (i, f, g, o) -> kernel order (i, f, o, g)."""
    H = HID
    return jnp.concatenate([w[:2 * H], w[3 * H:4 * H], w[2 * H:3 * H]], axis=0)


def _prepare_kernel_params(p):
    """Build the kernel-layout weights from PyTorch-layout parameters."""
    H = HID
    # input->gate: (74, 512) = [fwd 256 | bwd 256], per-direction order i,f,o,g
    wih = jnp.concatenate([_reorder_gates(p["w_ih_f"]).T,
                           _reorder_gates(p["w_ih_b"]).T], axis=1)
    # combined biases (b_ih + b_hh), same layout
    bx = jnp.concatenate([_reorder_gates(p["b_ih_f"] + p["b_hh_f"]),
                          _reorder_gates(p["b_ih_b"] + p["b_hh_b"])])[None, :]
    # hidden->gate, block-diagonal: rows [h_fwd | h_bwd] -> cols [fwd | bwd]
    whh_f = _reorder_gates(p["w_hh_f"]).T                   # (64, 256)
    whh_b = _reorder_gates(p["w_hh_b"]).T
    z = jnp.zeros((H, 4 * H), jnp.float32)
    whh = jnp.concatenate([jnp.concatenate([whh_f, z], axis=1),
                           jnp.concatenate([z, whh_b], axis=1)], axis=0)  # (128, 512)
    return {
        "wih": wih, "bx": bx, "whh": whh,
        "w1": p["w1"].T, "b1": p["b1"][None, :],
        "w2": p["w2"].T, "b2": p["b2"][None, :],
    }


@jax.jit
def mosei_a_cls_forward(x_bsf, params):
    """x_bsf: (B, S, 74) float32. Returns dict matching the PyTorch module."""
    B, S, _ = x_bsf.shape
    B_pad = max(BT, ((B + BT - 1) // BT) * BT)

    # glue: 'b s f -> s b f' + batch pad to a sublane multiple (tiny, XLA-fused)
    x_t = jnp.transpose(x_bsf.astype(jnp.float32), (1, 0, 2))
    x_t = jnp.pad(x_t, ((0, 0), (0, B_pad - B), (0, 0)))

    kp = _prepare_kernel_params(params)

    feat_p, pred_p = pl.pallas_call(
        _lstm_cls_kernel,
        out_shape=(jax.ShapeDtypeStruct((B_pad, OUT), jnp.float32),
                   jax.ShapeDtypeStruct((B_pad, NUM_CLASSES), jnp.float32)),
        grid=(B_pad // BT,),
        in_specs=[
            pl.BlockSpec((S, BT, F_IN), lambda i: (0, i, 0)),
            pl.BlockSpec((F_IN, 8 * HID), lambda i: (0, 0)),
            pl.BlockSpec((1, 8 * HID), lambda i: (0, 0)),
            pl.BlockSpec((2 * HID, 8 * HID), lambda i: (0, 0)),
            pl.BlockSpec((2 * HID, OUT), lambda i: (0, 0)),
            pl.BlockSpec((1, OUT), lambda i: (0, 0)),
            pl.BlockSpec((OUT, NUM_CLASSES), lambda i: (0, 0)),
            pl.BlockSpec((1, NUM_CLASSES), lambda i: (0, 0)),
        ],
        out_specs=(pl.BlockSpec((BT, OUT), lambda i: (i, 0)),
                   pl.BlockSpec((BT, NUM_CLASSES), lambda i: (i, 0))),
        scratch_shapes=[pltpu.VMEM((S, BT, 8 * HID), jnp.float32)],
        compiler_params=pltpu.CompilerParams(
            dimension_semantics=("parallel",)),
    )(x_t, kp["wih"], kp["bx"], kp["whh"], kp["w1"], kp["b1"], kp["w2"], kp["b2"])

    feat = feat_p[:B]
    pred = pred_p[:B]
    return {"preds": {"combined": pred}, "features": {"combined": feat}}


def init_params(key):
    """Deterministic synthetic parameters in PyTorch layout / gate order."""
    ks = jax.random.split(key, 16)
    k_lstm = HID ** -0.5
    k_l1 = (2 * HID) ** -0.5
    k_l2 = OUT ** -0.5

    def u(k, shape, bound):
        return jax.random.uniform(k, shape, jnp.float32, -bound, bound)

    return {
        # layer-0 forward direction (PyTorch shapes: (4H, in), gate order i,f,g,o)
        "w_ih_f": u(ks[0], (4 * HID, F_IN), k_lstm),
        "w_hh_f": u(ks[1], (4 * HID, HID), k_lstm),
        "b_ih_f": u(ks[2], (4 * HID,), k_lstm),
        "b_hh_f": u(ks[3], (4 * HID,), k_lstm),
        # layer-0 backward direction
        "w_ih_b": u(ks[4], (4 * HID, F_IN), k_lstm),
        "w_hh_b": u(ks[5], (4 * HID, HID), k_lstm),
        "b_ih_b": u(ks[6], (4 * HID,), k_lstm),
        "b_hh_b": u(ks[7], (4 * HID,), k_lstm),
        # linear_1: (out, in) = (64, 128)
        "w1": u(ks[8], (OUT, 2 * HID), k_l1),
        "b1": u(ks[9], (OUT,), k_l1),
        # cls: (num_classes, 64)
        "w2": u(ks[10], (NUM_CLASSES, OUT), k_l2),
        "b2": u(ks[11], (NUM_CLASSES,), k_l2),
    }


def _reference(x_bsf, p):
    """Pure-JAX reference using PyTorch layout / gate order (i, f, g, o)."""
    x = jnp.transpose(x_bsf, (1, 0, 2)).astype(jnp.float32)   # (S, B, F)
    B = x.shape[1]
    H = HID

    def make_step(wih, whh, bih, bhh):
        def step(carry, x_t):
            h, c = carry
            g = x_t @ wih.T + h @ whh.T + bih + bhh
            i = jax.nn.sigmoid(g[:, :H])
            f = jax.nn.sigmoid(g[:, H:2 * H])
            gg = jnp.tanh(g[:, 2 * H:3 * H])
            o = jax.nn.sigmoid(g[:, 3 * H:])
            c = f * c + i * gg
            h = o * jnp.tanh(c)
            return (h, c), None
        return step

    z = (jnp.zeros((B, H), jnp.float32), jnp.zeros((B, H), jnp.float32))
    (hf, _), _ = lax.scan(make_step(p["w_ih_f"], p["w_hh_f"],
                                    p["b_ih_f"], p["b_hh_f"]), z, x)
    (hb, _), _ = lax.scan(make_step(p["w_ih_b"], p["w_hh_b"],
                                    p["b_ih_b"], p["b_hh_b"]), z, x[::-1])
    h = jnp.concatenate([hf, hb], axis=-1)
    feat = h @ p["w1"].T + p["b1"]
    pred = feat @ p["w2"].T + p["b2"]
    return feat, pred


if __name__ == "__main__":
    key = jax.random.PRNGKey(0)
    k_x, k_p = jax.random.split(key)

    B, S = 2, 8
    x = jax.random.normal(k_x, (B, S, F_IN), jnp.float32)
    params = init_params(k_p)

    out = mosei_a_cls_forward(x, params)
    jax.block_until_ready(out)

    pred = out["preds"]["combined"]
    feat = out["features"]["combined"]
    assert pred.shape == (B, NUM_CLASSES) and feat.shape == (B, OUT)

    feat_ref, pred_ref = _reference(x, params)
    assert jnp.allclose(feat, feat_ref, atol=2e-4, rtol=2e-4)
    assert jnp.allclose(pred, pred_ref, atol=2e-4, rtol=2e-4)

    print("KERNEL_OK")
</pallas_src>

<mosaic_0001>
module attributes {stable_mosaic.version = 11 : i64} {
  func.func @_lstm_cls_kernel(%arg0: i32, %arg1: memref<8x8x74xf32, #tpu.memory_space<vmem>>, %arg2: memref<74x512xf32, #tpu.memory_space<vmem>>, %arg3: memref<1x512xf32, #tpu.memory_space<vmem>>, %arg4: memref<128x512xf32, #tpu.memory_space<vmem>>, %arg5: memref<128x64xf32, #tpu.memory_space<vmem>>, %arg6: memref<1x64xf32, #tpu.memory_space<vmem>>, %arg7: memref<64x2xf32, #tpu.memory_space<vmem>>, %arg8: memref<1x2xf32, #tpu.memory_space<vmem>>, %arg9: memref<8x64xf32, #tpu.memory_space<vmem>>, %arg10: memref<8x2xf32, #tpu.memory_space<vmem>>, %arg11: memref<8x8x512xf32, #tpu.memory_space<vmem>>) attributes {dimension_semantics = [#tpu.dimension_semantics<parallel>], iteration_bounds = array<i64: 1>, scalar_prefetch = 0 : i64, scratch_operands = 1 : i64, tpu.core_type = #tpu.core_type<tc>, window_params = [{transform_indices = @transform_0, window_bounds = array<i64: 8, 8, 74>}, {pipeline_mode = #tpu.pipeline_mode<synchronous>, transform_indices = @transform_1, window_bounds = array<i64: 74, 512>}, {pipeline_mode = #tpu.pipeline_mode<synchronous>, transform_indices = @transform_2, window_bounds = array<i64: 1, 512>}, {pipeline_mode = #tpu.pipeline_mode<synchronous>, transform_indices = @transform_3, window_bounds = array<i64: 128, 512>}, {pipeline_mode = #tpu.pipeline_mode<synchronous>, transform_indices = @transform_4, window_bounds = array<i64: 128, 64>}, {pipeline_mode = #tpu.pipeline_mode<synchronous>, transform_indices = @transform_5, window_bounds = array<i64: 1, 64>}, {pipeline_mode = #tpu.pipeline_mode<synchronous>, transform_indices = @transform_6, window_bounds = array<i64: 64, 2>}, {pipeline_mode = #tpu.pipeline_mode<synchronous>, transform_indices = @transform_7, window_bounds = array<i64: 1, 2>}, {transform_indices = @transform_8, window_bounds = array<i64: 8, 64>}, {transform_indices = @transform_9, window_bounds = array<i64: 8, 2>}]} {
    %c0 = arith.constant 0 : index
    %c0_0 = arith.constant 0 : index
    %0 = vector.load %arg3[%c0, %c0_0] : memref<1x512xf32, #tpu.memory_space<vmem>>, vector<1x512xf32>
    %c0_1 = arith.constant 0 : index
    %c0_2 = arith.constant 0 : index
    %c0_3 = arith.constant 0 : index
    %1 = vector.load %arg1[%c0_1, %c0_2, %c0_3] : memref<8x8x74xf32, #tpu.memory_space<vmem>>, vector<1x8x74xf32>
    %2 = vector.shape_cast %1 : vector<1x8x74xf32> to vector<8x74xf32>
    %c0_4 = arith.constant 0 : index
    %c0_5 = arith.constant 0 : index
    %3 = vector.load %arg2[%c0_4, %c0_5] : memref<74x512xf32, #tpu.memory_space<vmem>>, vector<74x512xf32>
    %cst = arith.constant dense<0.000000e+00> : vector<8x512xf32>
    %4 = tpu.matmul %2, %3, %cst {dimension_numbers = #tpu.dot_dimension_numbers<[1], [0], [0], [1], [0, 0, 1, 1], [], []>} : vector<8x74xf32>, vector<74x512xf32>, vector<8x512xf32> -> vector<8x512xf32>
    %5 = vector.broadcast %0 : vector<1x512xf32> to vector<8x512xf32>
    %6 = arith.addf %4, %5 : vector<8x512xf32>
    %c0_6 = arith.constant 0 : index
    %c0_7 = arith.constant 0 : index
    %c0_8 = arith.constant 0 : index
    %7 = vector.load %arg11[%c0_6, %c0_7, %c0_8] : memref<8x8x512xf32, #tpu.memory_space<vmem>>, vector<1x8x512xf32>
    %8 = vector.shape_cast %7 : vector<1x8x512xf32> to vector<8x512xf32>
    %9 = vector.shape_cast %6 : vector<8x512xf32> to vector<1x8x512xf32>
    tpu.vector_store %arg11[%c0_6, %c0_7, %c0_8], %9 {strides = array<i32>} : memref<8x8x512xf32, #tpu.memory_space<vmem>>, vector<1x8x512xf32>,
    %c1 = arith.constant 1 : index
    %c0_9 = arith.constant 0 : index
    %c0_10 = arith.constant 0 : index
    %10 = vector.load %arg1[%c1, %c0_9, %c0_10] : memref<8x8x74xf32, #tpu.memory_space<vmem>>, vector<1x8x74xf32>
    %11 = vector.shape_cast %10 : vector<1x8x74xf32> to vector<8x74xf32>
    %c0_11 = arith.constant 0 : index
    %c0_12 = arith.constant 0 : index
    %12 = vector.load %arg2[%c0_11, %c0_12] : memref<74x512xf32, #tpu.memory_space<vmem>>, vector<74x512xf32>
    %cst_13 = arith.constant dense<0.000000e+00> : vector<8x512xf32>
    %13 = tpu.matmul %11, %12, %cst_13 {dimension_numbers = #tpu.dot_dimension_numbers<[1], [0], [0], [1], [0, 0, 1, 1], [], []>} : vector<8x74xf32>, vector<74x512xf32>, vector<8x512xf32> -> vector<8x512xf32>
    %14 = vector.broadcast %0 : vector<1x512xf32> to vector<8x512xf32>
    %15 = arith.addf %13, %14 : vector<8x512xf32>
    %c1_14 = arith.constant 1 : index
    %c0_15 = arith.constant 0 : index
    %c0_16 = arith.constant 0 : index
    %16 = vector.load %arg11[%c1_14, %c0_15, %c0_16] : memref<8x8x512xf32, #tpu.memory_space<vmem>>, vector<1x8x512xf32>
    %17 = vector.shape_cast %16 : vector<1x8x512xf32> to vector<8x512xf32>
    %18 = vector.shape_cast %15 : vector<8x512xf32> to vector<1x8x512xf32>
    tpu.vector_store %arg11[%c1_14, %c0_15, %c0_16], %18 {strides = array<i32>} : memref<8x8x512xf32, #tpu.memory_space<vmem>>, vector<1x8x512xf32>,
    %c2 = arith.constant 2 : index
    %c0_17 = arith.constant 0 : index
    %c0_18 = arith.constant 0 : index
    %19 = vector.load %arg1[%c2, %c0_17, %c0_18] : memref<8x8x74xf32, #tpu.memory_space<vmem>>, vector<1x8x74xf32>
    %20 = vector.shape_cast %19 : vector<1x8x74xf32> to vector<8x74xf32>
    %c0_19 = arith.constant 0 : index
    %c0_20 = arith.constant 0 : index
    %21 = vector.load %arg2[%c0_19, %c0_20] : memref<74x512xf32, #tpu.memory_space<vmem>>, vector<74x512xf32>
    %cst_21 = arith.constant dense<0.000000e+00> : vector<8x512xf32>
    %22 = tpu.matmul %20, %21, %cst_21 {dimension_numbers = #tpu.dot_dimension_numbers<[1], [0], [0], [1], [0, 0, 1, 1], [], []>} : vector<8x74xf32>, vector<74x512xf32>, vector<8x512xf32> -> vector<8x512xf32>
    %23 = vector.broadcast %0 : vector<1x512xf32> to vector<8x512xf32>
    %24 = arith.addf %22, %23 : vector<8x512xf32>
    %c2_22 = arith.constant 2 : index
    %c0_23 = arith.constant 0 : index
    %c0_24 = arith.constant 0 : index
    %25 = vector.load %arg11[%c2_22, %c0_23, %c0_24] : memref<8x8x512xf32, #tpu.memory_space<vmem>>, vector<1x8x512xf32>
    %26 = vector.shape_cast %25 : vector<1x8x512xf32> to vector<8x512xf32>
    %27 = vector.shape_cast %24 : vector<8x512xf32> to vector<1x8x512xf32>
    tpu.vector_store %arg11[%c2_22, %c0_23, %c0_24], %27 {strides = array<i32>} : memref<8x8x512xf32, #tpu.memory_space<vmem>>, vector<1x8x512xf32>,
    %c3 = arith.constant 3 : index
    %c0_25 = arith.constant 0 : index
    %c0_26 = arith.constant 0 : index
    %28 = vector.load %arg1[%c3, %c0_25, %c0_26] : memref<8x8x74xf32, #tpu.memory_space<vmem>>, vector<1x8x74xf32>
    %29 = vector.shape_cast %28 : vector<1x8x74xf32> to vector<8x74xf32>
    %c0_27 = arith.constant 0 : index
    %c0_28 = arith.constant 0 : index
    %30 = vector.load %arg2[%c0_27, %c0_28] : memref<74x512xf32, #tpu.memory_space<vmem>>, vector<74x512xf32>
    %cst_29 = arith.constant dense<0.000000e+00> : vector<8x512xf32>
    %31 = tpu.matmul %29, %30, %cst_29 {dimension_numbers = #tpu.dot_dimension_numbers<[1], [0], [0], [1], [0, 0, 1, 1], [], []>} : vector<8x74xf32>, vector<74x512xf32>, vector<8x512xf32> -> vector<8x512xf32>
    %32 = vector.broadcast %0 : vector<1x512xf32> to vector<8x512xf32>
    %33 = arith.addf %31, %32 : vector<8x512xf32>
    %c3_30 = arith.constant 3 : index
    %c0_31 = arith.constant 0 : index
    %c0_32 = arith.constant 0 : index
    %34 = vector.load %arg11[%c3_30, %c0_31, %c0_32] : memref<8x8x512xf32, #tpu.memory_space<vmem>>, vector<1x8x512xf32>
    %35 = vector.shape_cast %34 : vector<1x8x512xf32> to vector<8x512xf32>
    %36 = vector.shape_cast %33 : vector<8x512xf32> to vector<1x8x512xf32>
    tpu.vector_store %arg11[%c3_30, %c0_31, %c0_32], %36 {strides = array<i32>} : memref<8x8x512xf32, #tpu.memory_space<vmem>>, vector<1x8x512xf32>,
    %c4 = arith.constant 4 : index
    %c0_33 = arith.constant 0 : index
    %c0_34 = arith.constant 0 : index
    %37 = vector.load %arg1[%c4, %c0_33, %c0_34] : memref<8x8x74xf32, #tpu.memory_space<vmem>>, vector<1x8x74xf32>
    %38 = vector.shape_cast %37 : vector<1x8x74xf32> to vector<8x74xf32>
    %c0_35 = arith.constant 0 : index
    %c0_36 = arith.constant 0 : index
    %39 = vector.load %arg2[%c0_35, %c0_36] : memref<74x512xf32, #tpu.memory_space<vmem>>, vector<74x512xf32>
    %cst_37 = arith.constant dense<0.000000e+00> : vector<8x512xf32>
    %40 = tpu.matmul %38, %39, %cst_37 {dimension_numbers = #tpu.dot_dimension_numbers<[1], [0], [0], [1], [0, 0, 1, 1], [], []>} : vector<8x74xf32>, vector<74x512xf32>, vector<8x512xf32> -> vector<8x512xf32>
    %41 = vector.broadcast %0 : vector<1x512xf32> to vector<8x512xf32>
    %42 = arith.addf %40, %41 : vector<8x512xf32>
    %c4_38 = arith.constant 4 : index
    %c0_39 = arith.constant 0 : index
    %c0_40 = arith.constant 0 : index
    %43 = vector.load %arg11[%c4_38, %c0_39, %c0_40] : memref<8x8x512xf32, #tpu.memory_space<vmem>>, vector<1x8x512xf32>
    %44 = vector.shape_cast %43 : vector<1x8x512xf32> to vector<8x512xf32>
    %45 = vector.shape_cast %42 : vector<8x512xf32> to vector<1x8x512xf32>
    tpu.vector_store %arg11[%c4_38, %c0_39, %c0_40], %45 {strides = array<i32>} : memref<8x8x512xf32, #tpu.memory_space<vmem>>, vector<1x8x512xf32>,
    %c5 = arith.constant 5 : index
    %c0_41 = arith.constant 0 : index
    %c0_42 = arith.constant 0 : index
    %46 = vector.load %arg1[%c5, %c0_41, %c0_42] : memref<8x8x74xf32, #tpu.memory_space<vmem>>, vector<1x8x74xf32>
    %47 = vector.shape_cast %46 : vector<1x8x74xf32> to vector<8x74xf32>
    %c0_43 = arith.constant 0 : index
    %c0_44 = arith.constant 0 : index
    %48 = vector.load %arg2[%c0_43, %c0_44] : memref<74x512xf32, #tpu.memory_space<vmem>>, vector<74x512xf32>
    %cst_45 = arith.constant dense<0.000000e+00> : vector<8x512xf32>
    %49 = tpu.matmul %47, %48, %cst_45 {dimension_numbers = #tpu.dot_dimension_numbers<[1], [0], [0], [1], [0, 0, 1, 1], [], []>} : vector<8x74xf32>, vector<74x512xf32>, vector<8x512xf32> -> vector<8x512xf32>
    %50 = vector.broadcast %0 : vector<1x512xf32> to vector<8x512xf32>
    %51 = arith.addf %49, %50 : vector<8x512xf32>
    %c5_46 = arith.constant 5 : index
    %c0_47 = arith.constant 0 : index
    %c0_48 = arith.constant 0 : index
    %52 = vector.load %arg11[%c5_46, %c0_47, %c0_48] : memref<8x8x512xf32, #tpu.memory_space<vmem>>, vector<1x8x512xf32>
    %53 = vector.shape_cast %52 : vector<1x8x512xf32> to vector<8x512xf32>
    %54 = vector.shape_cast %51 : vector<8x512xf32> to vector<1x8x512xf32>
    tpu.vector_store %arg11[%c5_46, %c0_47, %c0_48], %54 {strides = array<i32>} : memref<8x8x512xf32, #tpu.memory_space<vmem>>, vector<1x8x512xf32>,
    %c6 = arith.constant 6 : index
    %c0_49 = arith.constant 0 : index
    %c0_50 = arith.constant 0 : index
    %55 = vector.load %arg1[%c6, %c0_49, %c0_50] : memref<8x8x74xf32, #tpu.memory_space<vmem>>, vector<1x8x74xf32>
    %56 = vector.shape_cast %55 : vector<1x8x74xf32> to vector<8x74xf32>
    %c0_51 = arith.constant 0 : index
    %c0_52 = arith.constant 0 : index
    %57 = vector.load %arg2[%c0_51, %c0_52] : memref<74x512xf32, #tpu.memory_space<vmem>>, vector<74x512xf32>
    %cst_53 = arith.constant dense<0.000000e+00> : vector<8x512xf32>
    %58 = tpu.matmul %56, %57, %cst_53 {dimension_numbers = #tpu.dot_dimension_numbers<[1], [0], [0], [1], [0, 0, 1, 1], [], []>} : vector<8x74xf32>, vector<74x512xf32>, vector<8x512xf32> -> vector<8x512xf32>
    %59 = vector.broadcast %0 : vector<1x512xf32> to vector<8x512xf32>
    %60 = arith.addf %58, %59 : vector<8x512xf32>
    %c6_54 = arith.constant 6 : index
    %c0_55 = arith.constant 0 : index
    %c0_56 = arith.constant 0 : index
    %61 = vector.load %arg11[%c6_54, %c0_55, %c0_56] : memref<8x8x512xf32, #tpu.memory_space<vmem>>, vector<1x8x512xf32>
    %62 = vector.shape_cast %61 : vector<1x8x512xf32> to vector<8x512xf32>
    %63 = vector.shape_cast %60 : vector<8x512xf32> to vector<1x8x512xf32>
    tpu.vector_store %arg11[%c6_54, %c0_55, %c0_56], %63 {strides = array<i32>} : memref<8x8x512xf32, #tpu.memory_space<vmem>>, vector<1x8x512xf32>,
    %c7 = arith.constant 7 : index
    %c0_57 = arith.constant 0 : index
    %c0_58 = arith.constant 0 : index
    %64 = vector.load %arg1[%c7, %c0_57, %c0_58] : memref<8x8x74xf32, #tpu.memory_space<vmem>>, vector<1x8x74xf32>
    %65 = vector.shape_cast %64 : vector<1x8x74xf32> to vector<8x74xf32>
    %c0_59 = arith.constant 0 : index
    %c0_60 = arith.constant 0 : index
    %66 = vector.load %arg2[%c0_59, %c0_60] : memref<74x512xf32, #tpu.memory_space<vmem>>, vector<74x512xf32>
    %cst_61 = arith.constant dense<0.000000e+00> : vector<8x512xf32>
    %67 = tpu.matmul %65, %66, %cst_61 {dimension_numbers = #tpu.dot_dimension_numbers<[1], [0], [0], [1], [0, 0, 1, 1], [], []>} : vector<8x74xf32>, vector<74x512xf32>, vector<8x512xf32> -> vector<8x512xf32>
    %68 = vector.broadcast %0 : vector<1x512xf32> to vector<8x512xf32>
    %69 = arith.addf %67, %68 : vector<8x512xf32>
    %c7_62 = arith.constant 7 : index
    %c0_63 = arith.constant 0 : index
    %c0_64 = arith.constant 0 : index
    %70 = vector.load %arg11[%c7_62, %c0_63, %c0_64] : memref<8x8x512xf32, #tpu.memory_space<vmem>>, vector<1x8x512xf32>
    %71 = vector.shape_cast %70 : vector<1x8x512xf32> to vector<8x512xf32>
    %72 = vector.shape_cast %69 : vector<8x512xf32> to vector<1x8x512xf32>
    tpu.vector_store %arg11[%c7_62, %c0_63, %c0_64], %72 {strides = array<i32>} : memref<8x8x512xf32, #tpu.memory_space<vmem>>, vector<1x8x512xf32>,
    %cst_65 = arith.constant 0.000000e+00 : f32
    %73 = vector.broadcast %cst_65 : f32 to vector<8x128xf32>
    %cst_66 = arith.constant 0.000000e+00 : f32
    %74 = vector.broadcast %cst_66 : f32 to vector<8x128xf32>
    %c0_67 = arith.constant 0 : index
    %c0_68 = arith.constant 0 : index
    %75 = vector.load %arg4[%c0_67, %c0_68] : memref<128x512xf32, #tpu.memory_space<vmem>>, vector<128x512xf32>
    %cst_69 = arith.constant dense<0.000000e+00> : vector<8x512xf32>
    %76 = tpu.matmul %73, %75, %cst_69 {dimension_numbers = #tpu.dot_dimension_numbers<[1], [0], [0], [1], [0, 0, 1, 1], [], []>} : vector<8x128xf32>, vector<128x512xf32>, vector<8x512xf32> -> vector<8x512xf32>
    %77 = vector.extract_strided_slice %76 {offsets = [0, 0], sizes = [8, 256], strides = [1, 1]} : vector<8x512xf32> to vector<8x256xf32>
    %c0_70 = arith.constant 0 : index
    %c0_71 = arith.constant 0 : index
    %c0_72 = arith.constant 0 : index
    %78 = vector.load %arg11[%c0_70, %c0_71, %c0_72] : memref<8x8x512xf32, #tpu.memory_space<vmem>>, vector<1x8x512xf32>
    %79 = vector.shape_cast %78 : vector<1x8x512xf32> to vector<8x512xf32>
    %80 = vector.extract_strided_slice %79 {offsets = [0, 0], sizes = [8, 256], strides = [1, 1]} : vector<8x512xf32> to vector<8x256xf32>
    %81 = arith.addf %77, %80 : vector<8x256xf32>
    %82 = vector.extract_strided_slice %76 {offsets = [0, 256], sizes = [8, 256], strides = [1, 1]} : vector<8x512xf32> to vector<8x256xf32>
    %c7_73 = arith.constant 7 : index
    %c0_74 = arith.constant 0 : index
    %c0_75 = arith.constant 0 : index
    %83 = vector.load %arg11[%c7_73, %c0_74, %c0_75] : memref<8x8x512xf32, #tpu.memory_space<vmem>>, vector<1x8x512xf32>
    %84 = vector.shape_cast %83 : vector<1x8x512xf32> to vector<8x512xf32>
    %85 = vector.extract_strided_slice %84 {offsets = [0, 256], sizes = [8, 256], strides = [1, 1]} : vector<8x512xf32> to vector<8x256xf32>
    %86 = arith.addf %82, %85 : vector<8x256xf32>
    %87 = vector.extract_strided_slice %81 {offsets = [0, 0], sizes = [8, 192], strides = [1, 1]} : vector<8x256xf32> to vector<8x192xf32>
    %88 = arith.negf %87 : vector<8x192xf32>
    %89 = math.exp %88 : vector<8x192xf32>
    %cst_76 = arith.constant 1.000000e+00 : f32
    %90 = vector.broadcast %cst_76 : f32 to vector<8x192xf32>
    %91 = arith.addf %90, %89 : vector<8x192xf32>
    %92 = arith.divf %90, %91 : vector<8x192xf32>
    %93 = vector.extract_strided_slice %86 {offsets = [0, 0], sizes = [8, 192], strides = [1, 1]} : vector<8x256xf32> to vector<8x192xf32>
    %94 = arith.negf %93 : vector<8x192xf32>
    %95 = math.exp %94 : vector<8x192xf32>
    %cst_77 = arith.constant 1.000000e+00 : f32
    %96 = vector.broadcast %cst_77 : f32 to vector<8x192xf32>
    %97 = arith.addf %96, %95 : vector<8x192xf32>
    %98 = arith.divf %96, %97 : vector<8x192xf32>
    %99 = vector.extract_strided_slice %81 {offsets = [0, 192], sizes = [8, 64], strides = [1, 1]} : vector<8x256xf32> to vector<8x64xf32>
    %100 = vector.extract_strided_slice %86 {offsets = [0, 192], sizes = [8, 64], strides = [1, 1]} : vector<8x256xf32> to vector<8x64xf32>
    %101 = tpu.concatenate %99, %100 in 1 : vector<8x64xf32>, vector<8x64xf32> -> vector<8x128xf32>
    %102 = math.tanh %101 : vector<8x128xf32>
    %103 = vector.extract_strided_slice %92 {offsets = [0, 0], sizes = [8, 64], strides = [1, 1]} : vector<8x192xf32> to vector<8x64xf32>
    %104 = vector.extract_strided_slice %98 {offsets = [0, 0], sizes = [8, 64], strides = [1, 1]} : vector<8x192xf32> to vector<8x64xf32>
    %105 = tpu.concatenate %103, %104 in 1 : vector<8x64xf32>, vector<8x64xf32> -> vector<8x128xf32>
    %106 = vector.extract_strided_slice %92 {offsets = [0, 64], sizes = [8, 64], strides = [1, 1]} : vector<8x192xf32> to vector<8x64xf32>
    %107 = vector.extract_strided_slice %98 {offsets = [0, 64], sizes = [8, 64], strides = [1, 1]} : vector<8x192xf32> to vector<8x64xf32>
    %108 = tpu.concatenate %106, %107 in 1 : vector<8x64xf32>, vector<8x64xf32> -> vector<8x128xf32>
    %109 = vector.extract_strided_slice %92 {offsets = [0, 128], sizes = [8, 64], strides = [1, 1]} : vector<8x192xf32> to vector<8x64xf32>
    %110 = vector.extract_strided_slice %98 {offsets = [0, 128], sizes = [8, 64], strides = [1, 1]} : vector<8x192xf32> to vector<8x64xf32>
    %111 = tpu.concatenate %109, %110 in 1 : vector<8x64xf32>, vector<8x64xf32> -> vector<8x128xf32>
    %112 = arith.mulf %108, %74 : vector<8x128xf32>
    %113 = arith.mulf %105, %102 : vector<8x128xf32>
    %114 = arith.addf %112, %113 : vector<8x128xf32>
    %115 = math.tanh %114 : vector<8x128xf32>
    %116 = arith.mulf %111, %115 : vector<8x128xf32>
    %c0_78 = arith.constant 0 : index
    %c0_79 = arith.constant 0 : index
    %117 = vector.load %arg4[%c0_78, %c0_79] : memref<128x512xf32, #tpu.memory_space<vmem>>, vector<128x512xf32>
    %cst_80 = arith.constant dense<0.000000e+00> : vector<8x512xf32>
    %118 = tpu.matmul %116, %117, %cst_80 {dimension_numbers = #tpu.dot_dimension_numbers<[1], [0], [0], [1], [0, 0, 1, 1], [], []>} : vector<8x128xf32>, vector<128x512xf32>, vector<8x512xf32> -> vector<8x512xf32>
    %119 = vector.extract_strided_slice %118 {offsets = [0, 0], sizes = [8, 256], strides = [1, 1]} : vector<8x512xf32> to vector<8x256xf32>
    %c1_81 = arith.constant 1 : index
    %c0_82 = arith.constant 0 : index
    %c0_83 = arith.constant 0 : index
    %120 = vector.load %arg11[%c1_81, %c0_82, %c0_83] : memref<8x8x512xf32, #tpu.memory_space<vmem>>, vector<1x8x512xf32>
    %121 = vector.shape_cast %120 : vector<1x8x512xf32> to vector<8x512xf32>
    %122 = vector.extract_strided_slice %121 {offsets = [0, 0], sizes = [8, 256], strides = [1, 1]} : vector<8x512xf32> to vector<8x256xf32>
    %123 = arith.addf %119, %122 : vector<8x256xf32>
    %124 = vector.extract_strided_slice %118 {offsets = [0, 256], sizes = [8, 256], strides = [1, 1]} : vector<8x512xf32> to vector<8x256xf32>
    %c6_84 = arith.constant 6 : index
    %c0_85 = arith.constant 0 : index
    %c0_86 = arith.constant 0 : index
    %125 = vector.load %arg11[%c6_84, %c0_85, %c0_86] : memref<8x8x512xf32, #tpu.memory_space<vmem>>, vector<1x8x512xf32>
    %126 = vector.shape_cast %125 : vector<1x8x512xf32> to vector<8x512xf32>
    %127 = vector.extract_strided_slice %126 {offsets = [0, 256], sizes = [8, 256], strides = [1, 1]} : vector<8x512xf32> to vector<8x256xf32>
    %128 = arith.addf %124, %127 : vector<8x256xf32>
    %129 = vector.extract_strided_slice %123 {offsets = [0, 0], sizes = [8, 192], strides = [1, 1]} : vector<8x256xf32> to vector<8x192xf32>
    %130 = arith.negf %129 : vector<8x192xf32>
    %131 = math.exp %130 : vector<8x192xf32>
    %cst_87 = arith.constant 1.000000e+00 : f32
    %132 = vector.broadcast %cst_87 : f32 to vector<8x192xf32>
    %133 = arith.addf %132, %131 : vector<8x192xf32>
    %134 = arith.divf %132, %133 : vector<8x192xf32>
    %135 = vector.extract_strided_slice %128 {offsets = [0, 0], sizes = [8, 192], strides = [1, 1]} : vector<8x256xf32> to vector<8x192xf32>
    %136 = arith.negf %135 : vector<8x192xf32>
    %137 = math.exp %136 : vector<8x192xf32>
    %cst_88 = arith.constant 1.000000e+00 : f32
    %138 = vector.broadcast %cst_88 : f32 to vector<8x192xf32>
    %139 = arith.addf %138, %137 : vector<8x192xf32>
    %140 = arith.divf %138, %139 : vector<8x192xf32>
    %141 = vector.extract_strided_slice %123 {offsets = [0, 192], sizes = [8, 64], strides = [1, 1]} : vector<8x256xf32> to vector<8x64xf32>
    %142 = vector.extract_strided_slice %128 {offsets = [0, 192], sizes = [8, 64], strides = [1, 1]} : vector<8x256xf32> to vector<8x64xf32>
    %143 = tpu.concatenate %141, %142 in 1 : vector<8x64xf32>, vector<8x64xf32> -> vector<8x128xf32>
    %144 = math.tanh %143 : vector<8x128xf32>
    %145 = vector.extract_strided_slice %134 {offsets = [0, 0], sizes = [8, 64], strides = [1, 1]} : vector<8x192xf32> to vector<8x64xf32>
    %146 = vector.extract_strided_slice %140 {offsets = [0, 0], sizes = [8, 64], strides = [1, 1]} : vector<8x192xf32> to vector<8x64xf32>
    %147 = tpu.concatenate %145, %146 in 1 : vector<8x64xf32>, vector<8x64xf32> -> vector<8x128xf32>
    %148 = vector.extract_strided_slice %134 {offsets = [0, 64], sizes = [8, 64], strides = [1, 1]} : vector<8x192xf32> to vector<8x64xf32>
    %149 = vector.extract_strided_slice %140 {offsets = [0, 64], sizes = [8, 64], strides = [1, 1]} : vector<8x192xf32> to vector<8x64xf32>
    %150 = tpu.concatenate %148, %149 in 1 : vector<8x64xf32>, vector<8x64xf32> -> vector<8x128xf32>
    %151 = vector.extract_strided_slice %134 {offsets = [0, 128], sizes = [8, 64], strides = [1, 1]} : vector<8x192xf32> to vector<8x64xf32>
    %152 = vector.extract_strided_slice %140 {offsets = [0, 128], sizes = [8, 64], strides = [1, 1]} : vector<8x192xf32> to vector<8x64xf32>
    %153 = tpu.concatenate %151, %152 in 1 : vector<8x64xf32>, vector<8x64xf32> -> vector<8x128xf32>
    %154 = arith.mulf %150, %114 : vector<8x128xf32>
    %155 = arith.mulf %147, %144 : vector<8x128xf32>
    %156 = arith.addf %154, %155 : vector<8x128xf32>
    %157 = math.tanh %156 : vector<8x128xf32>
    %158 = arith.mulf %153, %157 : vector<8x128xf32>
    %c0_89 = arith.constant 0 : index
    %c0_90 = arith.constant 0 : index
    %159 = vector.load %arg4[%c0_89, %c0_90] : memref<128x512xf32, #tpu.memory_space<vmem>>, vector<128x512xf32>
    %cst_91 = arith.constant dense<0.000000e+00> : vector<8x512xf32>
    %160 = tpu.matmul %158, %159, %cst_91 {dimension_numbers = #tpu.dot_dimension_numbers<[1], [0], [0], [1], [0, 0, 1, 1], [], []>} : vector<8x128xf32>, vector<128x512xf32>, vector<8x512xf32> -> vector<8x512xf32>
    %161 = vector.extract_strided_slice %160 {offsets = [0, 0], sizes = [8, 256], strides = [1, 1]} : vector<8x512xf32> to vector<8x256xf32>
    %c2_92 = arith.constant 2 : index
    %c0_93 = arith.constant 0 : index
    %c0_94 = arith.constant 0 : index
    %162 = vector.load %arg11[%c2_92, %c0_93, %c0_94] : memref<8x8x512xf32, #tpu.memory_space<vmem>>, vector<1x8x512xf32>
    %163 = vector.shape_cast %162 : vector<1x8x512xf32> to vector<8x512xf32>
    %164 = vector.extract_strided_slice %163 {offsets = [0, 0], sizes = [8, 256], strides = [1, 1]} : vector<8x512xf32> to vector<8x256xf32>
    %165 = arith.addf %161, %164 : vector<8x256xf32>
    %166 = vector.extract_strided_slice %160 {offsets = [0, 256], sizes = [8, 256], strides = [1, 1]} : vector<8x512xf32> to vector<8x256xf32>
    %c5_95 = arith.constant 5 : index
    %c0_96 = arith.constant 0 : index
    %c0_97 = arith.constant 0 : index
    %167 = vector.load %arg11[%c5_95, %c0_96, %c0_97] : memref<8x8x512xf32, #tpu.memory_space<vmem>>, vector<1x8x512xf32>
    %168 = vector.shape_cast %167 : vector<1x8x512xf32> to vector<8x512xf32>
    %169 = vector.extract_strided_slice %168 {offsets = [0, 256], sizes = [8, 256], strides = [1, 1]} : vector<8x512xf32> to vector<8x256xf32>
    %170 = arith.addf %166, %169 : vector<8x256xf32>
    %171 = vector.extract_strided_slice %165 {offsets = [0, 0], sizes = [8, 192], strides = [1, 1]} : vector<8x256xf32> to vector<8x192xf32>
    %172 = arith.negf %171 : vector<8x192xf32>
    %173 = math.exp %172 : vector<8x192xf32>
    %cst_98 = arith.constant 1.000000e+00 : f32
    %174 = vector.broadcast %cst_98 : f32 to vector<8x192xf32>
    %175 = arith.addf %174, %173 : vector<8x192xf32>
    %176 = arith.divf %174, %175 : vector<8x192xf32>
    %177 = vector.extract_strided_slice %170 {offsets = [0, 0], sizes = [8, 192], strides = [1, 1]} : vector<8x256xf32> to vector<8x192xf32>
    %178 = arith.negf %177 : vector<8x192xf32>
    %179 = math.exp %178 : vector<8x192xf32>
    %cst_99 = arith.constant 1.000000e+00 : f32
    %180 = vector.broadcast %cst_99 : f32 to vector<8x192xf32>
    %181 = arith.addf %180, %179 : vector<8x192xf32>
    %182 = arith.divf %180, %181 : vector<8x192xf32>
    %183 = vector.extract_strided_slice %165 {offsets = [0, 192], sizes = [8, 64], strides = [1, 1]} : vector<8x256xf32> to vector<8x64xf32>
    %184 = vector.extract_strided_slice %170 {offsets = [0, 192], sizes = [8, 64], strides = [1, 1]} : vector<8x256xf32> to vector<8x64xf32>
    %185 = tpu.concatenate %183, %184 in 1 : vector<8x64xf32>, vector<8x64xf32> -> vector<8x128xf32>
    %186 = math.tanh %185 : vector<8x128xf32>
    %187 = vector.extract_strided_slice %176 {offsets = [0, 0], sizes = [8, 64], strides = [1, 1]} : vector<8x192xf32> to vector<8x64xf32>
    %188 = vector.extract_strided_slice %182 {offsets = [0, 0], sizes = [8, 64], strides = [1, 1]} : vector<8x192xf32> to vector<8x64xf32>
    %189 = tpu.concatenate %187, %188 in 1 : vector<8x64xf32>, vector<8x64xf32> -> vector<8x128xf32>
    %190 = vector.extract_strided_slice %176 {offsets = [0, 64], sizes = [8, 64], strides = [1, 1]} : vector<8x192xf32> to vector<8x64xf32>
    %191 = vector.extract_strided_slice %182 {offsets = [0, 64], sizes = [8, 64], strides = [1, 1]} : vector<8x192xf32> to vector<8x64xf32>
    %192 = tpu.concatenate %190, %191 in 1 : vector<8x64xf32>, vector<8x64xf32> -> vector<8x128xf32>
    %193 = vector.extract_strided_slice %176 {offsets = [0, 128], sizes = [8, 64], strides = [1, 1]} : vector<8x192xf32> to vector<8x64xf32>
    %194 = vector.extract_strided_slice %182 {offsets = [0, 128], sizes = [8, 64], strides = [1, 1]} : vector<8x192xf32> to vector<8x64xf32>
    %195 = tpu.concatenate %193, %194 in 1 : vector<8x64xf32>, vector<8x64xf32> -> vector<8x128xf32>
    %196 = arith.mulf %192, %156 : vector<8x128xf32>
    %197 = arith.mulf %189, %186 : vector<8x128xf32>
    %198 = arith.addf %196, %197 : vector<8x128xf32>
    %199 = math.tanh %198 : vector<8x128xf32>
    %200 = arith.mulf %195, %199 : vector<8x128xf32>
    %c0_100 = arith.constant 0 : index
    %c0_101 = arith.constant 0 : index
    %201 = vector.load %arg4[%c0_100, %c0_101] : memref<128x512xf32, #tpu.memory_space<vmem>>, vector<128x512xf32>
    %cst_102 = arith.constant dense<0.000000e+00> : vector<8x512xf32>
    %202 = tpu.matmul %200, %201, %cst_102 {dimension_numbers = #tpu.dot_dimension_numbers<[1], [0], [0], [1], [0, 0, 1, 1], [], []>} : vector<8x128xf32>, vector<128x512xf32>, vector<8x512xf32> -> vector<8x512xf32>
    %203 = vector.extract_strided_slice %202 {offsets = [0, 0], sizes = [8, 256], strides = [1, 1]} : vector<8x512xf32> to vector<8x256xf32>
    %c3_103 = arith.constant 3 : index
    %c0_104 = arith.constant 0 : index
    %c0_105 = arith.constant 0 : index
    %204 = vector.load %arg11[%c3_103, %c0_104, %c0_105] : memref<8x8x512xf32, #tpu.memory_space<vmem>>, vector<1x8x512xf32>
    %205 = vector.shape_cast %204 : vector<1x8x512xf32> to vector<8x512xf32>
    %206 = vector.extract_strided_slice %205 {offsets = [0, 0], sizes = [8, 256], strides = [1, 1]} : vector<8x512xf32> to vector<8x256xf32>
    %207 = arith.addf %203, %206 : vector<8x256xf32>
    %208 = vector.extract_strided_slice %202 {offsets = [0, 256], sizes = [8, 256], strides = [1, 1]} : vector<8x512xf32> to vector<8x256xf32>
    %c4_106 = arith.constant 4 : index
    %c0_107 = arith.constant 0 : index
    %c0_108 = arith.constant 0 : index
    %209 = vector.load %arg11[%c4_106, %c0_107, %c0_108] : memref<8x8x512xf32, #tpu.memory_space<vmem>>, vector<1x8x512xf32>
    %210 = vector.shape_cast %209 : vector<1x8x512xf32> to vector<8x512xf32>
    %211 = vector.extract_strided_slice %210 {offsets = [0, 256], sizes = [8, 256], strides = [1, 1]} : vector<8x512xf32> to vector<8x256xf32>
    %212 = arith.addf %208, %211 : vector<8x256xf32>
    %213 = vector.extract_strided_slice %207 {offsets = [0, 0], sizes = [8, 192], strides = [1, 1]} : vector<8x256xf32> to vector<8x192xf32>
    %214 = arith.negf %213 : vector<8x192xf32>
    %215 = math.exp %214 : vector<8x192xf32>
    %cst_109 = arith.constant 1.000000e+00 : f32
    %216 = vector.broadcast %cst_109 : f32 to vector<8x192xf32>
    %217 = arith.addf %216, %215 : vector<8x192xf32>
    %218 = arith.divf %216, %217 : vector<8x192xf32>
    %219 = vector.extract_strided_slice %212 {offsets = [0, 0], sizes = [8, 192], strides = [1, 1]} : vector<8x256xf32> to vector<8x192xf32>
    %220 = arith.negf %219 : vector<8x192xf32>
    %221 = math.exp %220 : vector<8x192xf32>
    %cst_110 = arith.constant 1.000000e+00 : f32
    %222 = vector.broadcast %cst_110 : f32 to vector<8x192xf32>
    %223 = arith.addf %222, %221 : vector<8x192xf32>
    %224 = arith.divf %222, %223 : vector<8x192xf32>
    %225 = vector.extract_strided_slice %207 {offsets = [0, 192], sizes = [8, 64], strides = [1, 1]} : vector<8x256xf32> to vector<8x64xf32>
    %226 = vector.extract_strided_slice %212 {offsets = [0, 192], sizes = [8, 64], strides = [1, 1]} : vector<8x256xf32> to vector<8x64xf32>
    %227 = tpu.concatenate %225, %226 in 1 : vector<8x64xf32>, vector<8x64xf32> -> vector<8x128xf32>
    %228 = math.tanh %227 : vector<8x128xf32>
    %229 = vector.extract_strided_slice %218 {offsets = [0, 0], sizes = [8, 64], strides = [1, 1]} : vector<8x192xf32> to vector<8x64xf32>
    %230 = vector.extract_strided_slice %224 {offsets = [0, 0], sizes = [8, 64], strides = [1, 1]} : vector<8x192xf32> to vector<8x64xf32>
    %231 = tpu.concatenate %229, %230 in 1 : vector<8x64xf32>, vector<8x64xf32> -> vector<8x128xf32>
    %232 = vector.extract_strided_slice %218 {offsets = [0, 64], sizes = [8, 64], strides = [1, 1]} : vector<8x192xf32> to vector<8x64xf32>
    %233 = vector.extract_strided_slice %224 {offsets = [0, 64], sizes = [8, 64], strides = [1, 1]} : vector<8x192xf32> to vector<8x64xf32>
    %234 = tpu.concatenate %232, %233 in 1 : vector<8x64xf32>, vector<8x64xf32> -> vector<8x128xf32>
    %235 = vector.extract_strided_slice %218 {offsets = [0, 128], sizes = [8, 64], strides = [1, 1]} : vector<8x192xf32> to vector<8x64xf32>
    %236 = vector.extract_strided_slice %224 {offsets = [0, 128], sizes = [8, 64], strides = [1, 1]} : vector<8x192xf32> to vector<8x64xf32>
    %237 = tpu.concatenate %235, %236 in 1 : vector<8x64xf32>, vector<8x64xf32> -> vector<8x128xf32>
    %238 = arith.mulf %234, %198 : vector<8x128xf32>
    %239 = arith.mulf %231, %228 : vector<8x128xf32>
    %240 = arith.addf %238, %239 : vector<8x128xf32>
    %241 = math.tanh %240 : vector<8x128xf32>
    %242 = arith.mulf %237, %241 : vector<8x128xf32>
    %c0_111 = arith.constant 0 : index
    %c0_112 = arith.constant 0 : index
    %243 = vector.load %arg4[%c0_111, %c0_112] : memref<128x512xf32, #tpu.memory_space<vmem>>, vector<128x512xf32>
    %cst_113 = arith.constant dense<0.000000e+00> : vector<8x512xf32>
    %244 = tpu.matmul %242, %243, %cst_113 {dimension_numbers = #tpu.dot_dimension_numbers<[1], [0], [0], [1], [0, 0, 1, 1], [], []>} : vector<8x128xf32>, vector<128x512xf32>, vector<8x512xf32> -> vector<8x512xf32>
    %245 = vector.extract_strided_slice %244 {offsets = [0, 0], sizes = [8, 256], strides = [1, 1]} : vector<8x512xf32> to vector<8x256xf32>
    %c4_114 = arith.constant 4 : index
    %c0_115 = arith.constant 0 : index
    %c0_116 = arith.constant 0 : index
    %246 = vector.load %arg11[%c4_114, %c0_115, %c0_116] : memref<8x8x512xf32, #tpu.memory_space<vmem>>, vector<1x8x512xf32>
    %247 = vector.shape_cast %246 : vector<1x8x512xf32> to vector<8x512xf32>
    %248 = vector.extract_strided_slice %247 {offsets = [0, 0], sizes = [8, 256], strides = [1, 1]} : vector<8x512xf32> to vector<8x256xf32>
    %249 = arith.addf %245, %248 : vector<8x256xf32>
    %250 = vector.extract_strided_slice %244 {offsets = [0, 256], sizes = [8, 256], strides = [1, 1]} : vector<8x512xf32> to vector<8x256xf32>
    %c3_117 = arith.constant 3 : index
    %c0_118 = arith.constant 0 : index
    %c0_119 = arith.constant 0 : index
    %251 = vector.load %arg11[%c3_117, %c0_118, %c0_119] : memref<8x8x512xf32, #tpu.memory_space<vmem>>, vector<1x8x512xf32>
    %252 = vector.shape_cast %251 : vector<1x8x512xf32> to vector<8x512xf32>
    %253 = vector.extract_strided_slice %252 {offsets = [0, 256], sizes = [8, 256], strides = [1, 1]} : vector<8x512xf32> to vector<8x256xf32>
    %254 = arith.addf %250, %253 : vector<8x256xf32>
    %255 = vector.extract_strided_slice %249 {offsets = [0, 0], sizes = [8, 192], strides = [1, 1]} : vector<8x256xf32> to vector<8x192xf32>
    %256 = arith.negf %255 : vector<8x192xf32>
    %257 = math.exp %256 : vector<8x192xf32>
    %cst_120 = arith.constant 1.000000e+00 : f32
    %258 = vector.broadcast %cst_120 : f32 to vector<8x192xf32>
    %259 = arith.addf %258, %257 : vector<8x192xf32>
    %260 = arith.divf %258, %259 : vector<8x192xf32>
    %261 = vector.extract_strided_slice %254 {offsets = [0, 0], sizes = [8, 192], strides = [1, 1]} : vector<8x256xf32> to vector<8x192xf32>
    %262 = arith.negf %261 : vector<8x192xf32>
    %263 = math.exp %262 : vector<8x192xf32>
    %cst_121 = arith.constant 1.000000e+00 : f32
    %264 = vector.broadcast %cst_121 : f32 to vector<8x192xf32>
    %265 = arith.addf %264, %263 : vector<8x192xf32>
    %266 = arith.divf %264, %265 : vector<8x192xf32>
    %267 = vector.extract_strided_slice %249 {offsets = [0, 192], sizes = [8, 64], strides = [1, 1]} : vector<8x256xf32> to vector<8x64xf32>
    %268 = vector.extract_strided_slice %254 {offsets = [0, 192], sizes = [8, 64], strides = [1, 1]} : vector<8x256xf32> to vector<8x64xf32>
    %269 = tpu.concatenate %267, %268 in 1 : vector<8x64xf32>, vector<8x64xf32> -> vector<8x128xf32>
    %270 = math.tanh %269 : vector<8x128xf32>
    %271 = vector.extract_strided_slice %260 {offsets = [0, 0], sizes = [8, 64], strides = [1, 1]} : vector<8x192xf32> to vector<8x64xf32>
    %272 = vector.extract_strided_slice %266 {offsets = [0, 0], sizes = [8, 64], strides = [1, 1]} : vector<8x192xf32> to vector<8x64xf32>
    %273 = tpu.concatenate %271, %272 in 1 : vector<8x64xf32>, vector<8x64xf32> -> vector<8x128xf32>
    %274 = vector.extract_strided_slice %260 {offsets = [0, 64], sizes = [8, 64], strides = [1, 1]} : vector<8x192xf32> to vector<8x64xf32>
    %275 = vector.extract_strided_slice %266 {offsets = [0, 64], sizes = [8, 64], strides = [1, 1]} : vector<8x192xf32> to vector<8x64xf32>
    %276 = tpu.concatenate %274, %275 in 1 : vector<8x64xf32>, vector<8x64xf32> -> vector<8x128xf32>
    %277 = vector.extract_strided_slice %260 {offsets = [0, 128], sizes = [8, 64], strides = [1, 1]} : vector<8x192xf32> to vector<8x64xf32>
    %278 = vector.extract_strided_slice %266 {offsets = [0, 128], sizes = [8, 64], strides = [1, 1]} : vector<8x192xf32> to vector<8x64xf32>
    %279 = tpu.concatenate %277, %278 in 1 : vector<8x64xf32>, vector<8x64xf32> -> vector<8x128xf32>
    %280 = arith.mulf %276, %240 : vector<8x128xf32>
    %281 = arith.mulf %273, %270 : vector<8x128xf32>
    %282 = arith.addf %280, %281 : vector<8x128xf32>
    %283 = math.tanh %282 : vector<8x128xf32>
    %284 = arith.mulf %279, %283 : vector<8x128xf32>
    %c0_122 = arith.constant 0 : index
    %c0_123 = arith.constant 0 : index
    %285 = vector.load %arg4[%c0_122, %c0_123] : memref<128x512xf32, #tpu.memory_space<vmem>>, vector<128x512xf32>
    %cst_124 = arith.constant dense<0.000000e+00> : vector<8x512xf32>
    %286 = tpu.matmul %284, %285, %cst_124 {dimension_numbers = #tpu.dot_dimension_numbers<[1], [0], [0], [1], [0, 0, 1, 1], [], []>} : vector<8x128xf32>, vector<128x512xf32>, vector<8x512xf32> -> vector<8x512xf32>
    %287 = vector.extract_strided_slice %286 {offsets = [0, 0], sizes = [8, 256], strides = [1, 1]} : vector<8x512xf32> to vector<8x256xf32>
    %c5_125 = arith.constant 5 : index
    %c0_126 = arith.constant 0 : index
    %c0_127 = arith.constant 0 : index
    %288 = vector.load %arg11[%c5_125, %c0_126, %c0_127] : memref<8x8x512xf32, #tpu.memory_space<vmem>>, vector<1x8x512xf32>
    %289 = vector.shape_cast %288 : vector<1x8x512xf32> to vector<8x512xf32>
    %290 = vector.extract_strided_slice %289 {offsets = [0, 0], sizes = [8, 256], strides = [1, 1]} : vector<8x512xf32> to vector<8x256xf32>
    %291 = arith.addf %287, %290 : vector<8x256xf32>
    %292 = vector.extract_strided_slice %286 {offsets = [0, 256], sizes = [8, 256], strides = [1, 1]} : vector<8x512xf32> to vector<8x256xf32>
    %c2_128 = arith.constant 2 : index
    %c0_129 = arith.constant 0 : index
    %c0_130 = arith.constant 0 : index
    %293 = vector.load %arg11[%c2_128, %c0_129, %c0_130] : memref<8x8x512xf32, #tpu.memory_space<vmem>>, vector<1x8x512xf32>
    %294 = vector.shape_cast %293 : vector<1x8x512xf32> to vector<8x512xf32>
    %295 = vector.extract_strided_slice %294 {offsets = [0, 256], sizes = [8, 256], strides = [1, 1]} : vector<8x512xf32> to vector<8x256xf32>
    %296 = arith.addf %292, %295 : vector<8x256xf32>
    %297 = vector.extract_strided_slice %291 {offsets = [0, 0], sizes = [8, 192], strides = [1, 1]} : vector<8x256xf32> to vector<8x192xf32>
    %298 = arith.negf %297 : vector<8x192xf32>
    %299 = math.exp %298 : vector<8x192xf32>
    %cst_131 = arith.constant 1.000000e+00 : f32
    %300 = vector.broadcast %cst_131 : f32 to vector<8x192xf32>
    %301 = arith.addf %300, %299 : vector<8x192xf32>
    %302 = arith.divf %300, %301 : vector<8x192xf32>
    %303 = vector.extract_strided_slice %296 {offsets = [0, 0], sizes = [8, 192], strides = [1, 1]} : vector<8x256xf32> to vector<8x192xf32>
    %304 = arith.negf %303 : vector<8x192xf32>
    %305 = math.exp %304 : vector<8x192xf32>
    %cst_132 = arith.constant 1.000000e+00 : f32
    %306 = vector.broadcast %cst_132 : f32 to vector<8x192xf32>
    %307 = arith.addf %306, %305 : vector<8x192xf32>
    %308 = arith.divf %306, %307 : vector<8x192xf32>
    %309 = vector.extract_strided_slice %291 {offsets = [0, 192], sizes = [8, 64], strides = [1, 1]} : vector<8x256xf32> to vector<8x64xf32>
    %310 = vector.extract_strided_slice %296 {offsets = [0, 192], sizes = [8, 64], strides = [1, 1]} : vector<8x256xf32> to vector<8x64xf32>
    %311 = tpu.concatenate %309, %310 in 1 : vector<8x64xf32>, vector<8x64xf32> -> vector<8x128xf32>
    %312 = math.tanh %311 : vector<8x128xf32>
    %313 = vector.extract_strided_slice %302 {offsets = [0, 0], sizes = [8, 64], strides = [1, 1]} : vector<8x192xf32> to vector<8x64xf32>
    %314 = vector.extract_strided_slice %308 {offsets = [0, 0], sizes = [8, 64], strides = [1, 1]} : vector<8x192xf32> to vector<8x64xf32>
    %315 = tpu.concatenate %313, %314 in 1 : vector<8x64xf32>, vector<8x64xf32> -> vector<8x128xf32>
    %316 = vector.extract_strided_slice %302 {offsets = [0, 64], sizes = [8, 64], strides = [1, 1]} : vector<8x192xf32> to vector<8x64xf32>
    %317 = vector.extract_strided_slice %308 {offsets = [0, 64], sizes = [8, 64], strides = [1, 1]} : vector<8x192xf32> to vector<8x64xf32>
    %318 = tpu.concatenate %316, %317 in 1 : vector<8x64xf32>, vector<8x64xf32> -> vector<8x128xf32>
    %319 = vector.extract_strided_slice %302 {offsets = [0, 128], sizes = [8, 64], strides = [1, 1]} : vector<8x192xf32> to vector<8x64xf32>
    %320 = vector.extract_strided_slice %308 {offsets = [0, 128], sizes = [8, 64], strides = [1, 1]} : vector<8x192xf32> to vector<8x64xf32>
    %321 = tpu.concatenate %319, %320 in 1 : vector<8x64xf32>, vector<8x64xf32> -> vector<8x128xf32>
    %322 = arith.mulf %318, %282 : vector<8x128xf32>
    %323 = arith.mulf %315, %312 : vector<8x128xf32>
    %324 = arith.addf %322, %323 : vector<8x128xf32>
    %325 = math.tanh %324 : vector<8x128xf32>
    %326 = arith.mulf %321, %325 : vector<8x128xf32>
    %c0_133 = arith.constant 0 : index
    %c0_134 = arith.constant 0 : index
    %327 = vector.load %arg4[%c0_133, %c0_134] : memref<128x512xf32, #tpu.memory_space<vmem>>, vector<128x512xf32>
    %cst_135 = arith.constant dense<0.000000e+00> : vector<8x512xf32>
    %328 = tpu.matmul %326, %327, %cst_135 {dimension_numbers = #tpu.dot_dimension_numbers<[1], [0], [0], [1], [0, 0, 1, 1], [], []>} : vector<8x128xf32>, vector<128x512xf32>, vector<8x512xf32> -> vector<8x512xf32>
    %329 = vector.extract_strided_slice %328 {offsets = [0, 0], sizes = [8, 256], strides = [1, 1]} : vector<8x512xf32> to vector<8x256xf32>
    %c6_136 = arith.constant 6 : index
    %c0_137 = arith.constant 0 : index
    %c0_138 = arith.constant 0 : index
    %330 = vector.load %arg11[%c6_136, %c0_137, %c0_138] : memref<8x8x512xf32, #tpu.memory_space<vmem>>, vector<1x8x512xf32>
    %331 = vector.shape_cast %330 : vector<1x8x512xf32> to vector<8x512xf32>
    %332 = vector.extract_strided_slice %331 {offsets = [0, 0], sizes = [8, 256], strides = [1, 1]} : vector<8x512xf32> to vector<8x256xf32>
    %333 = arith.addf %329, %332 : vector<8x256xf32>
    %334 = vector.extract_strided_slice %328 {offsets = [0, 256], sizes = [8, 256], strides = [1, 1]} : vector<8x512xf32> to vector<8x256xf32>
    %c1_139 = arith.constant 1 : index
    %c0_140 = arith.constant 0 : index
    %c0_141 = arith.constant 0 : index
    %335 = vector.load %arg11[%c1_139, %c0_140, %c0_141] : memref<8x8x512xf32, #tpu.memory_space<vmem>>, vector<1x8x512xf32>
    %336 = vector.shape_cast %335 : vector<1x8x512xf32> to vector<8x512xf32>
    %337 = vector.extract_strided_slice %336 {offsets = [0, 256], sizes = [8, 256], strides = [1, 1]} : vector<8x512xf32> to vector<8x256xf32>
    %338 = arith.addf %334, %337 : vector<8x256xf32>
    %339 = vector.extract_strided_slice %333 {offsets = [0, 0], sizes = [8, 192], strides = [1, 1]} : vector<8x256xf32> to vector<8x192xf32>
    %340 = arith.negf %339 : vector<8x192xf32>
    %341 = math.exp %340 : vector<8x192xf32>
    %cst_142 = arith.constant 1.000000e+00 : f32
    %342 = vector.broadcast %cst_142 : f32 to vector<8x192xf32>
    %343 = arith.addf %342, %341 : vector<8x192xf32>
    %344 = arith.divf %342, %343 : vector<8x192xf32>
    %345 = vector.extract_strided_slice %338 {offsets = [0, 0], sizes = [8, 192], strides = [1, 1]} : vector<8x256xf32> to vector<8x192xf32>
    %346 = arith.negf %345 : vector<8x192xf32>
    %347 = math.exp %346 : vector<8x192xf32>
    %cst_143 = arith.constant 1.000000e+00 : f32
    %348 = vector.broadcast %cst_143 : f32 to vector<8x192xf32>
    %349 = arith.addf %348, %347 : vector<8x192xf32>
    %350 = arith.divf %348, %349 : vector<8x192xf32>
    %351 = vector.extract_strided_slice %333 {offsets = [0, 192], sizes = [8, 64], strides = [1, 1]} : vector<8x256xf32> to vector<8x64xf32>
    %352 = vector.extract_strided_slice %338 {offsets = [0, 192], sizes = [8, 64], strides = [1, 1]} : vector<8x256xf32> to vector<8x64xf32>
    %353 = tpu.concatenate %351, %352 in 1 : vector<8x64xf32>, vector<8x64xf32> -> vector<8x128xf32>
    %354 = math.tanh %353 : vector<8x128xf32>
    %355 = vector.extract_strided_slice %344 {offsets = [0, 0], sizes = [8, 64], strides = [1, 1]} : vector<8x192xf32> to vector<8x64xf32>
    %356 = vector.extract_strided_slice %350 {offsets = [0, 0], sizes = [8, 64], strides = [1, 1]} : vector<8x192xf32> to vector<8x64xf32>
    %357 = tpu.concatenate %355, %356 in 1 : vector<8x64xf32>, vector<8x64xf32> -> vector<8x128xf32>
    %358 = vector.extract_strided_slice %344 {offsets = [0, 64], sizes = [8, 64], strides = [1, 1]} : vector<8x192xf32> to vector<8x64xf32>
    %359 = vector.extract_strided_slice %350 {offsets = [0, 64], sizes = [8, 64], strides = [1, 1]} : vector<8x192xf32> to vector<8x64xf32>
    %360 = tpu.concatenate %358, %359 in 1 : vector<8x64xf32>, vector<8x64xf32> -> vector<8x128xf32>
    %361 = vector.extract_strided_slice %344 {offsets = [0, 128], sizes = [8, 64], strides = [1, 1]} : vector<8x192xf32> to vector<8x64xf32>
    %362 = vector.extract_strided_slice %350 {offsets = [0, 128], sizes = [8, 64], strides = [1, 1]} : vector<8x192xf32> to vector<8x64xf32>
    %363 = tpu.concatenate %361, %362 in 1 : vector<8x64xf32>, vector<8x64xf32> -> vector<8x128xf32>
    %364 = arith.mulf %360, %324 : vector<8x128xf32>
    %365 = arith.mulf %357, %354 : vector<8x128xf32>
    %366 = arith.addf %364, %365 : vector<8x128xf32>
    %367 = math.tanh %366 : vector<8x128xf32>
    %368 = arith.mulf %363, %367 : vector<8x128xf32>
    %c0_144 = arith.constant 0 : index
    %c0_145 = arith.constant 0 : index
    %369 = vector.load %arg4[%c0_144, %c0_145] : memref<128x512xf32, #tpu.memory_space<vmem>>, vector<128x512xf32>
    %cst_146 = arith.constant dense<0.000000e+00> : vector<8x512xf32>
    %370 = tpu.matmul %368, %369, %cst_146 {dimension_numbers = #tpu.dot_dimension_numbers<[1], [0], [0], [1], [0, 0, 1, 1], [], []>} : vector<8x128xf32>, vector<128x512xf32>, vector<8x512xf32> -> vector<8x512xf32>
    %371 = vector.extract_strided_slice %370 {offsets = [0, 0], sizes = [8, 256], strides = [1, 1]} : vector<8x512xf32> to vector<8x256xf32>
    %c7_147 = arith.constant 7 : index
    %c0_148 = arith.constant 0 : index
    %c0_149 = arith.constant 0 : index
    %372 = vector.load %arg11[%c7_147, %c0_148, %c0_149] : memref<8x8x512xf32, #tpu.memory_space<vmem>>, vector<1x8x512xf32>
    %373 = vector.shape_cast %372 : vector<1x8x512xf32> to vector<8x512xf32>
    %374 = vector.extract_strided_slice %373 {offsets = [0, 0], sizes = [8, 256], strides = [1, 1]} : vector<8x512xf32> to vector<8x256xf32>
    %375 = arith.addf %371, %374 : vector<8x256xf32>
    %376 = vector.extract_strided_slice %370 {offsets = [0, 256], sizes = [8, 256], strides = [1, 1]} : vector<8x512xf32> to vector<8x256xf32>
    %c0_150 = arith.constant 0 : index
    %c0_151 = arith.constant 0 : index
    %c0_152 = arith.constant 0 : index
    %377 = vector.load %arg11[%c0_150, %c0_151, %c0_152] : memref<8x8x512xf32, #tpu.memory_space<vmem>>, vector<1x8x512xf32>
    %378 = vector.shape_cast %377 : vector<1x8x512xf32> to vector<8x512xf32>
    %379 = vector.extract_strided_slice %378 {offsets = [0, 256], sizes = [8, 256], strides = [1, 1]} : vector<8x512xf32> to vector<8x256xf32>
    %380 = arith.addf %376, %379 : vector<8x256xf32>
    %381 = vector.extract_strided_slice %375 {offsets = [0, 0], sizes = [8, 192], strides = [1, 1]} : vector<8x256xf32> to vector<8x192xf32>
    %382 = arith.negf %381 : vector<8x192xf32>
    %383 = math.exp %382 : vector<8x192xf32>
    %cst_153 = arith.constant 1.000000e+00 : f32
    %384 = vector.broadcast %cst_153 : f32 to vector<8x192xf32>
    %385 = arith.addf %384, %383 : vector<8x192xf32>
    %386 = arith.divf %384, %385 : vector<8x192xf32>
    %387 = vector.extract_strided_slice %380 {offsets = [0, 0], sizes = [8, 192], strides = [1, 1]} : vector<8x256xf32> to vector<8x192xf32>
    %388 = arith.negf %387 : vector<8x192xf32>
    %389 = math.exp %388 : vector<8x192xf32>
    %cst_154 = arith.constant 1.000000e+00 : f32
    %390 = vector.broadcast %cst_154 : f32 to vector<8x192xf32>
    %391 = arith.addf %390, %389 : vector<8x192xf32>
    %392 = arith.divf %390, %391 : vector<8x192xf32>
    %393 = vector.extract_strided_slice %375 {offsets = [0, 192], sizes = [8, 64], strides = [1, 1]} : vector<8x256xf32> to vector<8x64xf32>
    %394 = vector.extract_strided_slice %380 {offsets = [0, 192], sizes = [8, 64], strides = [1, 1]} : vector<8x256xf32> to vector<8x64xf32>
    %395 = tpu.concatenate %393, %394 in 1 : vector<8x64xf32>, vector<8x64xf32> -> vector<8x128xf32>
    %396 = math.tanh %395 : vector<8x128xf32>
    %397 = vector.extract_strided_slice %386 {offsets = [0, 0], sizes = [8, 64], strides = [1, 1]} : vector<8x192xf32> to vector<8x64xf32>
    %398 = vector.extract_strided_slice %392 {offsets = [0, 0], sizes = [8, 64], strides = [1, 1]} : vector<8x192xf32> to vector<8x64xf32>
    %399 = tpu.concatenate %397, %398 in 1 : vector<8x64xf32>, vector<8x64xf32> -> vector<8x128xf32>
    %400 = vector.extract_strided_slice %386 {offsets = [0, 64], sizes = [8, 64], strides = [1, 1]} : vector<8x192xf32> to vector<8x64xf32>
    %401 = vector.extract_strided_slice %392 {offsets = [0, 64], sizes = [8, 64], strides = [1, 1]} : vector<8x192xf32> to vector<8x64xf32>
    %402 = tpu.concatenate %400, %401 in 1 : vector<8x64xf32>, vector<8x64xf32> -> vector<8x128xf32>
    %403 = vector.extract_strided_slice %386 {offsets = [0, 128], sizes = [8, 64], strides = [1, 1]} : vector<8x192xf32> to vector<8x64xf32>
    %404 = vector.extract_strided_slice %392 {offsets = [0, 128], sizes = [8, 64], strides = [1, 1]} : vector<8x192xf32> to vector<8x64xf32>
    %405 = tpu.concatenate %403, %404 in 1 : vector<8x64xf32>, vector<8x64xf32> -> vector<8x128xf32>
    %406 = arith.mulf %402, %366 : vector<8x128xf32>
    %407 = arith.mulf %399, %396 : vector<8x128xf32>
    %408 = arith.addf %406, %407 : vector<8x128xf32>
    %409 = math.tanh %408 : vector<8x128xf32>
    %410 = arith.mulf %405, %409 : vector<8x128xf32>
    %c0_155 = arith.constant 0 : index
    %c0_156 = arith.constant 0 : index
    %411 = vector.load %arg5[%c0_155, %c0_156] : memref<128x64xf32, #tpu.memory_space<vmem>>, vector<128x64xf32>
    %cst_157 = arith.constant dense<0.000000e+00> : vector<8x64xf32>
    %412 = tpu.matmul %410, %411, %cst_157 {dimension_numbers = #tpu.dot_dimension_numbers<[1], [0], [0], [1], [0, 0, 1, 1], [], []>} : vector<8x128xf32>, vector<128x64xf32>, vector<8x64xf32> -> vector<8x64xf32>
    %c0_158 = arith.constant 0 : index
    %c0_159 = arith.constant 0 : index
    %413 = vector.load %arg6[%c0_158, %c0_159] : memref<1x64xf32, #tpu.memory_space<vmem>>, vector<1x64xf32>
    %414 = vector.broadcast %413 : vector<1x64xf32> to vector<8x64xf32>
    %415 = arith.addf %412, %414 : vector<8x64xf32>
    %c0_160 = arith.constant 0 : index
    %c0_161 = arith.constant 0 : index
    %416 = vector.load %arg7[%c0_160, %c0_161] : memref<64x2xf32, #tpu.memory_space<vmem>>, vector<64x2xf32>
    %cst_162 = arith.constant dense<0.000000e+00> : vector<8x2xf32>
    %417 = tpu.matmul %415, %416, %cst_162 {dimension_numbers = #tpu.dot_dimension_numbers<[1], [0], [0], [1], [0, 0, 1, 1], [], []>} : vector<8x64xf32>, vector<64x2xf32>, vector<8x2xf32> -> vector<8x2xf32>
    %c0_163 = arith.constant 0 : index
    %c0_164 = arith.constant 0 : index
    %418 = vector.load %arg8[%c0_163, %c0_164] : memref<1x2xf32, #tpu.memory_space<vmem>>, vector<1x2xf32>
    %419 = vector.broadcast %418 : vector<1x2xf32> to vector<8x2xf32>
    %420 = arith.addf %417, %419 : vector<8x2xf32>
    %c0_165 = arith.constant 0 : index
    %c0_166 = arith.constant 0 : index
    %421 = vector.load %arg9[%c0_165, %c0_166] : memref<8x64xf32, #tpu.memory_space<vmem>>, vector<8x64xf32>
    tpu.vector_store %arg9[%c0_165, %c0_166], %415 {strides = array<i32>} : memref<8x64xf32, #tpu.memory_space<vmem>>, vector<8x64xf32>,
    %c0_167 = arith.constant 0 : index
    %c0_168 = arith.constant 0 : index
    %422 = vector.load %arg10[%c0_167, %c0_168] : memref<8x2xf32, #tpu.memory_space<vmem>>, vector<8x2xf32>
    tpu.vector_store %arg10[%c0_167, %c0_168], %420 {strides = array<i32>} : memref<8x2xf32, #tpu.memory_space<vmem>>, vector<8x2xf32>,
    return
  }
  func.func @transform_0(%arg0: i32) -> (i32, i32, i32) {
    %c0_i32 = arith.constant 0 : i32
    %c0_i32_0 = arith.constant 0 : i32
    %c0_i32_1 = arith.constant 0 : i32
    return %c0_i32, %arg0, %c0_i32_0 : i32, i32, i32
  }
  func.func @transform_1(%arg0: i32) -> (i32, i32) {
    %c0_i32 = arith.constant 0 : i32
    %c0_i32_0 = arith.constant 0 : i32
    %c0_i32_1 = arith.constant 0 : i32
    return %c0_i32, %c0_i32_0 : i32, i32
  }
  func.func @transform_2(%arg0: i32) -> (i32, i32) {
    %c0_i32 = arith.constant 0 : i32
    %c0_i32_0 = arith.constant 0 : i32
    %c0_i32_1 = arith.constant 0 : i32
    return %c0_i32, %c0_i32_0 : i32, i32
  }
  func.func @transform_3(%arg0: i32) -> (i32, i32) {
    %c0_i32 = arith.constant 0 : i32
    %c0_i32_0 = arith.constant 0 : i32
    %c0_i32_1 = arith.constant 0 : i32
    return %c0_i32, %c0_i32_0 : i32, i32
  }
  func.func @transform_4(%arg0: i32) -> (i32, i32) {
    %c0_i32 = arith.constant 0 : i32
    %c0_i32_0 = arith.constant 0 : i32
    %c0_i32_1 = arith.constant 0 : i32
    return %c0_i32, %c0_i32_0 : i32, i32
  }
  func.func @transform_5(%arg0: i32) -> (i32, i32) {
    %c0_i32 = arith.constant 0 : i32
    %c0_i32_0 = arith.constant 0 : i32
    %c0_i32_1 = arith.constant 0 : i32
    return %c0_i32, %c0_i32_0 : i32, i32
  }
  func.func @transform_6(%arg0: i32) -> (i32, i32) {
    %c0_i32 = arith.constant 0 : i32
    %c0_i32_0 = arith.constant 0 : i32
    %c0_i32_1 = arith.constant 0 : i32
    return %c0_i32, %c0_i32_0 : i32, i32
  }
  func.func @transform_7(%arg0: i32) -> (i32, i32) {
    %c0_i32 = arith.constant 0 : i32
    %c0_i32_0 = arith.constant 0 : i32
    %c0_i32_1 = arith.constant 0 : i32
    return %c0_i32, %c0_i32_0 : i32, i32
  }
  func.func @transform_8(%arg0: i32) -> (i32, i32) {
    %c0_i32 = arith.constant 0 : i32
    %c0_i32_0 = arith.constant 0 : i32
    return %arg0, %c0_i32 : i32, i32
  }
  func.func @transform_9(%arg0: i32) -> (i32, i32) {
    %c0_i32 = arith.constant 0 : i32
    %c0_i32_0 = arith.constant 0 : i32
    return %arg0, %c0_i32 : i32, i32
  }
}

</mosaic_0001>

<bundles_post_ra>
// kernel: mosei_a_cls_forward.1
= control target key start
LH: loop header
LB: loop body
LE: loop exit
PB: predicated region body
PF: predicated region fallthrough
CT: control target
= control target key end

     0   :  { %v4841_v3 = vmov 0.0   ;;  %vm98_vm0 = vcmask 1041408   ;;  %vm4842_vm1 = vmmov 1   ;;  %vm94_vm3 = vcmask 605184   ;;  %s6341_s1 = inlined_call_operand.vmem [shape: f32[74,512], index: 1, kind: input, shape index: {}]   ;;  %s6342_s0 = inlined_call_operand.vmem [shape: f32[8,8,74], index: 0, kind: input, shape index: {}]   ;;  %s6343_s3 = inlined_call_operand.vmem [shape: f32[128,512], index: 3, kind: input, shape index: {}]   ;;  %s6344_s2 = inlined_call_operand.vmem [shape: f32[1,512], index: 2, kind: input, shape index: {}]   ;;  %s6345_s4 = inlined_call_operand.vmem [shape: f32[128,64], index: 4, kind: input, shape index: {}]   ;;  %s6346_s6 = inlined_call_operand.vmem [shape: f32[64,2], index: 6, kind: input, shape index: {}]   ;;  %s6347_s5 = inlined_call_operand.vmem [shape: f32[1,64], index: 5, kind: input, shape index: {}]   ;;  %s6348_s8 = inlined_call_operand.vmem [shape: f32[8,64], index: 8, kind: output, shape index: {0}]   ;;  %s6349_s7 = inlined_call_operand.vmem [shape: f32[1,2], index: 7, kind: input, shape index: {}]   ;;  %s6350_s9 = inlined_call_operand.vmem [shape: f32[8,2], index: 9, kind: output, shape index: {1}]  }
   0x1   :  { %v34_v0 = vld [vmem:[%s6341_s1 + $0x8] sm:$0xff]  ;;  %v36_v2 = vld [vmem:[%s6341_s1 + $0x18] sm:$0xff]  ;;  %175 = vmatprep.mubr.f32.mxu0 %v4841_v3  ;;  %246 = vmatprep.mubr.f32.mxu1 %v4841_v3  ;;  %v33_v6 = vld [vmem:[%s6341_s1] sm:$0xff]  ;;  %vm1931_vm4 = vcmask 523264   ;;  %vm4845_vm5 = vmmov 0   ;;  %vm3532_vm6 = vcmask 15360  }
   0x2   :  { %v38_v1 = vld [vmem:[%s6341_s1 + $0x28] sm:$0xff]  ;;  %v40_v5 = vld [vmem:[%s6341_s1 + $0x38] sm:$0xff]  ;;  %v37_v7 = vld [vmem:[%s6341_s1 + $0x20] sm:$0xff] }
   0x3   :  { %v4907_v4 = vpack.c.bf16 %v38_v1, %v34_v0  ;;  %v4918_v8 = vpack.c.bf16 %v40_v5, %v36_v2  ;;  %v4920_v9 = vpack.c.bf16 %v37_v7, %v33_v6  ;;  %v35_v10 = vld [vmem:[%s6341_s1 + $0x10] sm:$0xff]  ;;  %v42_v12 = vld [vmem:[%s6341_s1 + $0x48] sm:$0xff]  ;;  %v44_v15 = vld [vmem:[%s6341_s1 + $0x58] sm:$0xff] }
   0x4   :  { %v39_v11 = vld [vmem:[%s6341_s1 + $0x30] sm:$0xff]  ;;  %v46_v14 = vld [vmem:[%s6341_s1 + $0x68] sm:$0xff]  ;;  %v48_v16 = vld [vmem:[%s6341_s1 + $0x78] sm:$0xff] }
   0x5   :  { %3713 = vmatprep.subr.bf16.mxu0 %v4907_v4  ;;  %v4932_v13 = vpack.c.bf16 %v39_v11, %v35_v10  ;;  %3735 = vmatprep.subr.bf16.mxu1 %v4918_v8  ;;  %v4945_v17 = vpack.c.bf16 %v46_v14, %v42_v12  ;;  %v4947_v18 = vpack.c.bf16 %v48_v16, %v44_v15  ;;  %v41_v19 = vld [vmem:[%s6341_s1 + $0x40] sm:$0xff]  ;;  %v43_v21 = vld [vmem:[%s6341_s1 + $0x50] sm:$0xff]  ;;  %v50_v24 = vld [vmem:[%s6341_s1 + $0x88] sm:$0xff] }
   0x6   :  { %3715 = vmatpush1.bf16.msra.mxu0 %v4920_v9  ;;  %v45_v20 = vld [vmem:[%s6341_s1 + $0x60] sm:$0xff]  ;;  %v47_v23 = vld [vmem:[%s6341_s1 + $0x70] sm:$0xff]  ;;  %v54_v25 = vld [vmem:[%s6341_s1 + $0xa8] sm:$0xff] }
   0x7   :  { %3737 = vmatpush1.bf16.msra.mxu1 %v4932_v13  ;;  %v4959_v22 = vpack.c.bf16 %v45_v20, %v41_v19  ;;  %3717 = vmatprep.subr.bf16.mxu0 %v4945_v17  ;;  %v4972_v26 = vpack.c.bf16 %v47_v23, %v43_v21  ;;  %v4974_v27 = vpack.c.bf16 %v54_v25, %v50_v24  ;;  %v52_v28 = vld [vmem:[%s6341_s1 + $0x98] sm:$0xff]  ;;  %v49_v30 = vld [vmem:[%s6341_s1 + $0x80] sm:$0xff]  ;;  %v51_v33 = vld [vmem:[%s6341_s1 + $0x90] sm:$0xff] }
   0x8   :  { %3739 = vmatprep.subr.bf16.mxu1 %v4947_v18  ;;  %v56_v29 = vld [vmem:[%s6341_s1 + $0xb8] sm:$0xff]  ;;  %v53_v32 = vld [vmem:[%s6341_s1 + $0xa0] sm:$0xff]  ;;  %v55_v34 = vld [vmem:[%s6341_s1 + $0xb0] sm:$0xff] }
   0x9   :  { %v4985_v31 = vpack.c.bf16 %v56_v29, %v52_v28  ;;  %v4997_v35 = vpack.c.bf16 %v53_v32, %v49_v30  ;;  %v58_v36 = vld [vmem:[%s6341_s1 + $0xc8] sm:$0xff]  ;;  %v60_v38 = vld [vmem:[%s6341_s1 + $0xd8] sm:$0xff]  ;;  %v5010_v39 = vpack.c.bf16 %v55_v34, %v51_v33  ;;  %v57_v42 = vld [vmem:[%s6341_s1 + $0xc0] sm:$0xff] }
   0xa   :  { %3719 = vmatpush1.bf16.msra.mxu0 %v4959_v22  ;;  %v62_v37 = vld [vmem:[%s6341_s1 + $0xe8] sm:$0xff]  ;;  %v64_v41 = vld [vmem:[%s6341_s1 + $0xf8] sm:$0xff]  ;;  %v61_v43 = vld [vmem:[%s6341_s1 + $0xe0] sm:$0xff] }
   0xb   :  { %3741 = vmatpush1.bf16.msra.mxu1 %v4972_v26  ;;  %3721 = vmatprep.subr.bf16.mxu0 %v4974_v27  ;;  %v5012_v40 = vpack.c.bf16 %v62_v37, %v58_v36  ;;  %v5024_v44 = vpack.c.bf16 %v64_v41, %v60_v38  ;;  %v59_v45 = vld [vmem:[%s6341_s1 + $0xd0] sm:$0xff]  ;;  %v5035_v47 = vld [vmem:[%s6341_s1 + $0x108] sm:$0xff]  ;;  %v5043_v49 = vld [vmem:[%s6341_s1 + $0x118] sm:$0xff]  ;;  %v5046_v50 = vpack.c.bf16 %v61_v43, %v57_v42 }
   0xc   :  { %3743 = vmatprep.subr.bf16.mxu1 %v4985_v31  ;;  %v63_v46 = vld [vmem:[%s6341_s1 + $0xf0] sm:$0xff]  ;;  %v70_v48 = vld [vmem:[%s6341_s1 + $0x128] sm:$0x3]  ;;  %v72_v51 = vld [vmem:[%s6341_s1 + $0x138] sm:$0x3] }
   0xd   :  { %v5053_v52 = vpack.c.bf16 %v63_v46, %v59_v45  ;;  %v3728_v53 = vpack.c.bf16 %v70_v48, %v5035_v47  ;;  %v5059_v54 = vld [vmem:[%s6341_s1 + $0x100] sm:$0xff]  ;;  %vm5065_vm2 = vmpackc.low %vm98_vm0, %vm4842_vm1  ;;  %v3750_v57 = vpack.c.bf16 %v72_v51, %v5043_v49  ;;  %v5073_v58 = vld [vmem:[%s6341_s1 + $0x110] sm:$0xff] }
   0xe   :  { %3723 = vmatpush1.bf16.msra.mxu0 %v4997_v35  ;;  %v69_v55 = vld [vmem:[%s6341_s1 + $0x120] sm:$0x3]  ;;  %v71_v59 = vld [vmem:[%s6341_s1 + $0x130] sm:$0x3]  ;;  %v5089_v62 = vld [vmem:[%s6341_s1 + $0x128] sm:$0x3] }
   0xf   :  { %3745 = vmatpush1.bf16.msra.mxu1 %v5010_v39  ;;  %3725 = vmatprep.subr.bf16.mxu0 %v5012_v40  ;;  %v3731_v60 = vpack.c.bf16 %v69_v55, %v5059_v54  ;;  %v3753_v61 = vpack.c.bf16 %v71_v59, %v5073_v58  ;;  %v5094_v63 = vld [vmem:[%s6341_s1 + $0x138] sm:$0x3]  ;;  %v5099_v0 = vld [vmem:[%s6341_s1 + $0x120] sm:$0x3]  ;;  %v3904_v2 = vpack.c.bf16 %v5089_v62, %v5035_v47  ;;  %v5115_v7 = vld [vmem:[%s6341_s1 + $0x130] sm:$0x3] }
  0x10   :  { %3747 = vmatprep.subr.bf16.mxu1 %v5024_v44  ;;  %v32_v1 = vld [vmem:[%s6342_s0] sm:$0xff]  ;;  %v3926_v5 = vpack.c.bf16 %v5094_v63, %v5043_v49  ;;  %v3907_v6 = vpack.c.bf16 %v5099_v0, %v5059_v54  ;;  %v5120_v10 = vld [vmem:[%s6341_s1 + $0x128] sm:$0x3]  ;;  %v3929_v11 = vpack.c.bf16 %v5115_v7, %v5073_v58  ;;  %v5132_v14 = vld [vmem:[%s6341_s1 + $0x138] sm:$0x3] }
  0x11   :  { %v3948_v12 = vpack.c.bf16 %v5120_v10, %v5035_v47  ;;  %v5137_v15 = vld [vmem:[%s6341_s1 + $0x120] sm:$0x3]  ;;  %v5142_v16 = vld [vmem:[%s6341_s1 + $0x130] sm:$0x3]  ;;  %v3970_v19 = vpack.c.bf16 %v5132_v14, %v5043_v49  ;;  %v296_v23 = vld [vmem:[%s6341_s1 + $0x128] sm:$0x3] }
  0x12   :  { %3727 = vmatpush1.bf16.msra.mxu0 %v5046_v50  ;;  %v3951_v20 = vpack.c.bf16 %v5137_v15, %v5059_v54  ;;  %v3973_v21 = vpack.c.bf16 %v5142_v16, %v5073_v58  ;;  %v298_v24 = vld [vmem:[%s6341_s1 + $0x138] sm:$0x3]  ;;  %v3772_v25 = vpack.c.bf16 %v296_v23, %v5035_v47  ;;  %v295_v28 = vld [vmem:[%s6341_s1 + $0x120] sm:$0x3]  ;;  %v297_v30 = vld [vmem:[%s6341_s1 + $0x130] sm:$0x3] }
  0x13   :  { %3749 = vmatpush1.bf16.msra.mxu1 %v5053_v52  ;;  %3730 = vmatprep.subr.msk.bf16.mxu0 %vm5065_vm2, %v3728_v53  ;;  %v3794_v29 = vpack.c.bf16 %v298_v24, %v5043_v49  ;;  %v3775_v32 = vpack.c.bf16 %v295_v28, %v5059_v54  ;;  %v3797_v33 = vpack.c.bf16 %v297_v30, %v5073_v58  ;;  %v3548_v34 = vld [vmem:[%s6342_s0 + $0x8] sm:$0xff]  ;;  %v502_v37 = vld [vmem:[%s6341_s1 + $0x138] sm:$0x3]  ;;  %v499_v41 = vld [vmem:[%s6341_s1 + $0x120] sm:$0x3] }
  0x14   :  { %3752 = vmatprep.subr.msk.bf16.mxu1 %vm5065_vm2, %v3750_v57  ;;  %v500_v36 = vld [vmem:[%s6341_s1 + $0x128] sm:$0x3]  ;;  %v3838_v42 = vpack.c.bf16 %v502_v37, %v5043_v49  ;;  %v501_v43 = vld [vmem:[%s6341_s1 + $0x130] sm:$0x3]  ;;  %v3819_v45 = vpack.c.bf16 %v499_v41, %v5059_v54  ;;  %v706_v53 = vld [vmem:[%s6341_s1 + $0x138] sm:$0x3] }
  0x15   :  { %v3816_v38 = vpack.c.bf16 %v500_v36, %v5035_v47  ;;  %v3841_v46 = vpack.c.bf16 %v501_v43, %v5073_v58  ;;  %v3555_v48 = vld [vmem:[%s6342_s0 + $0x10] sm:$0xff]  ;;  %v704_v51 = vld [vmem:[%s6341_s1 + $0x128] sm:$0x3]  ;;  %v703_v57 = vld [vmem:[%s6341_s1 + $0x120] sm:$0x3]  ;;  %v3882_v59 = vpack.c.bf16 %v706_v53, %v5043_v49 }
  0x16   :  { %3733 = vmatpush1.bf16.msk.msra.mxu0 %vm5065_vm2, %v3731_v60  ;;  %v3860_v55 = vpack.c.bf16 %v704_v51, %v5035_v47  ;;  %v705_v60 = vld [vmem:[%s6341_s1 + $0x130] sm:$0x3]  ;;  %v3562_v23 = vld [vmem:[%s6342_s0 + $0x18] sm:$0xff]  ;;  %v3569_v24 = vld [vmem:[%s6342_s0 + $0x20] sm:$0xff] }
  0x17   :  { %3755 = vmatpush1.bf16.msk.msra.mxu1 %vm5065_vm2, %v3753_v61  ;;  %3757 = vmatprep.subr.bf16.mxu0 %v4907_v4  ;;  %v3863_v61 = vpack.c.bf16 %v703_v57, %v5059_v54  ;;  %v3576_v47 = vld [vmem:[%s6342_s0 + $0x28] sm:$0xff]  ;;  %v1287_v54 = vld [vmem:[%s6341_s1 + $0x40] sm:$0xff]  ;;  %v1293_v0 = vld [vmem:[%s6341_s1 + $0x70] sm:$0xff] }
  0x18   :  { %3779 = vmatprep.subr.bf16.mxu1 %v4918_v8  ;;  %v1291_v62 = vld [vmem:[%s6341_s1 + $0x60] sm:$0xff]  ;;  %v1302_v7 = vld [vmem:[%s6341_s1 + $0xb8] sm:$0xff]  ;;  %v1297_v16 = vld [vmem:[%s6341_s1 + $0x90] sm:$0xff] }
  0x19   :  { %3544 = vmatmul.mubr.msk.f32.vlgmr.msra.gmra.mrb[0].mxu0 %vm94_vm3, %v32_v1  ;;  %v5453_v10 = vpack.c.bf16 %v1291_v62, %v1287_v54  ;;  %v1295_v14 = vld [vmem:[%s6341_s1 + $0x80] sm:$0xff]  ;;  %v1306_v28 = vld [vmem:[%s6341_s1 + $0xd8] sm:$0xff]  ;;  %v1305_v37 = vld [vmem:[%s6341_s1 + $0xd0] sm:$0xff] }
  0x1a   :  { %3547 = vmatmul.mubr.msk.f32.vlgmr.msra.gmra.mrb[0].mxu1 %vm94_vm3, %v32_v1  ;;  %3759 = vmatpush1.bf16.msra.mxu0 %v4920_v9  ;;  %v3885_v1 = vpack.c.bf16 %v705_v60, %v5073_v58  ;;  %v1289_v58 = vld [vmem:[%s6341_s1 + $0x50] sm:$0xff]  ;;  %v1299_v15 = vld [vmem:[%s6341_s1 + $0xa0] sm:$0xff]  ;;  %v1316_v43 = vld [vmem:[%s6341_s1 + $0x128] sm:$0x3] }
  0x1b   :  { %3781 = vmatpush1.bf16.msra.mxu1 %v4932_v13  ;;  %3761 = vmatprep.subr.bf16.mxu0 %v4945_v17  ;;  %v3986_v30 = vpack.c.bf16 %v1299_v15, %v1295_v14  ;;  %v1307_v36 = vld [vmem:[%s6341_s1 + $0xe0] sm:$0xff]  ;;  %v1309_v41 = vld [vmem:[%s6341_s1 + $0xf0] sm:$0xff]  ;;  %v1694_v54 = vld [vmem:[%s6343_s3 + $0x48] sm:$0xff] }
  0x1c   :  { %3783 = vmatprep.subr.bf16.mxu1 %v4947_v18  ;;  %378 = vmatprep.mubr.f32.mxu0 %v4841_v3  ;;  %v4012_v51 = vpack.c.bf16 %v1309_v41, %v1305_v37  ;;  %v1315_v57 = vld [vmem:[%s6341_s1 + $0x120] sm:$0x3]  ;;  %v1313_v60 = vld [vmem:[%s6341_s1 + $0x110] sm:$0xff]  ;;  %v1698_v62 = vld [vmem:[%s6343_s3 + $0x68] sm:$0xff] }
  0x1d   :  { %449 = vmatprep.mubr.f32.mxu1 %v4841_v3  ;;  %v1702_v14 = vld [vmem:[%s6343_s3 + $0x88] sm:$0xff]  ;;  %v1712_v37 = vld [vmem:[%s6343_s3 + $0xd8] sm:$0xff] }
  0x1e   :  { %3763 = vmatpush1.bf16.msra.mxu0 %v4959_v22  ;;  %v1706_v15 = vld [vmem:[%s6343_s3 + $0xa8] sm:$0xff] }
  0x1f   :  { %3785 = vmatpush1.bf16.msra.mxu1 %v4972_v26  ;;  %3765 = vmatprep.subr.bf16.mxu0 %v4974_v27 }
  0x20   :  { %3787 = vmatprep.subr.bf16.mxu1 %v4985_v31 }
  0x22   :  { %3767 = vmatpush1.bf16.msra.mxu0 %v4997_v35 }
  0x23   :  { %3789 = vmatpush1.bf16.msra.mxu1 %v5010_v39  ;;  %3769 = vmatprep.subr.bf16.mxu0 %v5012_v40 }
  0x24   :  { %3791 = vmatprep.subr.bf16.mxu1 %v5024_v44 }
  0x26   :  { %3771 = vmatpush1.bf16.msra.mxu0 %v5046_v50 }
  0x27   :  { %3793 = vmatpush1.bf16.msra.mxu1 %v5053_v52  ;;  %3774 = vmatprep.subr.msk.bf16.mxu0 %vm5065_vm2, %v3772_v25  ;;  %v1308_v25 = vld [vmem:[%s6341_s1 + $0xe8] sm:$0xff] }
  0x28   :  { %3796 = vmatprep.subr.msk.bf16.mxu1 %vm5065_vm2, %v3794_v29  ;;  %v1310_v29 = vld [vmem:[%s6341_s1 + $0xf8] sm:$0xff] }
  0x2a   :  { %3777 = vmatpush1.bf16.msk.msra.mxu0 %vm5065_vm2, %v3775_v32 }
  0x2b   :  { %3799 = vmatpush1.bf16.msk.msra.mxu1 %vm5065_vm2, %v3797_v33  ;;  %3801 = vmatprep.subr.bf16.mxu0 %v4907_v4 }
  0x2c   :  { %3823 = vmatprep.subr.bf16.mxu1 %v4918_v8 }
  0x2d   :  { %3551 = vmatmul.mubr.msk.f32.vlgmr.msra.gmra.mrb[2].mxu0 %vm94_vm3, %v3548_v34 }
  0x2e   :  { %3554 = vmatmul.mubr.msk.f32.vlgmr.msra.gmra.mrb[2].mxu1 %vm94_vm3, %v3548_v34  ;;  %3803 = vmatpush1.bf16.msra.mxu0 %v4920_v9  ;;  %v1303_v34 = vld [vmem:[%s6341_s1 + $0xc0] sm:$0xff] }
  0x2f   :  { %3825 = vmatpush1.bf16.msra.mxu1 %v4932_v13  ;;  %3805 = vmatprep.subr.bf16.mxu0 %v4945_v17 }
  0x30   :  { %3827 = vmatprep.subr.bf16.mxu1 %v4947_v18  ;;  %582 = vmatprep.mubr.f32.mxu0 %v4841_v3 }
  0x31   :  { %653 = vmatprep.mubr.f32.mxu1 %v4841_v3 }
  0x32   :  { %3807 = vmatpush1.bf16.msra.mxu0 %v4959_v22 }
  0x33   :  { %3829 = vmatpush1.bf16.msra.mxu1 %v4972_v26  ;;  %3809 = vmatprep.subr.bf16.mxu0 %v4974_v27 }
  0x34   :  { %3831 = vmatprep.subr.bf16.mxu1 %v4985_v31 }
  0x36   :  { %3811 = vmatpush1.bf16.msra.mxu0 %v4997_v35 }
  0x37   :  { %3833 = vmatpush1.bf16.msra.mxu1 %v5010_v39  ;;  %3813 = vmatprep.subr.bf16.mxu0 %v5012_v40 }
  0x38   :  { %3835 = vmatprep.subr.bf16.mxu1 %v5024_v44 }
  0x3a   :  { %3815 = vmatpush1.bf16.msra.mxu0 %v5046_v50 }
  0x3b   :  { %3837 = vmatpush1.bf16.msra.mxu1 %v5053_v52  ;;  %3818 = vmatprep.subr.msk.bf16.mxu0 %vm5065_vm2, %v3816_v38  ;;  %v4010_v38 = vpack.c.bf16 %v1310_v29, %v1306_v28  ;;  %v1701_v28 = vld [vmem:[%s6343_s3 + $0x80] sm:$0xff] }
  0x3c   :  { %3840 = vmatprep.subr.msk.bf16.mxu1 %vm5065_vm2, %v3838_v42  ;;  %v1312_v42 = vld [vmem:[%s6341_s1 + $0x108] sm:$0xff]  ;;  %v1705_v29 = vld [vmem:[%s6343_s3 + $0xa0] sm:$0xff] }
  0x3d   :  { %v3992_v53 = vpack.c.bf16 %v1316_v43, %v1312_v42  ;;  %v5681_v41 = vpack.c.bf16 %v1705_v29, %v1701_v28  ;;  %v1746_v28 = vld [vmem:[%s6343_s3 + $0x1e8] sm:$0xff]  ;;  %v1744_v29 = vld [vmem:[%s6343_s3 + $0x1d8] sm:$0xff] }
  0x3e   :  { %3821 = vmatpush1.bf16.msk.msra.mxu0 %vm5065_vm2, %v3819_v45  ;;  %v1314_v45 = vld [vmem:[%s6341_s1 + $0x118] sm:$0xff] }
  0x3f   :  { %3843 = vmatpush1.bf16.msk.msra.mxu1 %vm5065_vm2, %v3841_v46  ;;  %3845 = vmatprep.subr.bf16.mxu0 %v4907_v4  ;;  %v1318_v46 = vld [vmem:[%s6341_s1 + $0x138] sm:$0x3] }
  0x40   :  { %3867 = vmatprep.subr.bf16.mxu1 %v4918_v8 }
  0x41   :  { %3558 = vmatmul.mubr.msk.f32.vlgmr.msra.gmra.mrb[4].mxu0 %vm94_vm3, %v3555_v48 }
  0x42   :  { %3561 = vmatmul.mubr.msk.f32.vlgmr.msra.gmra.mrb[4].mxu1 %vm94_vm3, %v3555_v48  ;;  %3847 = vmatpush1.bf16.msra.mxu0 %v4920_v9  ;;  %v3990_v48 = vpack.c.bf16 %v1307_v36, %v1303_v34  ;;  %v1710_v34 = vld [vmem:[%s6343_s3 + $0xc8] sm:$0xff] }
  0x43   :  { %3869 = vmatpush1.bf16.msra.mxu1 %v4932_v13  ;;  %3849 = vmatprep.subr.bf16.mxu0 %v4945_v17  ;;  %v1714_v36 = vld [vmem:[%s6343_s3 + $0xe8] sm:$0xff] }
  0x44   :  { %3871 = vmatprep.subr.bf16.mxu1 %v4947_v18  ;;  %786 = vmatprep.mubr.f32.mxu0 %v4841_v3  ;;  %v5687_v43 = vpack.c.bf16 %v1714_v36, %v1710_v34 }
  0x45   :  { %857 = vmatprep.mubr.f32.mxu1 %v4841_v3 }
  0x46   :  { %3851 = vmatpush1.bf16.msra.mxu0 %v4959_v22 }
  0x47   :  { %3873 = vmatpush1.bf16.msra.mxu1 %v4972_v26  ;;  %3853 = vmatprep.subr.bf16.mxu0 %v4974_v27 }
  0x48   :  { %3875 = vmatprep.subr.bf16.mxu1 %v4985_v31 }
  0x4a   :  { %3855 = vmatpush1.bf16.msra.mxu0 %v4997_v35 }
  0x4b   :  { %3877 = vmatpush1.bf16.msra.mxu1 %v5010_v39  ;;  %3857 = vmatprep.subr.bf16.mxu0 %v5012_v40 }
  0x4c   :  { %3879 = vmatprep.subr.bf16.mxu1 %v5024_v44 }
  0x4e   :  { %3859 = vmatpush1.bf16.msra.mxu0 %v5046_v50 }
  0x4f   :  { %3881 = vmatpush1.bf16.msra.mxu1 %v5053_v52  ;;  %3862 = vmatprep.subr.msk.bf16.mxu0 %vm5065_vm2, %v3860_v55  ;;  %v1311_v55 = vld [vmem:[%s6341_s1 + $0x100] sm:$0xff] }
  0x50   :  { %3884 = vmatprep.subr.msk.bf16.mxu1 %vm5065_vm2, %v3882_v59  ;;  %v4014_v59 = vpack.c.bf16 %v1318_v46, %v1314_v45  ;;  %v1713_v46 = vld [vmem:[%s6343_s3 + $0xe0] sm:$0xff] }
  0x52   :  { %3865 = vmatpush1.bf16.msk.msra.mxu0 %vm5065_vm2, %v3863_v61  ;;  %v1317_v61 = vld [vmem:[%s6341_s1 + $0x130] sm:$0x3] }
  0x53   :  { %3887 = vmatpush1.bf16.msk.msra.mxu1 %vm5065_vm2, %v3885_v1  ;;  %3889 = vmatprep.subr.bf16.mxu0 %v4907_v4  ;;  %v3995_v1 = vpack.c.bf16 %v1315_v57, %v1311_v55  ;;  %v1722_v57 = vld [vmem:[%s6343_s3 + $0x128] sm:$0xff] }
  0x54   :  { %3911 = vmatprep.subr.bf16.mxu1 %v4918_v8 }
  0x55   :  { %3565 = vmatmul.mubr.msk.f32.vlgmr.msra.gmra.mrb[6].mxu0 %vm94_vm3, %v3562_v23 }
  0x56   :  { %3568 = vmatmul.mubr.msk.f32.vlgmr.msra.gmra.mrb[6].mxu1 %vm94_vm3, %v3562_v23  ;;  %3891 = vmatpush1.bf16.msra.mxu0 %v4920_v9  ;;  %v4017_v23 = vpack.c.bf16 %v1317_v61, %v1313_v60 }
  0x57   :  { %3913 = vmatpush1.bf16.msra.mxu1 %v4932_v13  ;;  %3893 = vmatprep.subr.bf16.mxu0 %v4945_v17 }
  0x58   :  { %3915 = vmatprep.subr.bf16.mxu1 %v4947_v18  ;;  %990 = vmatprep.mubr.f32.mxu0 %v4841_v3 }
  0x59   :  { %1061 = vmatprep.mubr.f32.mxu1 %v4841_v3 }
  0x5a   :  { %3895 = vmatpush1.bf16.msra.mxu0 %v4959_v22 }
  0x5b   :  { %3917 = vmatpush1.bf16.msra.mxu1 %v4972_v26  ;;  %3897 = vmatprep.subr.bf16.mxu0 %v4974_v27 }
  0x5c   :  { %3919 = vmatprep.subr.bf16.mxu1 %v4985_v31 }
  0x5e   :  { %3899 = vmatpush1.bf16.msra.mxu0 %v4997_v35 }
  0x5f   :  { %3921 = vmatpush1.bf16.msra.mxu1 %v5010_v39  ;;  %3901 = vmatprep.subr.bf16.mxu0 %v5012_v40 }
  0x60   :  { %3923 = vmatprep.subr.bf16.mxu1 %v5024_v44 }
  0x62   :  { %3903 = vmatpush1.bf16.msra.mxu0 %v5046_v50 }
  0x63   :  { %3925 = vmatpush1.bf16.msra.mxu1 %v5053_v52  ;;  %3906 = vmatprep.subr.msk.bf16.mxu0 %vm5065_vm2, %v3904_v2  ;;  %v1296_v2 = vld [vmem:[%s6341_s1 + $0x88] sm:$0xff] }
  0x64   :  { %3928 = vmatprep.subr.msk.bf16.mxu1 %vm5065_vm2, %v3926_v5  ;;  %v1300_v5 = vld [vmem:[%s6341_s1 + $0xa8] sm:$0xff] }
  0x66   :  { %3909 = vmatpush1.bf16.msk.msra.mxu0 %vm5065_vm2, %v3907_v6  ;;  %v1298_v6 = vld [vmem:[%s6341_s1 + $0x98] sm:$0xff] }
  0x67   :  { %3931 = vmatpush1.bf16.msk.msra.mxu1 %vm5065_vm2, %v3929_v11  ;;  %3933 = vmatprep.subr.bf16.mxu0 %v4907_v4  ;;  %v1280_v4 = vld [vmem:[%s6341_s1 + $0x8] sm:$0xff]  ;;  %v4004_v11 = vpack.c.bf16 %v1293_v0, %v1289_v58  ;;  %v1696_v58 = vld [vmem:[%s6343_s3 + $0x58] sm:$0xff] }
  0x68   :  { %3955 = vmatprep.subr.bf16.mxu1 %v4918_v8  ;;  %v1284_v8 = vld [vmem:[%s6341_s1 + $0x28] sm:$0xff]  ;;  %v3590_v0 = vld [vmem:[%s6342_s0 + $0x38] sm:$0xff] }
  0x69   :  { %3572 = vmatmul.mubr.msk.f32.vlgmr.msra.gmra.mrb[8].mxu0 %vm94_vm3, %v3569_v24 }
  0x6a   :  { %3575 = vmatmul.mubr.msk.f32.vlgmr.msra.gmra.mrb[8].mxu1 %vm94_vm3, %v3569_v24  ;;  %3935 = vmatpush1.bf16.msra.mxu0 %v4920_v9  ;;  %v1282_v9 = vld [vmem:[%s6341_s1 + $0x18] sm:$0xff]  ;;  %v3583_v24 = vld [vmem:[%s6342_s0 + $0x30] sm:$0xff] }
  0x6b   :  { %3957 = vmatpush1.bf16.msra.mxu1 %v4932_v13  ;;  %3937 = vmatprep.subr.bf16.mxu0 %v4945_v17  ;;  %v1286_v13 = vld [vmem:[%s6341_s1 + $0x38] sm:$0xff]  ;;  %v5370_v17 = vpack.c.bf16 %v1284_v8, %v1280_v4  ;;  %v1520_v4 = vld [vmem:[%s6341_s1 + $0x128] sm:$0x3] }
  0x6c   :  { %3959 = vmatprep.subr.bf16.mxu1 %v4947_v18  ;;  %1194 = vmatprep.mubr.f32.mxu0 %v4841_v3  ;;  %v1279_v18 = vld [vmem:[%s6341_s1] sm:$0xff]  ;;  %v1522_v8 = vld [vmem:[%s6341_s1 + $0x138] sm:$0x3] }
  0x6d   :  { %1265 = vmatprep.mubr.f32.mxu1 %v4841_v3 }
  0x6e   :  { %3939 = vmatpush1.bf16.msra.mxu0 %v4959_v22  ;;  %v1283_v22 = vld [vmem:[%s6341_s1 + $0x20] sm:$0xff] }
  0x6f   :  { %3961 = vmatpush1.bf16.msra.mxu1 %v4972_v26  ;;  %3941 = vmatprep.subr.bf16.mxu0 %v4974_v27  ;;  %v1281_v26 = vld [vmem:[%s6341_s1 + $0x10] sm:$0xff]  ;;  %v5386_v27 = vpack.c.bf16 %v1286_v13, %v1282_v9  ;;  %v5411_v49 = vpack.c.bf16 %v1283_v22, %v1279_v18  ;;  %v4036_v9 = vpack.c.bf16 %v1520_v4, %v1312_v42  ;;  %v1519_v13 = vld [vmem:[%s6341_s1 + $0x120] sm:$0x3]  ;;  %v1686_v22 = vld [vmem:[%s6343_s3 + $0x8] sm:$0xff] }
  0x70   :  { %3963 = vmatprep.subr.bf16.mxu1 %v4985_v31  ;;  %v1285_v31 = vld [vmem:[%s6341_s1 + $0x30] sm:$0xff]  ;;  %v1721_v4 = vld [vmem:[%s6343_s3 + $0x120] sm:$0xff] }
  0x71   :  { %v1521_v18 = vld [vmem:[%s6341_s1 + $0x130] sm:$0x3] }
  0x72   :  { %3943 = vmatpush1.bf16.msra.mxu0 %v4997_v35  ;;  %v1288_v35 = vld [vmem:[%s6341_s1 + $0x48] sm:$0xff] }
  0x73   :  { %3965 = vmatpush1.bf16.msra.mxu1 %v5010_v39  ;;  %3945 = vmatprep.subr.bf16.mxu0 %v5012_v40  ;;  %v1292_v39 = vld [vmem:[%s6341_s1 + $0x68] sm:$0xff]  ;;  %v1290_v40 = vld [vmem:[%s6341_s1 + $0x58] sm:$0xff] }
  0x74   :  { %3967 = vmatprep.subr.bf16.mxu1 %v5024_v44  ;;  %v1294_v44 = vld [vmem:[%s6341_s1 + $0x78] sm:$0xff] }
  0x75   :  { %v5433_v63 = vpack.c.bf16 %v1294_v44, %v1290_v40  ;;  %v1685_v44 = vld [vmem:[%s6343_s3] sm:$0xff] }
  0x76   :  { %3947 = vmatpush1.bf16.msra.mxu0 %v5046_v50  ;;  %v5419_v50 = vpack.c.bf16 %v1285_v31, %v1281_v26  ;;  %v1690_v26 = vld [vmem:[%s6343_s3 + $0x28] sm:$0xff]  ;;  %v1692_v31 = vld [vmem:[%s6343_s3 + $0x38] sm:$0xff] }
  0x77   :  { %3969 = vmatpush1.bf16.msra.mxu1 %v5053_v52  ;;  %3950 = vmatprep.subr.msk.bf16.mxu0 %vm5065_vm2, %v3948_v12  ;;  %v5421_v52 = vpack.c.bf16 %v1292_v39, %v1288_v35  ;;  %v3984_v12 = vpack.c.bf16 %v1300_v5, %v1296_v2  ;;  %v4039_v35 = vpack.c.bf16 %v1519_v13, %v1311_v55  ;;  %v1718_v55 = vld [vmem:[%s6343_s3 + $0x108] sm:$0xff]  ;;  %v1723_v13 = vld [vmem:[%s6343_s3 + $0x130] sm:$0xff] }
  0x78   :  { %3972 = vmatprep.subr.msk.bf16.mxu1 %vm5065_vm2, %v3970_v19  ;;  %v4006_v19 = vpack.c.bf16 %v1302_v7, %v1298_v6  ;;  %v4061_v39 = vpack.c.bf16 %v1521_v18, %v1313_v60  ;;  %v5569_v40 = vpack.c.bf16 %v1690_v26, %v1686_v22  ;;  %v5611_v6 = vpack.c.bf16 %v1698_v62, %v1694_v54  ;;  %v1693_v7 = vld [vmem:[%s6343_s3 + $0x40] sm:$0xff]  ;;  %v1724_v60 = vld [vmem:[%s6343_s3 + $0x138] sm:$0xff]  ;;  %v1730_v18 = vld [vmem:[%s6343_s3 + $0x168] sm:$0xff] }
  0x79   :  { %v1728_v22 = vld [vmem:[%s6343_s3 + $0x158] sm:$0xff]  ;;  %v1734_v54 = vld [vmem:[%s6343_s3 + $0x188] sm:$0xff] }
  0x7a   :  { %3953 = vmatpush1.bf16.msk.msra.mxu0 %vm5065_vm2, %v3951_v20  ;;  %v1301_v20 = vld [vmem:[%s6341_s1 + $0xb0] sm:$0xff]  ;;  %v1732_v26 = vld [vmem:[%s6343_s3 + $0x178] sm:$0xff]  ;;  %v1738_v62 = vld [vmem:[%s6343_s3 + $0x1a8] sm:$0xff] }
  0x7b   :  { %3975 = vmatpush1.bf16.msk.msra.mxu1 %vm5065_vm2, %v3973_v21  ;;  %3977 = vmatprep.subr.bf16.mxu0 %v5370_v17  ;;  %v1304_v21 = vld [vmem:[%s6341_s1 + $0xc8] sm:$0xff]  ;;  %v4008_v32 = vpack.c.bf16 %v1301_v20, %v1297_v16  ;;  %v1704_v16 = vld [vmem:[%s6343_s3 + $0x98] sm:$0xff] }
  0x7c   :  { %3999 = vmatprep.subr.bf16.mxu1 %v5386_v27  ;;  %v3988_v33 = vpack.c.bf16 %v1308_v25, %v1304_v21  ;;  %v5649_v25 = vpack.c.bf16 %v1706_v15, %v1702_v14  ;;  %v1735_v14 = vld [vmem:[%s6343_s3 + $0x190] sm:$0xff] }
  0x7d   :  { %3579 = vmatmul.mubr.msk.f32.vlgmr.msra.gmra.mrb[10].mxu0 %vm94_vm3, %v3576_v47 }
  0x7e   :  { %3582 = vmatmul.mubr.msk.f32.vlgmr.msra.gmra.mrb[10].mxu1 %vm94_vm3, %v3576_v47  ;;  %3979 = vmatpush1.bf16.msra.mxu0 %v5411_v49  ;;  %v1689_v47 = vld [vmem:[%s6343_s3 + $0x20] sm:$0xff] }
  0x7f   :  { %4001 = vmatpush1.bf16.msra.mxu1 %v5419_v50  ;;  %3981 = vmatprep.subr.bf16.mxu0 %v5421_v52  ;;  %v5604_v2 = vpack.c.bf16 %v1689_v47, %v1685_v44  ;;  %v1729_v44 = vld [vmem:[%s6343_s3 + $0x160] sm:$0xff]  ;;  %v1727_v47 = vld [vmem:[%s6343_s3 + $0x150] sm:$0xff] }
  0x80   :  { %4003 = vmatprep.subr.bf16.mxu1 %v5433_v63  ;;  %1398 = vmatprep.mubr.f32.mxu0 %v4841_v3 }
  0x81   :  { %1469 = vmatprep.mubr.f32.mxu1 %v4841_v3 }
  0x82   :  { %3983 = vmatpush1.bf16.msra.mxu0 %v5453_v10 }
  0x83   :  { %4005 = vmatpush1.bf16.msra.mxu1 %v4004_v11  ;;  %3985 = vmatprep.subr.bf16.mxu0 %v3984_v12 }
  0x84   :  { %4007 = vmatprep.subr.bf16.mxu1 %v4006_v19 }
  0x86   :  { %3987 = vmatpush1.bf16.msra.mxu0 %v3986_v30 }
  0x87   :  { %4009 = vmatpush1.bf16.msra.mxu1 %v4008_v32  ;;  %3989 = vmatprep.subr.bf16.mxu0 %v3988_v33 }
  0x88   :  { %4011 = vmatprep.subr.bf16.mxu1 %v4010_v38 }
  0x8a   :  { %3991 = vmatpush1.bf16.msra.mxu0 %v3990_v48 }
  0x8b   :  { %4013 = vmatpush1.bf16.msra.mxu1 %v4012_v51  ;;  %3994 = vmatprep.subr.msk.bf16.mxu0 %vm5065_vm2, %v3992_v53  ;;  %v1715_v53 = vld [vmem:[%s6343_s3 + $0xf0] sm:$0xff] }
  0x8c   :  { %4016 = vmatprep.subr.msk.bf16.mxu1 %vm5065_vm2, %v4014_v59  ;;  %v1720_v59 = vld [vmem:[%s6343_s3 + $0x118] sm:$0xff] }
  0x8e   :  { %3997 = vmatpush1.bf16.msk.msra.mxu0 %vm5065_vm2, %v3995_v1 }
  0x8f   :  { %4019 = vmatpush1.bf16.msk.msra.mxu1 %vm5065_vm2, %v4017_v23  ;;  %4021 = vmatprep.subr.bf16.mxu0 %v5370_v17  ;;  %v4058_v17 = vpack.c.bf16 %v1522_v8, %v1314_v45  ;;  %v1709_v45 = vld [vmem:[%s6343_s3 + $0xc0] sm:$0xff]  ;;  %v5723_v23 = vpack.c.bf16 %v1722_v57, %v1718_v55  ;;  %v1719_v8 = vld [vmem:[%s6343_s3 + $0x110] sm:$0xff]  ;;  %v74_v57 = vlaneseq }
  0x90   :  { %4043 = vmatprep.subr.bf16.mxu1 %v5386_v27  ;;  %v1688_v27 = vld [vmem:[%s6343_s3 + $0x18] sm:$0xff]  ;;  %v5717_v61 = vpack.c.bf16 %v1713_v46, %v1709_v45  ;;  %v1743_v46 = vld [vmem:[%s6343_s3 + $0x1d0] sm:$0xff] }
  0x91   :  { %3586 = vmatmul.mubr.msk.f32.vlgmr.msra.gmra.mrb[12].mxu0 %vm94_vm3, %v3583_v24 }
  0x92   :  { %3589 = vmatmul.mubr.msk.f32.vlgmr.msra.gmra.mrb[12].mxu1 %vm94_vm3, %v3583_v24  ;;  %4023 = vmatpush1.bf16.msra.mxu0 %v5411_v49  ;;  %v1687_v49 = vld [vmem:[%s6343_s3 + $0x10] sm:$0xff]  ;;  %v1717_v24 = vld [vmem:[%s6343_s3 + $0x100] sm:$0xff] }
  0x93   :  { %4045 = vmatpush1.bf16.msra.mxu1 %v5419_v50  ;;  %4025 = vmatprep.subr.bf16.mxu0 %v5421_v52  ;;  %v5582_v50 = vpack.c.bf16 %v1692_v31, %v1688_v27  ;;  %v1691_v52 = vld [vmem:[%s6343_s3 + $0x30] sm:$0xff]  ;;  %v5753_v27 = vpack.c.bf16 %v1721_v4, %v1717_v24  ;;  %v5757_v31 = vpack.c.bf16 %v1723_v13, %v1719_v8  ;;  %v31_v24 = vld [vmem:[%s6344_s2] sm:$0xf]  ;;  %s4843_s2 = smov 64  }
  0x94   :  { %4047 = vmatprep.subr.bf16.mxu1 %v5433_v63  ;;  %1602 = vmatprep.mubr.f32.mxu0 %v4841_v3  ;;  %v1700_v63 = vld [vmem:[%s6343_s3 + $0x78] sm:$0xff]  ;;  %v5609_v5 = vpack.c.bf16 %v1691_v52, %v1687_v49  ;;  %v5771_v49 = vpack.c.bf16 %v1732_v26, %v1728_v22  ;;  %v1731_v52 = vld [vmem:[%s6343_s3 + $0x170] sm:$0xff] }
  0x95   :  { %1673 = vmatprep.mubr.f32.mxu1 %v4841_v3  ;;  %v5623_v56 = vpack.c.bf16 %v1700_v63, %v1696_v58  ;;  %v1736_v58 = vld [vmem:[%s6343_s3 + $0x198] sm:$0xff] }
  0x96   :  { %4027 = vmatpush1.bf16.msra.mxu0 %v5453_v10  ;;  %v1697_v10 = vld [vmem:[%s6343_s3 + $0x60] sm:$0xff]  ;;  %v1740_v63 = vld [vmem:[%s6343_s3 + $0x1b8] sm:$0xff] }
  0x97   :  { %4049 = vmatpush1.bf16.msra.mxu1 %v4004_v11  ;;  %4029 = vmatprep.subr.bf16.mxu0 %v3984_v12  ;;  %v1695_v11 = vld [vmem:[%s6343_s3 + $0x50] sm:$0xff]  ;;  %v5643_v20 = vpack.c.bf16 %v1697_v10, %v1693_v7  ;;  %v5793_v7 = vpack.c.bf16 %v1731_v52, %v1727_v47  ;;  %v5795_v10 = vpack.c.bf16 %v1738_v62, %v1734_v54 }
  0x98   :  { %4051 = vmatprep.subr.bf16.mxu1 %v4006_v19  ;;  %v1699_v12 = vld [vmem:[%s6343_s3 + $0x70] sm:$0xff]  ;;  %v1708_v19 = vld [vmem:[%s6343_s3 + $0xb8] sm:$0xff]  ;;  %v5807_v15 = vpack.c.bf16 %v1740_v63, %v1736_v58 }
  0x99   :  { %v5647_v21 = vpack.c.bf16 %v1699_v12, %v1695_v11  ;;  %v1733_v11 = vld [vmem:[%s6343_s3 + $0x180] sm:$0xff] }
  0x9a   :  { %4031 = vmatpush1.bf16.msra.mxu0 %v3986_v30  ;;  %v1703_v30 = vld [vmem:[%s6343_s3 + $0x90] sm:$0xff]  ;;  %v1737_v12 = vld [vmem:[%s6343_s3 + $0x1a0] sm:$0xff] }
  0x9b   :  { %4053 = vmatpush1.bf16.msra.mxu1 %v4008_v32  ;;  %4033 = vmatprep.subr.bf16.mxu0 %v3988_v33  ;;  %v5661_v32 = vpack.c.bf16 %v1708_v19, %v1704_v16  ;;  %v1707_v33 = vld [vmem:[%s6343_s3 + $0xb0] sm:$0xff]  ;;  %v1742_v19 = vld [vmem:[%s6343_s3 + $0x1c8] sm:$0xff] }
  0x9c   :  { %4055 = vmatprep.subr.bf16.mxu1 %v4010_v38  ;;  %v1716_v38 = vld [vmem:[%s6343_s3 + $0xf8] sm:$0xff]  ;;  %v5685_v42 = vpack.c.bf16 %v1707_v33, %v1703_v30  ;;  %v1739_v16 = vld [vmem:[%s6343_s3 + $0x1b0] sm:$0xff]  ;;  %v5825_v33 = vpack.c.bf16 %v1737_v12, %v1733_v11  ;;  %v5831_v36 = vpack.c.bf16 %v1746_v28, %v1742_v19 }
  0x9d   :  { %v1748_v30 = vld [vmem:[%s6343_s3 + $0x1f8] sm:$0xff]  ;;  %v5829_v34 = vpack.c.bf16 %v1739_v16, %v1735_v14 }
  0x9e   :  { %4035 = vmatpush1.bf16.msra.mxu0 %v3990_v48  ;;  %v1711_v48 = vld [vmem:[%s6343_s3 + $0xd0] sm:$0xff]  ;;  %v5840_v45 = vpack.c.bf16 %v1748_v30, %v1744_v29 }
  0x9f   :  { %4057 = vmatpush1.bf16.msra.mxu1 %v4012_v51  ;;  %4038 = vmatprep.subr.msk.bf16.mxu0 %vm5065_vm2, %v4036_v9  ;;  %v5699_v51 = vpack.c.bf16 %v1716_v38, %v1712_v37  ;;  %v5721_v1 = vpack.c.bf16 %v1715_v53, %v1711_v48  ;;  %v5735_v9 = vpack.c.bf16 %v1724_v60, %v1720_v59  ;;  %v1741_v37 = vld [vmem:[%s6343_s3 + $0x1c0] sm:$0xff]  ;;  %v1747_v48 = vld [vmem:[%s6343_s3 + $0x1f0] sm:$0xff]  ;;  %v75_v59 = vshrl.u32 %v74_v57, 7 }
  0xa0   :  { %4060 = vmatprep.subr.msk.bf16.mxu1 %vm5065_vm2, %v4058_v17  ;;  %v1726_v17 = vld [vmem:[%s6343_s3 + $0x148] sm:$0xff]  ;;  %v1745_v38 = vld [vmem:[%s6343_s3 + $0x1e0] sm:$0xff]  ;;  %v5853_v55 = vpack.c.bf16 %v1747_v48, %v1743_v46 }
  0xa1   :  { %v5849_v53 = vpack.c.bf16 %v1745_v38, %v1741_v37  ;;  %v76_v60 = vsub.s32 0, %v75_v59  ;;  %v84_v4 = vsub.s32 2, %v75_v59  ;;  %v80_v8 = vsub.s32 1, %v75_v59 }
  0xa2   :  { %4041 = vmatpush1.bf16.msk.msra.mxu0 %vm5065_vm2, %v4039_v35  ;;  %v5759_v35 = vpack.c.bf16 %v1730_v18, %v1726_v17  ;;  %v88_v13 = vsub.s32 3, %v75_v59 }
  0xa3   :  { %4063 = vmatpush1.bf16.msk.msra.mxu1 %vm5065_vm2, %v4061_v39  ;;  %4065 = vmatprep.subr.bf16.mxu0 %v5569_v40  ;;  %v1725_v39 = vld [vmem:[%s6343_s3 + $0x140] sm:$0xff]  ;;  %v5899_v17 = vrot.slane %v31_v24, %v76_v60  ;;  %v5901_v18 = vrot.slane %v31_v24, %v84_v4  ;;  %v5903_v22 = vrot.slane %v31_v24, %v80_v8 }
  0xa4   :  { %4097 = vmatprep.subr.bf16.mxu1 %v5582_v50  ;;  %v5905_v26 = vrot.slane %v31_v24, %v88_v13 }
  0xa5   :  { %3593 = vmatmul.mubr.msk.f32.vlgmr.msra.gmra.mrb[14].mxu0 %vm94_vm3, %v3590_v0 }
  0xa6   :  { %3596 = vmatmul.mubr.msk.f32.vlgmr.msra.gmra.mrb[14].mxu1 %vm94_vm3, %v3590_v0  ;;  %4067 = vmatpush1.bf16.msra.mxu0 %v5604_v2  ;;  %v5789_v0 = vpack.c.bf16 %v1729_v44, %v1725_v39 }
  0xa7   :  { %4099 = vmatpush1.bf16.msra.mxu1 %v5609_v5  ;;  %4069 = vmatprep.subr.bf16.mxu0 %v5611_v6 }
  0xa8   :  { %4101 = vmatprep.subr.bf16.mxu1 %v5623_v56  ;;  %1813 = vmatprep.mubr.f32.mxu0 %v4841_v3 }
  0xa9   :  { %1884 = vmatprep.mubr.f32.mxu1 %v4841_v3 }
  0xaa   :  { %4071 = vmatpush1.bf16.msra.mxu0 %v5643_v20 }
  0xab   :  { %4103 = vmatpush1.bf16.msra.mxu1 %v5647_v21  ;;  %4073 = vmatprep.subr.bf16.mxu0 %v5649_v25 }
  0xac   :  { %4105 = vmatprep.subr.bf16.mxu1 %v5661_v32 }
  0xae   :  { %4075 = vmatpush1.bf16.msra.mxu0 %v5681_v41 }
  0xaf   :  { %4107 = vmatpush1.bf16.msra.mxu1 %v5685_v42  ;;  %4077 = vmatprep.subr.bf16.mxu0 %v5687_v43 }
  0xb0   :  { %4109 = vmatprep.subr.bf16.mxu1 %v5699_v51 }
  0xb2   :  { %4079 = vmatpush1.bf16.msra.mxu0 %v5717_v61 }
  0xb3   :  { %4111 = vmatpush1.bf16.msra.mxu1 %v5721_v1  ;;  %4081 = vmatprep.subr.bf16.mxu0 %v5723_v23 }
  0xb4   :  { %4113 = vmatprep.subr.bf16.mxu1 %v5735_v9 }
  0xb6   :  { %4083 = vmatpush1.bf16.msra.mxu0 %v5753_v27 }
  0xb7   :  { %4115 = vmatpush1.bf16.msra.mxu1 %v5757_v31  ;;  %4085 = vmatprep.subr.bf16.mxu0 %v5759_v35 }
  0xb8   :  { %4117 = vmatprep.subr.bf16.mxu1 %v5771_v49 }
  0xba   :  { %4087 = vmatpush1.bf16.msra.mxu0 %v5789_v0 }
  0xbb   :  { %4119 = vmatpush1.bf16.msra.mxu1 %v5793_v7  ;;  %4089 = vmatprep.subr.bf16.mxu0 %v5795_v10 }
  0xbc   :  { %4121 = vmatprep.subr.bf16.mxu1 %v5807_v15 }
  0xbe   :  { %4091 = vmatpush1.bf16.msra.mxu0 %v5825_v33 }
  0xbf   :  { %4123 = vmatpush1.bf16.msra.mxu1 %v5829_v34  ;;  %4093 = vmatprep.subr.bf16.mxu0 %v5831_v36 }
  0xc0   :  { %4125 = vmatprep.subr.bf16.mxu1 %v5840_v45 }
  0xc2   :  { %4095 = vmatpush1.bf16.msra.mxu0 %v5849_v53 }
  0xc3   :  { %4127 = vmatpush1.bf16.msra.mxu1 %v5853_v55  ;;  %4129 = vmatprep.subr.bf16.mxu0 %v5569_v40 }
  0xc4   :  { %4161 = vmatprep.subr.bf16.mxu1 %v5582_v50 }
  0xc5   :  { %1814 = vmatmul.mubr.f32.vlgmr.msra.gmra.mrb[0].mxu0 %v4841_v3 }
  0xc6   :  { %1885 = vmatmul.mubr.f32.vlgmr.msra.gmra.mrb[14].mxu1 %v4841_v3  ;;  %4131 = vmatpush1.bf16.msra.mxu0 %v5604_v2 }
  0xc7   :  { %4163 = vmatpush1.bf16.msra.mxu1 %v5609_v5  ;;  %4133 = vmatprep.subr.bf16.mxu0 %v5611_v6 }
  0xc8   :  { %4165 = vmatprep.subr.bf16.mxu1 %v5623_v56  ;;  %2018 = vmatprep.mubr.f32.mxu0 %v4841_v3 }
  0xc9   :  { %2089 = vmatprep.mubr.f32.mxu1 %v4841_v3 }
  0xca   :  { %4135 = vmatpush1.bf16.msra.mxu0 %v5643_v20 }
  0xcb   :  { %4167 = vmatpush1.bf16.msra.mxu1 %v5647_v21  ;;  %4137 = vmatprep.subr.bf16.mxu0 %v5649_v25 }
  0xcc   :  { %4169 = vmatprep.subr.bf16.mxu1 %v5661_v32 }
  0xce   :  { %4139 = vmatpush1.bf16.msra.mxu0 %v5681_v41 }
  0xcf   :  { %4171 = vmatpush1.bf16.msra.mxu1 %v5685_v42  ;;  %4141 = vmatprep.subr.bf16.mxu0 %v5687_v43 }
  0xd0   :  { %4173 = vmatprep.subr.bf16.mxu1 %v5699_v51 }
  0xd2   :  { %4143 = vmatpush1.bf16.msra.mxu0 %v5717_v61 }
  0xd3   :  { %4175 = vmatpush1.bf16.msra.mxu1 %v5721_v1  ;;  %4145 = vmatprep.subr.bf16.mxu0 %v5723_v23 }
  0xd4   :  { %4177 = vmatprep.subr.bf16.mxu1 %v5735_v9 }
  0xd6   :  { %4147 = vmatpush1.bf16.msra.mxu0 %v5753_v27 }
  0xd7   :  { %4179 = vmatpush1.bf16.msra.mxu1 %v5757_v31  ;;  %4149 = vmatprep.subr.bf16.mxu0 %v5759_v35 }
  0xd8   :  { %4181 = vmatprep.subr.bf16.mxu1 %v5771_v49 }
  0xda   :  { %4151 = vmatpush1.bf16.msra.mxu0 %v5789_v0 }
  0xdb   :  { %4183 = vmatpush1.bf16.msra.mxu1 %v5793_v7  ;;  %4153 = vmatprep.subr.bf16.mxu0 %v5795_v10 }
  0xdc   :  { %4185 = vmatprep.subr.bf16.mxu1 %v5807_v15 }
  0xde   :  { %4155 = vmatpush1.bf16.msra.mxu0 %v5825_v33 }
  0xdf   :  { %4187 = vmatpush1.bf16.msra.mxu1 %v5829_v34  ;;  %4157 = vmatprep.subr.bf16.mxu0 %v5831_v36 }
  0xe0   :  { %4189 = vmatprep.subr.bf16.mxu1 %v5840_v45 }
  0xe2   :  { %4159 = vmatpush1.bf16.msra.mxu0 %v5849_v53 }
  0xe3   :  { %4191 = vmatpush1.bf16.msra.mxu1 %v5853_v55  ;;  %4193 = vmatprep.subr.bf16.mxu0 %v5569_v40 }
  0xe4   :  { %4225 = vmatprep.subr.bf16.mxu1 %v5582_v50 }
 0x198   :  { %v1815_v39 = vpop.f32.mrb[0].mxu0 }
 0x199   :  { %v4612_v44 = vadd.f32 %v1815_v39, %v5899_v17  ;;  %v1886_v47 = vpop.f32.mrb[14].mxu1  ;;  %v1817_v52 = vpop.f32.mrb[1].mxu0 }
 0x19a   :  { %v4642_v54 = vadd.f32 %v1886_v47, %v5901_v18  ;;  %v4613_v62 = vadd.f32 %v1817_v52, %v5903_v22  ;;  %v1888_v58 = vpop.f32.mrb[15].mxu1 }
 0x19b   :  { %v3597_v63 = vmul.f32 -1.442695, %v4612_v44  ;;  %v4643_v11 = vadd.f32 %v1888_v58, %v5905_v26 }
 0x19c   :  { %v3599_v12 = vmul.f32 -1.442695, %v4642_v54  ;;  %1928 = vrot.lane.b32.xlu0 %v4613_v62, %s4843_s2  ;;  %v3598_v57 = vmul.f32 -1.442695, %v4613_v62 }
 0x19d   :  { %4681 = vpow2.f32 %v3597_v63  ;;  %v3600_v14 = vmul.f32 -1.442695, %v4643_v11 }
 0x19e   :  { %4683 = vpow2.f32 %v3599_v12 }
 0x19f   :  { %4685 = vpow2.f32 %v3600_v14 }
 0x1a7   :  { %v4682_v16 = vpop.eup %4681 }
 0x1a8   :  { %v4684_v19 = vpop.eup %4683  ;;  %v1909_v28 = vadd.f32 1.0, %v4682_v16 }
 0x1a9   :  { %v1921_v29 = vadd.f32 1.0, %v4684_v19  ;;  %v4686_v30 = vpop.eup %4685 }
 0x1aa   :  { %4687 = vrcp.f32 %v1909_v28  ;;  %v1922_v37 = vadd.f32 1.0, %v4686_v30 }
 0x1ab   :  { %4689 = vrcp.f32 %v1921_v29 }
 0x1ac   :  { %4691 = vrcp.f32 %v1922_v37 }
 0x1ad   :  { %4693 = vpow2.f32 %v3598_v57 }
 0x1b4   :  { %v4688_v38 = vpop.eup %4687 }
 0x1b5   :  { %v4690_v46 = vpop.eup %4689  ;;  %1940 = vrot.lane.b32.xlu1 %v4688_v38, %s4843_s2 }
 0x1b6   :  { %1935 = vrot.lane.b32.xlu0 %v4690_v46, %s4843_s2  ;;  %v4692_v48 = vpop.eup %4691 }
 0x1b7   :  { %v4694_v24 = vpop.eup %4693 }
 0x1b8   :  { %v1910_v44 = vadd.f32 1.0, %v4694_v24 }
 0x1b9   :  { %1945 = vrot.lane.b32.xlu1 %v4692_v48, %s4843_s2 }
 0x20e   :  { %v1929_v59 = vpop.permute.xlu0 %1928 }
 0x20f   :  { %v1932_v60 = vsel %vm1931_vm4, %v1929_v59, %v4643_v11 }
 0x210   :  { %4695 = vtanh.f32 %v1932_v60 }
 0x211   :  { %4697 = vrcp.f32 %v1910_v44 }
 0x21a   :  { %v4696_v39 = vpop.eup %4695 }
 0x21b   :  { %v4698_v63 = vpop.eup %4697 }
 0x227   :  { %v1941_v4 = vpop.permute.xlu1 %1940 }
 0x228   :  { %v1943_v8 = vsel %vm1931_vm4, %v1941_v4, %v4690_v46  ;;  %v1936_v13 = vpop.permute.xlu0 %1935 }
 0x229   :  { %v1949_v47 = vmul.f32 0.0, %v1943_v8  ;;  %v1938_v52 = vsel %vm1931_vm4, %v4688_v38, %v1936_v13 }
 0x22a   :  { %v1950_v54 = vmul.f32 %v4696_v39, %v1938_v52 }
 0x22b   :  { %v1946_v62 = vpop.permute.xlu1 %1945 }
 0x22c   :  { %v5918_v58 = vadd.f32 %v1950_v54, %v1949_v47  ;;  %v1948_v12 = vsel %vm1931_vm4, %v4698_v63, %v1946_v62 }
 0x22e   :  { %4699 = vtanh.f32 %v5918_v58 }
 0x238   :  { %v4700_v11 = vpop.eup %4699 }
 0x239   :  { %v1953_v14 = vmul.f32 %v4700_v11, %v1948_v12 }
 0x23b   :  { %2019 = vmatmul.mubr.f32.vlgmr.msra.gmra.mrb[2].mxu0 %v1953_v14  ;;  %2090 = vmatmul.mubr.f32.vlgmr.msra.gmra.mrb[12].mxu1 %v1953_v14 }
 0x23c   :  { %4195 = vmatpush1.bf16.msra.mxu0 %v5604_v2  ;;  %4227 = vmatpush1.bf16.msra.mxu1 %v5609_v5 }
 0x23d   :  { %4197 = vmatprep.subr.bf16.mxu0 %v5611_v6  ;;  %4229 = vmatprep.subr.bf16.mxu1 %v5623_v56 }
 0x23e   :  { %2222 = vmatprep.mubr.f32.mxu0 %v4841_v3  ;;  %2293 = vmatprep.mubr.f32.mxu1 %v4841_v3 }
 0x240   :  { %4199 = vmatpush1.bf16.msra.mxu0 %v5643_v20  ;;  %4231 = vmatpush1.bf16.msra.mxu1 %v5647_v21 }
 0x241   :  { %4201 = vmatprep.subr.bf16.mxu0 %v5649_v25  ;;  %4233 = vmatprep.subr.bf16.mxu1 %v5661_v32 }
 0x244   :  { %4203 = vmatpush1.bf16.msra.mxu0 %v5681_v41  ;;  %4235 = vmatpush1.bf16.msra.mxu1 %v5685_v42 }
 0x245   :  { %4205 = vmatprep.subr.bf16.mxu0 %v5687_v43  ;;  %4237 = vmatprep.subr.bf16.mxu1 %v5699_v51 }
 0x248   :  { %4239 = vmatpush1.bf16.msra.mxu1 %v5721_v1  ;;  %4207 = vmatpush1.bf16.msra.mxu0 %v5717_v61 }
 0x249   :  { %4209 = vmatprep.subr.bf16.mxu0 %v5723_v23  ;;  %4241 = vmatprep.subr.bf16.mxu1 %v5735_v9 }
 0x24c   :  { %4243 = vmatpush1.bf16.msra.mxu1 %v5757_v31  ;;  %4211 = vmatpush1.bf16.msra.mxu0 %v5753_v27 }
 0x24d   :  { %4213 = vmatprep.subr.bf16.mxu0 %v5759_v35  ;;  %4245 = vmatprep.subr.bf16.mxu1 %v5771_v49 }
 0x250   :  { %4215 = vmatpush1.bf16.msra.mxu0 %v5789_v0  ;;  %4247 = vmatpush1.bf16.msra.mxu1 %v5793_v7 }
 0x251   :  { %4217 = vmatprep.subr.bf16.mxu0 %v5795_v10  ;;  %4249 = vmatprep.subr.bf16.mxu1 %v5807_v15 }
 0x254   :  { %4219 = vmatpush1.bf16.msra.mxu0 %v5825_v33  ;;  %4251 = vmatpush1.bf16.msra.mxu1 %v5829_v34 }
 0x255   :  { %4221 = vmatprep.subr.bf16.mxu0 %v5831_v36  ;;  %4253 = vmatprep.subr.bf16.mxu1 %v5840_v45 }
 0x258   :  { %4223 = vmatpush1.bf16.msra.mxu0 %v5849_v53  ;;  %4255 = vmatpush1.bf16.msra.mxu1 %v5853_v55 }
 0x259   :  { %4257 = vmatprep.subr.bf16.mxu0 %v5569_v40  ;;  %4289 = vmatprep.subr.bf16.mxu1 %v5582_v50 }
 0x30e   :  { %v2020_v16 = vpop.f32.mrb[2].mxu0  ;;  %v2091_v19 = vpop.f32.mrb[12].mxu1 }
 0x30f   :  { %v4616_v28 = vadd.f32 %v2020_v16, %v5899_v17  ;;  %v4638_v29 = vadd.f32 %v2091_v19, %v5901_v18  ;;  %v2022_v30 = vpop.f32.mrb[3].mxu0  ;;  %v2093_v37 = vpop.f32.mrb[13].mxu1 }
 0x310   :  { %v4617_v38 = vadd.f32 %v2022_v30, %v5903_v22  ;;  %v4639_v46 = vadd.f32 %v2093_v37, %v5905_v26 }
 0x311   :  { %v3601_v48 = vmul.f32 -1.442695, %v4616_v28  ;;  %v3603_v57 = vmul.f32 -1.442695, %v4638_v29 }
 0x312   :  { %v3604_v59 = vmul.f32 -1.442695, %v4639_v46  ;;  %2133 = vrot.lane.b32.xlu0 %v4617_v38, %s4843_s2  ;;  %v3602_v54 = vmul.f32 -1.442695, %v4617_v38 }
 0x313   :  { %4701 = vpow2.f32 %v3601_v48 }
 0x314   :  { %4703 = vpow2.f32 %v3603_v57 }
 0x315   :  { %4705 = vpow2.f32 %v3604_v59 }
 0x31d   :  { %v4702_v60 = vpop.eup %4701 }
 0x31e   :  { %v4704_v24 = vpop.eup %4703  ;;  %v2114_v4 = vadd.f32 1.0, %v4702_v60 }
 0x31f   :  { %v2126_v8 = vadd.f32 1.0, %v4704_v24  ;;  %v4706_v13 = vpop.eup %4705 }
 0x320   :  { %4707 = vrcp.f32 %v2114_v4  ;;  %v2127_v39 = vadd.f32 1.0, %v4706_v13 }
 0x321   :  { %4709 = vrcp.f32 %v2126_v8 }
 0x322   :  { %4711 = vrcp.f32 %v2127_v39 }
 0x323   :  { %4713 = vpow2.f32 %v3602_v54 }
 0x32a   :  { %v4708_v44 = vpop.eup %4707 }
 0x32b   :  { %v4710_v47 = vpop.eup %4709  ;;  %2144 = vrot.lane.b32.xlu0 %v4708_v44, %s4843_s2 }
 0x32c   :  { %2139 = vrot.lane.b32.xlu1 %v4710_v47, %s4843_s2  ;;  %v4712_v52 = vpop.eup %4711 }
 0x32d   :  { %v4714_v11 = vpop.eup %4713 }
 0x32e   :  { %v2115_v28 = vadd.f32 1.0, %v4714_v11 }
 0x330   :  { %2149 = vrot.lane.b32.xlu1 %v4712_v52, %s4843_s2 }
 0x384   :  { %v2134_v62 = vpop.permute.xlu0 %2133 }
 0x385   :  { %v2136_v63 = vsel %vm1931_vm4, %v2134_v62, %v4639_v46 }
 0x386   :  { %4715 = vtanh.f32 %v2136_v63 }
 0x387   :  { %4717 = vrcp.f32 %v2115_v28 }
 0x390   :  { %v4716_v19 = vpop.eup %4715 }
 0x391   :  { %v4718_v46 = vpop.eup %4717 }
 0x39d   :  { %v2145_v12 = vpop.permute.xlu0 %2144 }
 0x39e   :  { %v2140_v14 = vpop.permute.xlu1 %2139  ;;  %v2147_v16 = vsel %vm1931_vm4, %v2145_v12, %v4710_v47 }
 0x39f   :  { %v2142_v29 = vsel %vm1931_vm4, %v4708_v44, %v2140_v14  ;;  %v2153_v30 = vmul.f32 %v2147_v16, %v5918_v58 }
 0x3a0   :  { %v2154_v37 = vmul.f32 %v4716_v19, %v2142_v29 }
 0x3a2   :  { %v5968_v48 = vadd.f32 %v2154_v37, %v2153_v30  ;;  %v2150_v38 = vpop.permute.xlu1 %2149 }
 0x3a3   :  { %v2152_v59 = vsel %vm1931_vm4, %v4718_v46, %v2150_v38 }
 0x3a4   :  { %4719 = vtanh.f32 %v5968_v48 }
 0x3ae   :  { %v4720_v57 = vpop.eup %4719 }
 0x3af   :  { %v2157_v60 = vmul.f32 %v4720_v57, %v2152_v59 }
 0x3b1   :  { %2223 = vmatmul.mubr.f32.vlgmr.msra.gmra.mrb[4].mxu0 %v2157_v60  ;;  %2294 = vmatmul.mubr.f32.vlgmr.msra.gmra.mrb[10].mxu1 %v2157_v60 }
 0x3b2   :  { %4259 = vmatpush1.bf16.msra.mxu0 %v5604_v2  ;;  %4291 = vmatpush1.bf16.msra.mxu1 %v5609_v5 }
 0x3b3   :  { %4261 = vmatprep.subr.bf16.mxu0 %v5611_v6  ;;  %4293 = vmatprep.subr.bf16.mxu1 %v5623_v56 }
 0x3b4   :  { %2426 = vmatprep.mubr.f32.mxu0 %v4841_v3  ;;  %2497 = vmatprep.mubr.f32.mxu1 %v4841_v3 }
 0x3b6   :  { %4263 = vmatpush1.bf16.msra.mxu0 %v5643_v20  ;;  %4295 = vmatpush1.bf16.msra.mxu1 %v5647_v21 }
 0x3b7   :  { %4265 = vmatprep.subr.bf16.mxu0 %v5649_v25  ;;  %4297 = vmatprep.subr.bf16.mxu1 %v5661_v32 }
 0x3ba   :  { %4267 = vmatpush1.bf16.msra.mxu0 %v5681_v41  ;;  %4299 = vmatpush1.bf16.msra.mxu1 %v5685_v42 }
 0x3bb   :  { %4269 = vmatprep.subr.bf16.mxu0 %v5687_v43  ;;  %4301 = vmatprep.subr.bf16.mxu1 %v5699_v51 }
 0x3be   :  { %4303 = vmatpush1.bf16.msra.mxu1 %v5721_v1  ;;  %4271 = vmatpush1.bf16.msra.mxu0 %v5717_v61 }
 0x3bf   :  { %4273 = vmatprep.subr.bf16.mxu0 %v5723_v23  ;;  %4305 = vmatprep.subr.bf16.mxu1 %v5735_v9 }
 0x3c2   :  { %4307 = vmatpush1.bf16.msra.mxu1 %v5757_v31  ;;  %4275 = vmatpush1.bf16.msra.mxu0 %v5753_v27 }
 0x3c3   :  { %4277 = vmatprep.subr.bf16.mxu0 %v5759_v35  ;;  %4309 = vmatprep.subr.bf16.mxu1 %v5771_v49 }
 0x3c6   :  { %4279 = vmatpush1.bf16.msra.mxu0 %v5789_v0  ;;  %4311 = vmatpush1.bf16.msra.mxu1 %v5793_v7 }
 0x3c7   :  { %4281 = vmatprep.subr.bf16.mxu0 %v5795_v10  ;;  %4313 = vmatprep.subr.bf16.mxu1 %v5807_v15 }
 0x3ca   :  { %4283 = vmatpush1.bf16.msra.mxu0 %v5825_v33  ;;  %4315 = vmatpush1.bf16.msra.mxu1 %v5829_v34 }
 0x3cb   :  { %4285 = vmatprep.subr.bf16.mxu0 %v5831_v36  ;;  %4317 = vmatprep.subr.bf16.mxu1 %v5840_v45 }
 0x3ce   :  { %4287 = vmatpush1.bf16.msra.mxu0 %v5849_v53  ;;  %4319 = vmatpush1.bf16.msra.mxu1 %v5853_v55 }
 0x3cf   :  { %4321 = vmatprep.subr.bf16.mxu0 %v5569_v40  ;;  %4353 = vmatprep.subr.bf16.mxu1 %v5582_v50 }
 0x484   :  { %v2224_v58 = vpop.f32.mrb[4].mxu0  ;;  %v2295_v24 = vpop.f32.mrb[10].mxu1 }
 0x485   :  { %v4620_v4 = vadd.f32 %v2224_v58, %v5899_v17  ;;  %v4634_v8 = vadd.f32 %v2295_v24, %v5901_v18  ;;  %v2226_v13 = vpop.f32.mrb[5].mxu0  ;;  %v2297_v39 = vpop.f32.mrb[11].mxu1 }
 0x486   :  { %v4621_v44 = vadd.f32 %v2226_v13, %v5903_v22  ;;  %v4635_v47 = vadd.f32 %v2297_v39, %v5905_v26 }
 0x487   :  { %v3605_v52 = vmul.f32 -1.442695, %v4620_v4  ;;  %v3607_v54 = vmul.f32 -1.442695, %v4634_v8 }
 0x488   :  { %v3608_v62 = vmul.f32 -1.442695, %v4635_v47  ;;  %2337 = vrot.lane.b32.xlu0 %v4621_v44, %s4843_s2  ;;  %v3606_v37 = vmul.f32 -1.442695, %v4621_v44 }
 0x489   :  { %4721 = vpow2.f32 %v3605_v52 }
 0x48a   :  { %4723 = vpow2.f32 %v3607_v54 }
 0x48b   :  { %4725 = vpow2.f32 %v3608_v62 }
 0x493   :  { %v4722_v63 = vpop.eup %4721 }
 0x494   :  { %v4724_v11 = vpop.eup %4723  ;;  %v2318_v12 = vadd.f32 1.0, %v4722_v63 }
 0x495   :  { %v2330_v14 = vadd.f32 1.0, %v4724_v11  ;;  %v4726_v16 = vpop.eup %4725 }
 0x496   :  { %4727 = vrcp.f32 %v2318_v12  ;;  %v2331_v19 = vadd.f32 1.0, %v4726_v16 }
 0x497   :  { %4729 = vrcp.f32 %v2330_v14 }
 0x498   :  { %4731 = vrcp.f32 %v2331_v19 }
 0x499   :  { %4733 = vpow2.f32 %v3606_v37 }
 0x4a0   :  { %v4728_v28 = vpop.eup %4727 }
 0x4a1   :  { %v4730_v29 = vpop.eup %4729  ;;  %2348 = vrot.lane.b32.xlu0 %v4728_v28, %s4843_s2 }
 0x4a2   :  { %2343 = vrot.lane.b32.xlu1 %v4730_v29, %s4843_s2  ;;  %v4732_v30 = vpop.eup %4731 }
 0x4a3   :  { %v4734_v57 = vpop.eup %4733 }
 0x4a4   :  { %v2319_v4 = vadd.f32 1.0, %v4734_v57 }
 0x4a6   :  { %2353 = vrot.lane.b32.xlu1 %v4732_v30, %s4843_s2 }
 0x4fa   :  { %v2338_v38 = vpop.permute.xlu0 %2337 }
 0x4fb   :  { %v2340_v46 = vsel %vm1931_vm4, %v2338_v38, %v4635_v47 }
 0x4fc   :  { %4735 = vtanh.f32 %v2340_v46 }
 0x4fd   :  { %4737 = vrcp.f32 %v2319_v4 }
 0x506   :  { %v4736_v24 = vpop.eup %4735 }
 0x507   :  { %v4738_v47 = vpop.eup %4737 }
 0x513   :  { %v2349_v59 = vpop.permute.xlu0 %2348 }
 0x514   :  { %v2344_v60 = vpop.permute.xlu1 %2343  ;;  %v2351_v58 = vsel %vm1931_vm4, %v2349_v59, %v4730_v29 }
 0x515   :  { %v2346_v8 = vsel %vm1931_vm4, %v4728_v28, %v2344_v60  ;;  %v2357_v13 = vmul.f32 %v2351_v58, %v5968_v48 }
 0x516   :  { %v2358_v39 = vmul.f32 %v4736_v24, %v2346_v8 }
 0x518   :  { %v6018_v52 = vadd.f32 %v2358_v39, %v2357_v13  ;;  %v2354_v44 = vpop.permute.xlu1 %2353 }
 0x519   :  { %v2356_v62 = vsel %vm1931_vm4, %v4738_v47, %v2354_v44 }
 0x51a   :  { %4739 = vtanh.f32 %v6018_v52 }
 0x524   :  { %v4740_v54 = vpop.eup %4739 }
 0x525   :  { %v2361_v63 = vmul.f32 %v4740_v54, %v2356_v62 }
 0x527   :  { %2427 = vmatmul.mubr.f32.vlgmr.msra.gmra.mrb[6].mxu0 %v2361_v63  ;;  %2498 = vmatmul.mubr.f32.vlgmr.msra.gmra.mrb[8].mxu1 %v2361_v63 }
 0x528   :  { %4323 = vmatpush1.bf16.msra.mxu0 %v5604_v2  ;;  %4355 = vmatpush1.bf16.msra.mxu1 %v5609_v5 }
 0x529   :  { %4325 = vmatprep.subr.bf16.mxu0 %v5611_v6  ;;  %4357 = vmatprep.subr.bf16.mxu1 %v5623_v56 }
 0x52a   :  { %2630 = vmatprep.mubr.f32.mxu0 %v4841_v3  ;;  %2701 = vmatprep.mubr.f32.mxu1 %v4841_v3 }
 0x52c   :  { %4327 = vmatpush1.bf16.msra.mxu0 %v5643_v20  ;;  %4359 = vmatpush1.bf16.msra.mxu1 %v5647_v21 }
 0x52d   :  { %4329 = vmatprep.subr.bf16.mxu0 %v5649_v25  ;;  %4361 = vmatprep.subr.bf16.mxu1 %v5661_v32 }
 0x530   :  { %4331 = vmatpush1.bf16.msra.mxu0 %v5681_v41  ;;  %4363 = vmatpush1.bf16.msra.mxu1 %v5685_v42 }
 0x531   :  { %4333 = vmatprep.subr.bf16.mxu0 %v5687_v43  ;;  %4365 = vmatprep.subr.bf16.mxu1 %v5699_v51 }
 0x534   :  { %4367 = vmatpush1.bf16.msra.mxu1 %v5721_v1  ;;  %4335 = vmatpush1.bf16.msra.mxu0 %v5717_v61 }
 0x535   :  { %4337 = vmatprep.subr.bf16.mxu0 %v5723_v23  ;;  %4369 = vmatprep.subr.bf16.mxu1 %v5735_v9 }
 0x538   :  { %4371 = vmatpush1.bf16.msra.mxu1 %v5757_v31  ;;  %4339 = vmatpush1.bf16.msra.mxu0 %v5753_v27 }
 0x539   :  { %4341 = vmatprep.subr.bf16.mxu0 %v5759_v35  ;;  %4373 = vmatprep.subr.bf16.mxu1 %v5771_v49 }
 0x53c   :  { %4343 = vmatpush1.bf16.msra.mxu0 %v5789_v0  ;;  %4375 = vmatpush1.bf16.msra.mxu1 %v5793_v7 }
 0x53d   :  { %4345 = vmatprep.subr.bf16.mxu0 %v5795_v10  ;;  %4377 = vmatprep.subr.bf16.mxu1 %v5807_v15 }
 0x540   :  { %4347 = vmatpush1.bf16.msra.mxu0 %v5825_v33  ;;  %4379 = vmatpush1.bf16.msra.mxu1 %v5829_v34 }
 0x541   :  { %4349 = vmatprep.subr.bf16.mxu0 %v5831_v36  ;;  %4381 = vmatprep.subr.bf16.mxu1 %v5840_v45 }
 0x544   :  { %4351 = vmatpush1.bf16.msra.mxu0 %v5849_v53  ;;  %4383 = vmatpush1.bf16.msra.mxu1 %v5853_v55 }
 0x545   :  { %4385 = vmatprep.subr.bf16.mxu0 %v5569_v40  ;;  %4417 = vmatprep.subr.bf16.mxu1 %v5582_v50 }
 0x5fa   :  { %v2428_v48 = vpop.f32.mrb[6].mxu0  ;;  %v2499_v11 = vpop.f32.mrb[8].mxu1 }
 0x5fb   :  { %v4624_v12 = vadd.f32 %v2428_v48, %v5899_v17  ;;  %v4630_v14 = vadd.f32 %v2499_v11, %v5901_v18  ;;  %v2430_v16 = vpop.f32.mrb[7].mxu0  ;;  %v2501_v19 = vpop.f32.mrb[9].mxu1 }
 0x5fc   :  { %v4625_v28 = vadd.f32 %v2430_v16, %v5903_v22  ;;  %v4631_v29 = vadd.f32 %v2501_v19, %v5905_v26 }
 0x5fd   :  { %v3609_v30 = vmul.f32 -1.442695, %v4624_v12  ;;  %v3611_v37 = vmul.f32 -1.442695, %v4630_v14 }
 0x5fe   :  { %v3612_v38 = vmul.f32 -1.442695, %v4631_v29  ;;  %2541 = vrot.lane.b32.xlu0 %v4625_v28, %s4843_s2  ;;  %v3610_v39 = vmul.f32 -1.442695, %v4625_v28 }
 0x5ff   :  { %4741 = vpow2.f32 %v3609_v30 }
 0x600   :  { %4743 = vpow2.f32 %v3611_v37 }
 0x601   :  { %4745 = vpow2.f32 %v3612_v38 }
 0x609   :  { %v4742_v46 = vpop.eup %4741 }
 0x60a   :  { %v4744_v57 = vpop.eup %4743  ;;  %v2522_v59 = vadd.f32 1.0, %v4742_v46 }
 0x60b   :  { %v2534_v60 = vadd.f32 1.0, %v4744_v57  ;;  %v4746_v58 = vpop.eup %4745 }
 0x60c   :  { %4747 = vrcp.f32 %v2522_v59  ;;  %v2535_v24 = vadd.f32 1.0, %v4746_v58 }
 0x60d   :  { %4749 = vrcp.f32 %v2534_v60 }
 0x60e   :  { %4751 = vrcp.f32 %v2535_v24 }
 0x60f   :  { %4753 = vpow2.f32 %v3610_v39 }
 0x616   :  { %v4748_v4 = vpop.eup %4747 }
 0x617   :  { %v4750_v8 = vpop.eup %4749  ;;  %2552 = vrot.lane.b32.xlu0 %v4748_v4, %s4843_s2 }
 0x618   :  { %2547 = vrot.lane.b32.xlu1 %v4750_v8, %s4843_s2  ;;  %v4752_v13 = vpop.eup %4751 }
 0x619   :  { %v4754_v54 = vpop.eup %4753 }
 0x61a   :  { %v2523_v12 = vadd.f32 1.0, %v4754_v54 }
 0x61c   :  { %2557 = vrot.lane.b32.xlu1 %v4752_v13, %s4843_s2 }
 0x670   :  { %v2542_v44 = vpop.permute.xlu0 %2541 }
 0x671   :  { %v2544_v47 = vsel %vm1931_vm4, %v2542_v44, %v4631_v29 }
 0x672   :  { %4755 = vtanh.f32 %v2544_v47 }
 0x673   :  { %4757 = vrcp.f32 %v2523_v12 }
 0x67c   :  { %v4756_v11 = vpop.eup %4755 }
 0x67d   :  { %v4758_v29 = vpop.eup %4757 }
 0x689   :  { %v2553_v62 = vpop.permute.xlu0 %2552 }
 0x68a   :  { %v2548_v63 = vpop.permute.xlu1 %2547  ;;  %v2555_v48 = vsel %vm1931_vm4, %v2553_v62, %v4750_v8 }
 0x68b   :  { %v2550_v14 = vsel %vm1931_vm4, %v4748_v4, %v2548_v63  ;;  %v2561_v16 = vmul.f32 %v2555_v48, %v6018_v52 }
 0x68c   :  { %v2562_v19 = vmul.f32 %v4756_v11, %v2550_v14 }
 0x68e   :  { %v6068_v30 = vadd.f32 %v2562_v19, %v2561_v16  ;;  %v2558_v28 = vpop.permute.xlu1 %2557 }
 0x68f   :  { %v2560_v38 = vsel %vm1931_vm4, %v4758_v29, %v2558_v28 }
 0x690   :  { %4759 = vtanh.f32 %v6068_v30 }
 0x69a   :  { %v4760_v37 = vpop.eup %4759 }
 0x69b   :  { %v2565_v46 = vmul.f32 %v4760_v37, %v2560_v38 }
 0x69d   :  { %2631 = vmatmul.mubr.f32.vlgmr.msra.gmra.mrb[8].mxu0 %v2565_v46  ;;  %2702 = vmatmul.mubr.f32.vlgmr.msra.gmra.mrb[6].mxu1 %v2565_v46 }
 0x69e   :  { %4387 = vmatpush1.bf16.msra.mxu0 %v5604_v2  ;;  %4419 = vmatpush1.bf16.msra.mxu1 %v5609_v5 }
 0x69f   :  { %4389 = vmatprep.subr.bf16.mxu0 %v5611_v6  ;;  %4421 = vmatprep.subr.bf16.mxu1 %v5623_v56 }
 0x6a0   :  { %2826 = vmatprep.mubr.f32.mxu0 %v4841_v3  ;;  %2897 = vmatprep.mubr.f32.mxu1 %v4841_v3 }
 0x6a2   :  { %4391 = vmatpush1.bf16.msra.mxu0 %v5643_v20  ;;  %4423 = vmatpush1.bf16.msra.mxu1 %v5647_v21 }
 0x6a3   :  { %4393 = vmatprep.subr.bf16.mxu0 %v5649_v25  ;;  %4425 = vmatprep.subr.bf16.mxu1 %v5661_v32 }
 0x6a6   :  { %4395 = vmatpush1.bf16.msra.mxu0 %v5681_v41  ;;  %4427 = vmatpush1.bf16.msra.mxu1 %v5685_v42 }
 0x6a7   :  { %4397 = vmatprep.subr.bf16.mxu0 %v5687_v43  ;;  %4429 = vmatprep.subr.bf16.mxu1 %v5699_v51 }
 0x6aa   :  { %4431 = vmatpush1.bf16.msra.mxu1 %v5721_v1  ;;  %4399 = vmatpush1.bf16.msra.mxu0 %v5717_v61 }
 0x6ab   :  { %4401 = vmatprep.subr.bf16.mxu0 %v5723_v23  ;;  %4433 = vmatprep.subr.bf16.mxu1 %v5735_v9 }
 0x6ae   :  { %4435 = vmatpush1.bf16.msra.mxu1 %v5757_v31  ;;  %4403 = vmatpush1.bf16.msra.mxu0 %v5753_v27 }
 0x6af   :  { %4405 = vmatprep.subr.bf16.mxu0 %v5759_v35  ;;  %4437 = vmatprep.subr.bf16.mxu1 %v5771_v49 }
 0x6b2   :  { %4407 = vmatpush1.bf16.msra.mxu0 %v5789_v0  ;;  %4439 = vmatpush1.bf16.msra.mxu1 %v5793_v7 }
 0x6b3   :  { %4409 = vmatprep.subr.bf16.mxu0 %v5795_v10  ;;  %4441 = vmatprep.subr.bf16.mxu1 %v5807_v15 }
 0x6b6   :  { %4411 = vmatpush1.bf16.msra.mxu0 %v5825_v33  ;;  %4443 = vmatpush1.bf16.msra.mxu1 %v5829_v34 }
 0x6b7   :  { %4413 = vmatprep.subr.bf16.mxu0 %v5831_v36  ;;  %4445 = vmatprep.subr.bf16.mxu1 %v5840_v45 }
 0x6ba   :  { %4415 = vmatpush1.bf16.msra.mxu0 %v5849_v53  ;;  %4447 = vmatpush1.bf16.msra.mxu1 %v5853_v55 }
 0x6bb   :  { %4449 = vmatprep.subr.bf16.mxu0 %v5569_v40  ;;  %4481 = vmatprep.subr.bf16.mxu1 %v5582_v50 }
 0x770   :  { %v2632_v52 = vpop.f32.mrb[8].mxu0  ;;  %v2703_v57 = vpop.f32.mrb[6].mxu1 }
 0x771   :  { %v4628_v59 = vadd.f32 %v2632_v52, %v5899_v17  ;;  %v4626_v60 = vadd.f32 %v2703_v57, %v5901_v18  ;;  %v2634_v58 = vpop.f32.mrb[9].mxu0  ;;  %v2705_v24 = vpop.f32.mrb[7].mxu1 }
 0x772   :  { %v4629_v4 = vadd.f32 %v2634_v58, %v5903_v22  ;;  %v4627_v8 = vadd.f32 %v2705_v24, %v5905_v26 }
 0x773   :  { %v3613_v13 = vmul.f32 -1.442695, %v4628_v59  ;;  %v3615_v39 = vmul.f32 -1.442695, %v4626_v60 }
 0x774   :  { %v3616_v44 = vmul.f32 -1.442695, %v4627_v8  ;;  %2737 = vrot.lane.b32.xlu0 %v4629_v4, %s4843_s2  ;;  %v3614_v19 = vmul.f32 -1.442695, %v4629_v4 }
 0x775   :  { %4761 = vpow2.f32 %v3613_v13 }
 0x776   :  { %4763 = vpow2.f32 %v3615_v39 }
 0x777   :  { %4765 = vpow2.f32 %v3616_v44 }
 0x77f   :  { %v4762_v47 = vpop.eup %4761 }
 0x780   :  { %v4764_v54 = vpop.eup %4763  ;;  %v2718_v62 = vadd.f32 1.0, %v4762_v47 }
 0x781   :  { %v2730_v63 = vadd.f32 1.0, %v4764_v54  ;;  %v4766_v48 = vpop.eup %4765 }
 0x782   :  { %4767 = vrcp.f32 %v2718_v62  ;;  %v2731_v11 = vadd.f32 1.0, %v4766_v48 }
 0x783   :  { %4769 = vrcp.f32 %v2730_v63 }
 0x784   :  { %4771 = vrcp.f32 %v2731_v11 }
 0x785   :  { %4773 = vpow2.f32 %v3614_v19 }
 0x78c   :  { %v4768_v12 = vpop.eup %4767 }
 0x78d   :  { %v4770_v14 = vpop.eup %4769  ;;  %2748 = vrot.lane.b32.xlu0 %v4768_v12, %s4843_s2 }
 0x78e   :  { %2743 = vrot.lane.b32.xlu1 %v4770_v14, %s4843_s2  ;;  %v4772_v16 = vpop.eup %4771 }
 0x78f   :  { %v4774_v37 = vpop.eup %4773 }
 0x790   :  { %v2719_v59 = vadd.f32 1.0, %v4774_v37 }
 0x792   :  { %2753 = vrot.lane.b32.xlu1 %v4772_v16, %s4843_s2 }
 0x7e6   :  { %v2738_v28 = vpop.permute.xlu0 %2737 }
 0x7e7   :  { %v2740_v29 = vsel %vm1931_vm4, %v2738_v28, %v4627_v8 }
 0x7e8   :  { %4775 = vtanh.f32 %v2740_v29 }
 0x7e9   :  { %4777 = vrcp.f32 %v2719_v59 }
 0x7f2   :  { %v4776_v57 = vpop.eup %4775 }
 0x7f3   :  { %v4778_v8 = vpop.eup %4777 }
 0x7ff   :  { %v2749_v38 = vpop.permute.xlu0 %2748 }
 0x800   :  { %v2744_v46 = vpop.permute.xlu1 %2743  ;;  %v2751_v52 = vsel %vm1931_vm4, %v2749_v38, %v4770_v14 }
 0x801   :  { %v2746_v60 = vsel %vm1931_vm4, %v4768_v12, %v2744_v46  ;;  %v2757_v58 = vmul.f32 %v2751_v52, %v6068_v30 }
 0x802   :  { %v2758_v24 = vmul.f32 %v4776_v57, %v2746_v60 }
 0x804   :  { %v6118_v13 = vadd.f32 %v2758_v24, %v2757_v58  ;;  %v2754_v4 = vpop.permute.xlu1 %2753 }
 0x805   :  { %v2756_v44 = vsel %vm1931_vm4, %v4778_v8, %v2754_v4 }
 0x806   :  { %4779 = vtanh.f32 %v6118_v13 }
 0x810   :  { %v4780_v39 = vpop.eup %4779 }
 0x811   :  { %v2761_v47 = vmul.f32 %v4780_v39, %v2756_v44 }
 0x813   :  { %2827 = vmatmul.mubr.f32.vlgmr.msra.gmra.mrb[10].mxu0 %v2761_v47  ;;  %2898 = vmatmul.mubr.f32.vlgmr.msra.gmra.mrb[4].mxu1 %v2761_v47 }
 0x814   :  { %4451 = vmatpush1.bf16.msra.mxu0 %v5604_v2  ;;  %4483 = vmatpush1.bf16.msra.mxu1 %v5609_v5 }
 0x815   :  { %4453 = vmatprep.subr.bf16.mxu0 %v5611_v6  ;;  %4485 = vmatprep.subr.bf16.mxu1 %v5623_v56 }
 0x816   :  { %3022 = vmatprep.mubr.f32.mxu0 %v4841_v3  ;;  %3093 = vmatprep.mubr.f32.mxu1 %v4841_v3 }
 0x818   :  { %4455 = vmatpush1.bf16.msra.mxu0 %v5643_v20  ;;  %4487 = vmatpush1.bf16.msra.mxu1 %v5647_v21 }
 0x819   :  { %4457 = vmatprep.subr.bf16.mxu0 %v5649_v25  ;;  %4489 = vmatprep.subr.bf16.mxu1 %v5661_v32 }
 0x81c   :  { %4459 = vmatpush1.bf16.msra.mxu0 %v5681_v41  ;;  %4491 = vmatpush1.bf16.msra.mxu1 %v5685_v42 }
 0x81d   :  { %4461 = vmatprep.subr.bf16.mxu0 %v5687_v43  ;;  %4493 = vmatprep.subr.bf16.mxu1 %v5699_v51 }
 0x820   :  { %4495 = vmatpush1.bf16.msra.mxu1 %v5721_v1  ;;  %4463 = vmatpush1.bf16.msra.mxu0 %v5717_v61 }
 0x821   :  { %4465 = vmatprep.subr.bf16.mxu0 %v5723_v23  ;;  %4497 = vmatprep.subr.bf16.mxu1 %v5735_v9 }
 0x824   :  { %4499 = vmatpush1.bf16.msra.mxu1 %v5757_v31  ;;  %4467 = vmatpush1.bf16.msra.mxu0 %v5753_v27 }
 0x825   :  { %4469 = vmatprep.subr.bf16.mxu0 %v5759_v35  ;;  %4501 = vmatprep.subr.bf16.mxu1 %v5771_v49 }
 0x828   :  { %4471 = vmatpush1.bf16.msra.mxu0 %v5789_v0  ;;  %4503 = vmatpush1.bf16.msra.mxu1 %v5793_v7 }
 0x829   :  { %4473 = vmatprep.subr.bf16.mxu0 %v5795_v10  ;;  %4505 = vmatprep.subr.bf16.mxu1 %v5807_v15 }
 0x82c   :  { %4475 = vmatpush1.bf16.msra.mxu0 %v5825_v33  ;;  %4507 = vmatpush1.bf16.msra.mxu1 %v5829_v34 }
 0x82d   :  { %4477 = vmatprep.subr.bf16.mxu0 %v5831_v36  ;;  %4509 = vmatprep.subr.bf16.mxu1 %v5840_v45 }
 0x830   :  { %4479 = vmatpush1.bf16.msra.mxu0 %v5849_v53  ;;  %4511 = vmatpush1.bf16.msra.mxu1 %v5853_v55 }
 0x831   :  { %4513 = vmatprep.subr.bf16.mxu0 %v5569_v40  ;;  %4545 = vmatprep.subr.bf16.mxu1 %v5582_v50 }
 0x8e6   :  { %v2828_v30 = vpop.f32.mrb[10].mxu0  ;;  %v2899_v54 = vpop.f32.mrb[4].mxu1 }
 0x8e7   :  { %v4632_v62 = vadd.f32 %v2828_v30, %v5899_v17  ;;  %v4622_v63 = vadd.f32 %v2899_v54, %v5901_v18  ;;  %v2830_v48 = vpop.f32.mrb[11].mxu0  ;;  %v2901_v11 = vpop.f32.mrb[5].mxu1 }
 0x8e8   :  { %v4633_v12 = vadd.f32 %v2830_v48, %v5903_v22  ;;  %v4623_v14 = vadd.f32 %v2901_v11, %v5905_v26 }
 0x8e9   :  { %v3617_v16 = vmul.f32 -1.442695, %v4632_v62  ;;  %v3619_v19 = vmul.f32 -1.442695, %v4622_v63 }
 0x8ea   :  { %v3620_v28 = vmul.f32 -1.442695, %v4623_v14  ;;  %2933 = vrot.lane.b32.xlu0 %v4633_v12, %s4843_s2  ;;  %v3618_v60 = vmul.f32 -1.442695, %v4633_v12 }
 0x8eb   :  { %4781 = vpow2.f32 %v3617_v16 }
 0x8ec   :  { %4783 = vpow2.f32 %v3619_v19 }
 0x8ed   :  { %4785 = vpow2.f32 %v3620_v28 }
 0x8f5   :  { %v4782_v40 = vpop.eup %4781 }
 0x8f6   :  { %v4784_v50 = vpop.eup %4783  ;;  %v2914_v29 = vadd.f32 1.0, %v4782_v40 }
 0x8f7   :  { %v2926_v37 = vadd.f32 1.0, %v4784_v50  ;;  %v4786_v38 = vpop.eup %4785 }
 0x8f8   :  { %4787 = vrcp.f32 %v2914_v29  ;;  %v2927_v46 = vadd.f32 1.0, %v4786_v38 }
 0x8f9   :  { %4789 = vrcp.f32 %v2926_v37 }
 0x8fa   :  { %4791 = vrcp.f32 %v2927_v46 }
 0x8fb   :  { %4793 = vpow2.f32 %v3618_v60  ;;  %v3352_v60 = vld [vmem:[%s6345_s4 + $0x10] sm:$0xff] }
 0x902   :  { %v4788_v52 = vpop.eup %4787 }
 0x903   :  { %v4790_v57 = vpop.eup %4789  ;;  %2944 = vrot.lane.b32.xlu0 %v4788_v52, %s4843_s2 }
 0x904   :  { %2939 = vrot.lane.b32.xlu1 %v4790_v57, %s4843_s2  ;;  %v4792_v59 = vpop.eup %4791 }
 0x905   :  { %v4794_v4 = vpop.eup %4793 }
 0x906   :  { %v2915_v30 = vadd.f32 1.0, %v4794_v4 }
 0x908   :  { %2949 = vrot.lane.b32.xlu1 %v4792_v59, %s4843_s2  ;;  %v3351_v59 = vld [vmem:[%s6345_s4 + $0x8] sm:$0xff] }
 0x95c   :  { %v2934_v58 = vpop.permute.xlu0 %2933 }
 0x95d   :  { %v2936_v24 = vsel %vm1931_vm4, %v2934_v58, %v4623_v14 }
 0x95e   :  { %4795 = vtanh.f32 %v2936_v24  ;;  %v3353_v24 = vld [vmem:[%s6345_s4 + $0x18] sm:$0xff] }
 0x95f   :  { %4797 = vrcp.f32 %v2915_v30  ;;  %v4580_v4 = vpack.c.bf16 %v3353_v24, %v3352_v60 }
 0x968   :  { %v4796_v47 = vpop.eup %4795 }
 0x969   :  { %v4798_v12 = vpop.eup %4797 }
 0x975   :  { %v2945_v8 = vpop.permute.xlu0 %2944 }
 0x976   :  { %v2940_v39 = vpop.permute.xlu1 %2939  ;;  %v2947_v44 = vsel %vm1931_vm4, %v2945_v8, %v4790_v57  ;;  %v3350_v57 = vld [vmem:[%s6345_s4] sm:$0xff] }
 0x977   :  { %v2942_v54 = vsel %vm1931_vm4, %v4788_v52, %v2940_v39  ;;  %v2953_v62 = vmul.f32 %v2947_v44, %v6118_v13  ;;  %v4844_v52 = vmov 0.0|0.0   ;;  %v4577_v58 = vpack.c.bf16 %v3351_v59, %v3350_v57  ;;  %v3354_v8 = vld [vmem:[%s6345_s4 + $0x20] sm:$0xff]  ;;  %v3355_v39 = vld [vmem:[%s6345_s4 + $0x28] sm:$0xff] }
 0x978   :  { %v2954_v63 = vmul.f32 %v4796_v47, %v2942_v54  ;;  %v4583_v30 = vpack.c.bf16 %v3355_v39, %v3354_v8 }
 0x97a   :  { %v6168_v48 = vadd.f32 %v2954_v63, %v2953_v62  ;;  %v2950_v11 = vpop.permute.xlu1 %2949 }
 0x97b   :  { %v2952_v16 = vsel %vm1931_vm4, %v4798_v12, %v2950_v11 }
 0x97c   :  { %4799 = vtanh.f32 %v6168_v48 }
 0x986   :  { %v4800_v14 = vpop.eup %4799 }
 0x987   :  { %v2957_v19 = vmul.f32 %v4800_v14, %v2952_v16 }
 0x989   :  { %3023 = vmatmul.mubr.f32.vlgmr.msra.gmra.mrb[12].mxu0 %v2957_v19  ;;  %3094 = vmatmul.mubr.f32.vlgmr.msra.gmra.mrb[2].mxu1 %v2957_v19 }
 0x98a   :  { %4515 = vmatpush1.bf16.msra.mxu0 %v5604_v2  ;;  %4547 = vmatpush1.bf16.msra.mxu1 %v5609_v5 }
 0x98b   :  { %4517 = vmatprep.subr.bf16.mxu0 %v5611_v6  ;;  %4549 = vmatprep.subr.bf16.mxu1 %v5623_v56 }
 0x98c   :  { %3218 = vmatprep.mubr.f32.mxu0 %v4841_v3  ;;  %3289 = vmatprep.mubr.f32.mxu1 %v4841_v3 }
 0x98e   :  { %4519 = vmatpush1.bf16.msra.mxu0 %v5643_v20  ;;  %4551 = vmatpush1.bf16.msra.mxu1 %v5647_v21 }
 0x98f   :  { %4521 = vmatprep.subr.bf16.mxu0 %v5649_v25  ;;  %4553 = vmatprep.subr.bf16.mxu1 %v5661_v32 }
 0x992   :  { %4523 = vmatpush1.bf16.msra.mxu0 %v5681_v41  ;;  %4555 = vmatpush1.bf16.msra.mxu1 %v5685_v42 }
 0x993   :  { %4525 = vmatprep.subr.bf16.mxu0 %v5687_v43  ;;  %4557 = vmatprep.subr.bf16.mxu1 %v5699_v51 }
 0x996   :  { %4559 = vmatpush1.bf16.msra.mxu1 %v5721_v1  ;;  %4527 = vmatpush1.bf16.msra.mxu0 %v5717_v61 }
 0x997   :  { %4529 = vmatprep.subr.bf16.mxu0 %v5723_v23  ;;  %4561 = vmatprep.subr.bf16.mxu1 %v5735_v9 }
 0x99a   :  { %4563 = vmatpush1.bf16.msra.mxu1 %v5757_v31  ;;  %4531 = vmatpush1.bf16.msra.mxu0 %v5753_v27 }
 0x99b   :  { %4533 = vmatprep.subr.bf16.mxu0 %v5759_v35  ;;  %4565 = vmatprep.subr.bf16.mxu1 %v5771_v49 }
 0x99e   :  { %4535 = vmatpush1.bf16.msra.mxu0 %v5789_v0  ;;  %4567 = vmatpush1.bf16.msra.mxu1 %v5793_v7 }
 0x99f   :  { %4537 = vmatprep.subr.bf16.mxu0 %v5795_v10  ;;  %4569 = vmatprep.subr.bf16.mxu1 %v5807_v15 }
 0x9a2   :  { %4539 = vmatpush1.bf16.msra.mxu0 %v5825_v33  ;;  %4571 = vmatpush1.bf16.msra.mxu1 %v5829_v34 }
 0x9a3   :  { %4541 = vmatprep.subr.bf16.mxu0 %v5831_v36  ;;  %4573 = vmatprep.subr.bf16.mxu1 %v5840_v45 }
 0x9a6   :  { %4543 = vmatpush1.bf16.msra.mxu0 %v5849_v53  ;;  %4575 = vmatpush1.bf16.msra.mxu1 %v5853_v55 }
 0x9a7   :  { %4576 = vmatprep.subr.bf16.mxu0 %v4844_v52  ;;  %4600 = vmatprep.subr.bf16.mxu1 %v4844_v52 }
 0xa5c   :  { %v3024_v2 = vpop.f32.mrb[12].mxu0  ;;  %v3095_v5 = vpop.f32.mrb[2].mxu1 }
 0xa5d   :  { %v4636_v6 = vadd.f32 %v3024_v2, %v5899_v17  ;;  %v4618_v56 = vadd.f32 %v3095_v5, %v5901_v18  ;;  %v3026_v20 = vpop.f32.mrb[13].mxu0  ;;  %v3097_v21 = vpop.f32.mrb[3].mxu1 }
 0xa5e   :  { %v4637_v25 = vadd.f32 %v3026_v20, %v5903_v22  ;;  %v4619_v32 = vadd.f32 %v3097_v21, %v5905_v26  ;;  %v3358_v20 = vld [vmem:[%s6345_s4 + $0x40] sm:$0xff]  ;;  %v3359_v21 = vld [vmem:[%s6345_s4 + $0x48] sm:$0xff] }
 0xa5f   :  { %v3621_v41 = vmul.f32 -1.442695, %v4636_v6  ;;  %v3623_v42 = vmul.f32 -1.442695, %v4618_v56 }
 0xa60   :  { %v3624_v43 = vmul.f32 -1.442695, %v4619_v32  ;;  %3129 = vrot.lane.b32.xlu0 %v4637_v25, %s4843_s2  ;;  %v3622_v0 = vmul.f32 -1.442695, %v4637_v25 }
 0xa61   :  { %4801 = vpow2.f32 %v3621_v41  ;;  %v3360_v41 = vld [vmem:[%s6345_s4 + $0x50] sm:$0xff] }
 0xa62   :  { %4803 = vpow2.f32 %v3623_v42  ;;  %v3361_v42 = vld [vmem:[%s6345_s4 + $0x58] sm:$0xff] }
 0xa63   :  { %4805 = vpow2.f32 %v3624_v43  ;;  %v4592_v43 = vpack.c.bf16 %v3361_v42, %v3360_v41 }
 0xa6b   :  { %v4802_v51 = vpop.eup %4801 }
 0xa6c   :  { %v4804_v61 = vpop.eup %4803  ;;  %v3110_v1 = vadd.f32 1.0, %v4802_v51  ;;  %v3362_v51 = vld [vmem:[%s6345_s4 + $0x60] sm:$0xff] }
 0xa6d   :  { %v3122_v23 = vadd.f32 1.0, %v4804_v61  ;;  %v4806_v9 = vpop.eup %4805  ;;  %v3363_v61 = vld [vmem:[%s6345_s4 + $0x68] sm:$0xff] }
 0xa6e   :  { %4807 = vrcp.f32 %v3110_v1  ;;  %v3123_v27 = vadd.f32 1.0, %v4806_v9  ;;  %v4595_v1 = vpack.c.bf16 %v3363_v61, %v3362_v51 }
 0xa6f   :  { %4809 = vrcp.f32 %v3122_v23 }
 0xa70   :  { %4811 = vrcp.f32 %v3123_v27  ;;  %v3364_v27 = vld [vmem:[%s6345_s4 + $0x70] sm:$0xff] }
 0xa71   :  { %4813 = vpow2.f32 %v3622_v0  ;;  %v3443_v0 = vld [vmem:[%s6346_s6] sm:$0xff] }
 0xa78   :  { %v4808_v31 = vpop.eup %4807 }
 0xa79   :  { %v4810_v35 = vpop.eup %4809  ;;  %3140 = vrot.lane.b32.xlu0 %v4808_v31, %s4843_s2 }
 0xa7a   :  { %3135 = vrot.lane.b32.xlu1 %v4810_v35, %s4843_s2  ;;  %v4812_v49 = vpop.eup %4811 }
 0xa7b   :  { %v4814_v15 = vpop.eup %4813 }
 0xa7c   :  { %v3111_v53 = vadd.f32 1.0, %v4814_v15 }
 0xa7e   :  { %3145 = vrot.lane.b32.xlu1 %v4812_v49, %s4843_s2 }
 0xad2   :  { %v3130_v7 = vpop.permute.xlu0 %3129 }
 0xad3   :  { %v3132_v10 = vsel %vm1931_vm4, %v3130_v7, %v4619_v32  ;;  %v4589_v32 = vpack.c.bf16 %v3359_v21, %v3358_v20  ;;  %v3444_v7 = vld [vmem:[%s6346_s6 + $0x8] sm:$0xff] }
 0xad4   :  { %4815 = vtanh.f32 %v3132_v10  ;;  %v3445_v10 = vld [vmem:[%s6346_s6 + $0x10] sm:$0xff]  ;;  %v4601_v15 = vpack.c.bf16 %v3444_v7, %v3443_v0 }
 0xad5   :  { %4817 = vrcp.f32 %v3111_v53 }
 0xade   :  { %v4816_v45 = vpop.eup %4815 }
 0xadf   :  { %v4818_v29 = vpop.eup %4817 }
 0xaeb   :  { %v3141_v33 = vpop.permute.xlu0 %3140 }
 0xaec   :  { %v3136_v34 = vpop.permute.xlu1 %3135  ;;  %v3143_v36 = vsel %vm1931_vm4, %v3141_v33, %v4810_v35  ;;  %v3446_v33 = vld [vmem:[%s6346_s6 + $0x18] sm:$0xff] }
 0xaed   :  { %v3138_v55 = vsel %vm1931_vm4, %v4808_v31, %v3136_v34  ;;  %v3149_v13 = vmul.f32 %v3143_v36, %v6168_v48  ;;  %v3365_v31 = vld [vmem:[%s6345_s4 + $0x78] sm:$0xff]  ;;  %v4604_v34 = vpack.c.bf16 %v3446_v33, %v3445_v10  ;;  %v3448_v36 = vld [vmem:[%s6346_s6 + $0x28] sm:$0xff] }
 0xaee   :  { %v3150_v28 = vmul.f32 %v4816_v45, %v3138_v55  ;;  %v4598_v35 = vpack.c.bf16 %v3365_v31, %v3364_v27 }
 0xaf0   :  { %v6216_v40 = vadd.f32 %v3150_v28, %v3149_v13  ;;  %v3146_v50 = vpop.permute.xlu1 %3145 }
 0xaf1   :  { %v3148_v38 = vsel %vm1931_vm4, %v4818_v29, %v3146_v50 }
 0xaf2   :  { %4819 = vtanh.f32 %v6216_v40 }
 0xafc   :  { %v4820_v37 = vpop.eup %4819 }
 0xafd   :  { %v3153_v46 = vmul.f32 %v4820_v37, %v3148_v38 }
 0xaff   :  { %3219 = vmatmul.mubr.f32.vlgmr.msra.gmra.mrb[14].mxu0 %v3153_v46  ;;  %3290 = vmatmul.mubr.f32.vlgmr.msra.gmra.mrb[0].mxu1 %v3153_v46 }
 0xb00   :  { %4578 = vmatpush3.bf16.msra.mxu0 %v4577_v58  ;;  %3690 = vmatprep.mubr.msk.f32.mxu0 %vm4845_vm5, %v4841_v3 }
 0xb01   :  { %4579 = vmatprep.subr.bf16.mxu0 %v4844_v52  ;;  %3709 = vmatprep.mubr.msk.f32.mxu1 %vm4845_vm5, %v4841_v3  ;;  %v3447_v3 = vld [vmem:[%s6346_s6 + $0x20] sm:$0xff] }
 0xb02   :  { %4602 = vmatpush3.bf16.msra.mxu1 %v4601_v15  ;;  %v4607_v45 = vpack.c.bf16 %v3448_v36, %v3447_v3 }
 0xb03   :  { %4603 = vmatprep.subr.bf16.mxu1 %v4844_v52 }
 0xb04   :  { %4581 = vmatpush3.bf16.msra.mxu0 %v4580_v4 }
 0xb05   :  { %4582 = vmatprep.subr.bf16.mxu0 %v4844_v52 }
 0xb06   :  { %4605 = vmatpush3.bf16.msra.mxu1 %v4604_v34 }
 0xb07   :  { %4606 = vmatprep.subr.bf16.mxu1 %v4844_v52 }
 0xb08   :  { %4584 = vmatpush3.bf16.msra.mxu0 %v4583_v30  ;;  %v3629_v30 = vld [vmem:[%s6347_s5] ss:$0 sm:$0xff] }
 0xb09   :  { %4585 = vmatprep.subr.bf16.mxu0 %v4844_v52 }
 0xb0a   :  { %4608 = vmatpush3.bf16.msra.mxu1 %v4607_v45 }
 0xb0b   :  { %4609 = vmatprep.subr.bf16.mxu1 %v4844_v52 }
 0xbd2   :  { %v3220_v44 = vpop.f32.mrb[14].mxu0  ;;  %v3291_v47 = vpop.f32.mrb[0].mxu1 }
 0xbd3   :  { %v4640_v54 = vadd.f32 %v3220_v44, %v5899_v17  ;;  %v4614_v62 = vadd.f32 %v3291_v47, %v5901_v18  ;;  %v3222_v63 = vpop.f32.mrb[15].mxu0  ;;  %v3293_v48 = vpop.f32.mrb[1].mxu1  ;;  %v3356_v17 = vld [vmem:[%s6345_s4 + $0x30] sm:$0xff]  ;;  %v3357_v18 = vld [vmem:[%s6345_s4 + $0x38] sm:$0xff] }
 0xbd4   :  { %v6245_v11 = vadd.f32 %v3222_v63, %v5903_v22  ;;  %v6248_v12 = vadd.f32 %v3293_v48, %v5905_v26  ;;  %v4586_v26 = vpack.c.bf16 %v3357_v18, %v3356_v17  ;;  %v3449_v44 = vld [vmem:[%s6346_s6 + $0x30] sm:$0xff]  ;;  %v3450_v47 = vld [vmem:[%s6346_s6 + $0x38] sm:$0xff]  ;;  %v3630_v48 = vld [vmem:[%s6349_s7] ss:$0 sm:$0xff] }
 0xbd5   :  { %v3625_v14 = vmul.f32 -1.442695, %v4640_v54  ;;  %v3627_v16 = vmul.f32 -1.442695, %v4614_v62 }
 0xbd6   :  { %v3628_v19 = vmul.f32 -1.442695, %v6248_v12  ;;  %3325 = vrot.lane.b32.xlu0 %v6245_v11, %s4843_s2  ;;  %4587 = vmatpush3.bf16.msra.mxu0 %v4586_v26  ;;  %v3626_v53 = vmul.f32 -1.442695, %v6245_v11 }
 0xbd7   :  { %4821 = vpow2.f32 %v3625_v14  ;;  %4588 = vmatprep.subr.bf16.mxu0 %v4844_v52 }
 0xbd8   :  { %4823 = vpow2.f32 %v3627_v16 }
 0xbd9   :  { %4825 = vpow2.f32 %v3628_v19 }
 0xbda   :  { %4590 = vmatpush3.bf16.msra.mxu0 %v4589_v32 }
 0xbdb   :  { %4591 = vmatprep.subr.bf16.mxu0 %v4844_v52 }
 0xbde   :  { %4593 = vmatpush3.bf16.msra.mxu0 %v4592_v43 }
 0xbdf   :  { %4594 = vmatprep.subr.bf16.mxu0 %v4844_v52 }
 0xbe1   :  { %v4822_v22 = vpop.eup %4821 }
 0xbe2   :  { %v4824_v2 = vpop.eup %4823  ;;  %v3306_v5 = vadd.f32 1.0, %v4822_v22  ;;  %4596 = vmatpush3.bf16.msra.mxu0 %v4595_v1 }
 0xbe3   :  { %v3318_v6 = vadd.f32 1.0, %v4824_v2  ;;  %v4826_v56 = vpop.eup %4825  ;;  %4597 = vmatprep.subr.bf16.mxu0 %v4844_v52 }
 0xbe4   :  { %4827 = vrcp.f32 %v3306_v5  ;;  %v3319_v25 = vadd.f32 1.0, %v4826_v56 }
 0xbe5   :  { %4829 = vrcp.f32 %v3318_v6 }
 0xbe6   :  { %4831 = vrcp.f32 %v3319_v25  ;;  %4599 = vmatpush3.bf16.msra.mxu0 %v4598_v35 }
 0xbe7   :  { %4833 = vpow2.f32 %v3626_v53 }
 0xbee   :  { %v4828_v23 = vpop.eup %4827 }
 0xbef   :  { %v4830_v9 = vpop.eup %4829  ;;  %3336 = vrot.lane.b32.xlu0 %v4828_v23, %s4843_s2 }
 0xbf0   :  { %3331 = vrot.lane.b32.xlu1 %v4830_v9, %s4843_s2  ;;  %v4832_v49 = vpop.eup %4831 }
 0xbf1   :  { %v4834_v28 = vpop.eup %4833 }
 0xbf2   :  { %v3307_v46 = vadd.f32 1.0, %v4834_v28 }
 0xbf4   :  { %3341 = vrot.lane.b32.xlu1 %v4832_v49, %s4843_s2 }
 0xc48   :  { %v3326_v55 = vpop.permute.xlu0 %3325 }
 0xc49   :  { %v3328_v13 = vsel %vm1931_vm4, %v3326_v55, %v6248_v12 }
 0xc4a   :  { %4835 = vtanh.f32 %v3328_v13 }
 0xc4b   :  { %4837 = vrcp.f32 %v3307_v46 }
 0xc54   :  { %v4836_v38 = vpop.eup %4835 }
 0xc55   :  { %v4838_v24 = vpop.eup %4837 }
 0xc61   :  { %v3337_v50 = vpop.permute.xlu0 %3336 }
 0xc62   :  { %v3332_v29 = vpop.permute.xlu1 %3331  ;;  %v3339_v37 = vsel %vm1931_vm4, %v3337_v50, %v4830_v9 }
 0xc63   :  { %v3334_v57 = vsel %vm1931_vm4, %v4828_v23, %v3332_v29  ;;  %v3345_v59 = vmul.f32 %v3339_v37, %v6216_v40  ;;  %v4610_v40 = vpack.c.bf16 %v3450_v47, %v3449_v44 }
 0xc64   :  { %v3346_v52 = vmul.f32 %v4836_v38, %v3334_v57 }
 0xc65   :  { %4611 = vmatpush3.bf16.msra.mxu1 %v4610_v40 }
 0xc66   :  { %v3347_v60 = vadd.f32 %v3346_v52, %v3345_v59  ;;  %v3342_v58 = vpop.permute.xlu1 %3341 }
 0xc67   :  { %v3344_v8 = vsel %vm1931_vm4, %v4838_v24, %v3342_v58 }
 0xc68   :  { %4839 = vtanh.f32 %v3347_v60 }
 0xc72   :  { %v4840_v4 = vpop.eup %4839 }
 0xc73   :  { %v3349_v39 = vmul.f32 %v4840_v4, %v3344_v8 }
 0xc75   :  { %3691 = vmatmul.mubr.f32.vlgmr.msra.gmra.mrb[16].mxu0 %v3349_v39 }
 0xd48   :  { %v3439_v54 = vpop.f32.mrb[16].mxu0 }
 0xd49   :  { %v3440_v62 = vadd.f32 %v3629_v30, %v3439_v54  ;;  %v3692_v63 = vpop.f32.mrb[17].mxu0 }
 0xd4b   :  { %3531 = vst.msk [vmem:[%s6348_s8] sm:$0xff] %vm1931_vm4, %v3440_v62  ;;  %3710 = vmatmul.mubr.msk.f32.vlgmr.msra.gmra.mrb[16].mxu1 %vm1931_vm4, %v3440_v62 }
 0xe1e   :  { %v3527_v11 = vpop.f32.mrb[16].mxu1 }
 0xe1f   :  { %v3528_v12 = vadd.f32 %v3630_v48, %v3527_v11  ;;  %v3711_v14 = vpop.f32.mrb[17].mxu1 }
 0xe21   :  { %3533 = vst.msk [vmem:[%s6350_s9] sm:$0xff] %vm3532_vm6, %v3528_v12 }

</bundles_post_ra>
